<compile_context>
chip_gen: v7x
topology: tpu7x:2x2x1
jax: 0.10.0
libtpu: 0.0.40
codegen_flags: <defaults>
</compile_context>

<pallas_src>
import functools

import jax
import jax.numpy as jnp
from jax.experimental import pallas as pl
from jax.experimental.pallas import tpu as pltpu


# Conservative VMEM-residency threshold for the embedding table: must fit the
# smallest-VMEM generation (v7x: 64 MiB physical, 32 MiB default scoped) with
# headroom for scratch and double-buffered output tiles.
_VMEM_TABLE_LIMIT_BYTES = 24 * 1024 * 1024
_PROB_LANES = 128  # lane-dense prob output block width


def skipgram_kernel(all_idx_ref, tgt_idx_ref,     # scalar prefetch (SMEM)
                    emb_ref,                      # (V, D) table, VMEM-resident
                    ctx_sum_ref, prob_ref,        # outputs: (TB, D), (TB, 128)
                    cn_scr, tgt_scr,              # VMEM scratch
                    *, C, K, TB):
    """One grid step == one block of TB batch elements."""
    CK = C + K
    D = emb_ref.shape[1]
    blk = pl.program_id(0)

    # ---- Gather: TB * (C + K + 1) rows, dynamic-row loads from the resident
    # table (no HBM DMAs, no semaphores).  Destinations are static, sources are
    # SMEM-scalar-indexed dynamic sublane slices.
    for t in range(TB):
        b = blk * TB + t
        tgt_scr[pl.ds(t, 1), :] = emb_ref[pl.ds(tgt_idx_ref[b], 1), :]
        for j in range(CK):
            cn_scr[t, pl.ds(j, 1), :] = emb_ref[pl.ds(all_idx_ref[b, j], 1), :]

    cn = cn_scr[...].astype(jnp.float32)           # (TB, CK, D) ctx rows then neg rows
    tgt = tgt_scr[...].astype(jnp.float32)         # (TB, D)     target rows

    # <row, target> per row: VPU multiply + XLU lane reduce (MXU left idle).
    scores = jnp.sum(cn * jnp.expand_dims(tgt, 1), axis=2)      # (TB, CK)
    e = jnp.exp(scores)                                          # EUP
    # NOTE: like the PyTorch reference, no max-subtraction; assumes scaled
    # embeddings so exp() stays finite.

    # Masked reduces (no sublane slices) -> works for arbitrary C, K.
    col = jax.lax.broadcasted_iota(jnp.int32, (TB, CK), 1)
    is_ctx = col < C
    y = jnp.sum(jnp.where(is_ctx, e, 0.0), axis=1, keepdims=True)      # (TB, 1)
    fenmu = jnp.sum(jnp.where(is_ctx, 0.0, e), axis=1, keepdims=True)  # (TB, 1)
    prob = y * pl.reciprocal(fenmu, approx=True)                       # EUP divide

    # Context-embedding sum, full (TB, D) tile store.
    mask3 = jax.lax.broadcasted_iota(jnp.int32, (TB, CK, D), 1) < C
    ctx_sum_ref[...] = jnp.sum(jnp.where(mask3, cn, 0.0), axis=1)

    # Per-element partial probs, lane-dense (TB, 128) store; summed in wrapper.
    prob_ref[...] = jnp.broadcast_to(prob, (TB, prob_ref.shape[1]))


def skipgram_forward(emb_table, x_context, y_target, neg_samples, *, block_b=8):
    """x_context: (B,1,C) int, y_target: (B,1,1) int, neg_samples: (B,1,K) int.

    Returns (y_context.squeeze().sum(1) -> (B, D) f32, prob_of_y_tar.sum() scalar),
    matching SkipgramModel.forward.
    """
    B = x_context.shape[0]
    C = x_context.shape[-1]
    K = neg_samples.shape[-1]
    V, D = emb_table.shape

    table_bytes = emb_table.size * emb_table.dtype.itemsize
    if table_bytes > _VMEM_TABLE_LIMIT_BYTES:
        # TODO(synk): for tables beyond the per-generation VMEM budget, fall
        # back to an HBM-resident table with a manual multi-buffered DMA row
        # gather (prefetch-before-wait, one DMA semaphore per slot).
        raise NotImplementedError(
            "embedding table too large for the VMEM-resident fast path")

    TB = block_b
    nb = pl.cdiv(B, TB)
    B_pad = nb * TB

    # Indices ride the scalar-prefetch (SMEM) path; context & negative indices
    # are concatenated so each batch element gathers into one (C+K, D) slab.
    all_idx = jnp.concatenate(
        [x_context.reshape(B, C), neg_samples.reshape(B, K)],
        axis=1).astype(jnp.int32)                                 # (B, C+K)
    tgt_idx = y_target.reshape(B).astype(jnp.int32)               # (B,)
    if B_pad != B:
        all_idx = jnp.pad(all_idx, ((0, B_pad - B), (0, 0)))
        tgt_idx = jnp.pad(tgt_idx, ((0, B_pad - B),))

    grid_spec = pltpu.PrefetchScalarGridSpec(
        num_scalar_prefetch=2,
        grid=(nb,),
        in_specs=[
            # Whole table resident in VMEM; block index never changes, so it is
            # fetched once and kept across grid steps.
            pl.BlockSpec((V, D), lambda blk, *_: (0, 0)),
        ],
        out_specs=(
            pl.BlockSpec((TB, D), lambda blk, *_: (blk, 0)),            # ctx_sum
            pl.BlockSpec((TB, _PROB_LANES), lambda blk, *_: (blk, 0)),  # prob partials
        ),
        scratch_shapes=[
            pltpu.VMEM((TB, C + K, D), emb_table.dtype),   # gathered ctx+neg rows
            pltpu.VMEM((TB, D), emb_table.dtype),          # gathered target rows
        ],
    )

    ctx_sum_pad, prob_pad = pl.pallas_call(
        functools.partial(skipgram_kernel, C=C, K=K, TB=TB),
        out_shape=(jax.ShapeDtypeStruct((B_pad, D), jnp.float32),
                   jax.ShapeDtypeStruct((B_pad, _PROB_LANES), jnp.float32)),
        grid_spec=grid_spec,
        compiler_params=pltpu.CompilerParams(
            # No cross-step accumulator anymore -> batch blocks are independent
            # (lets v7x shard across its 2 TensorCores; no-op on v5e/v6e).
            dimension_semantics=("parallel",),
            vmem_limit_bytes=32 * 1024 * 1024,
        ),
    )(all_idx, tgt_idx, emb_table)

    ctx_sum = ctx_sum_pad[:B]
    prob_sum = jnp.sum(prob_pad[:B, 0])
    return ctx_sum, prob_sum


def skipgram_reference(emb_table, x_context, y_target, neg_samples):
    """Pure-JAX mirror of the PyTorch forward (for verification)."""
    emb = emb_table.astype(jnp.float32)
    y_t = emb[y_target]                              # (B,1,1,D)
    y_c = emb[x_context]                             # (B,1,C,D)
    n_e = emb[neg_samples]                           # (B,1,K,D)
    y = jnp.exp(jnp.matmul(y_c, jnp.swapaxes(y_t, 2, 3))).squeeze().sum(-1)
    fenmu = jnp.exp(jnp.matmul(n_e, jnp.swapaxes(y_t, 2, 3)).squeeze()).sum(-1)
    prob = y / fenmu
    return y_c.squeeze().sum(1).squeeze(), prob.sum(-1)


if __name__ == "__main__":
    V, D = 256, 128          # vocabulary_size, embedding_dim (D lane-dense)
    B, C, K = 16, 8, 8       # batch (2 grid blocks of 8), context, negatives
    PADDING_IDX = 0

    key = jax.random.PRNGKey(0)
    k_emb, k_ctx, k_tgt, k_neg = jax.random.split(key, 4)

    # nn.Embedding-style init, scaled so exp(scores) stays well-conditioned;
    # padding row zeroed.  (bf16 tables also work — the kernel upcasts to f32.)
    emb_table = 0.1 * jax.random.normal(k_emb, (V, D), dtype=jnp.float32)
    emb_table = emb_table.at[PADDING_IDX].set(0.0)

    x_context = jax.random.randint(k_ctx, (B, 1, C), 0, V, dtype=jnp.int32)
    y_target = jax.random.randint(k_tgt, (B, 1, 1), 1, V, dtype=jnp.int32)
    neg_samples = jax.random.randint(k_neg, (B, 1, K), 0, V, dtype=jnp.int32)

    ctx_sum, prob_sum = jax.block_until_ready(
        skipgram_forward(emb_table, x_context, y_target, neg_samples))

    ref_ctx_sum, ref_prob_sum = skipgram_reference(
        emb_table, x_context, y_target, neg_samples)

    assert ctx_sum.shape == (B, D)
    assert jnp.allclose(ctx_sum, ref_ctx_sum, atol=1e-3, rtol=1e-3)
    assert jnp.allclose(prob_sum, ref_prob_sum, atol=1e-3, rtol=1e-3)

    print("KERNEL_OK")
</pallas_src>

<mosaic_0001>
module attributes {stable_mosaic.version = 11 : i64} {
  func.func @skipgram_kernel(%arg0: i32, %arg1: memref<16x16xi32, #tpu.memory_space<smem>>, %arg2: memref<16xi32, #tpu.memory_space<smem>>, %arg3: memref<256x128xf32, #tpu.memory_space<vmem>>, %arg4: memref<8x128xf32, #tpu.memory_space<vmem>>, %arg5: memref<8x128xf32, #tpu.memory_space<vmem>>, %arg6: memref<8x16x128xf32, #tpu.memory_space<vmem>>, %arg7: memref<8x128xf32, #tpu.memory_space<vmem>>) attributes {dimension_semantics = [#tpu.dimension_semantics<parallel>], iteration_bounds = array<i64: 2>, scalar_prefetch = 2 : i64, scratch_operands = 2 : i64, tpu.core_type = #tpu.core_type<tc>, window_params = [{pipeline_mode = #tpu.pipeline_mode<synchronous>, transform_indices = @transform_0, window_bounds = array<i64: 256, 128>}, {transform_indices = @transform_1, window_bounds = array<i64: 8, 128>}, {transform_indices = @transform_2, window_bounds = array<i64: 8, 128>}]} {
    %c8_i32 = arith.constant 8 : i32
    %0 = arith.muli %arg0, %c8_i32 : i32
    %c0_i32 = arith.constant 0 : i32
    %1 = arith.addi %0, %c0_i32 : i32
    %2 = arith.index_cast %1 : i32 to index
    %3 = memref.load %arg2[%2] : memref<16xi32, #tpu.memory_space<smem>>
    %4 = arith.index_cast %3 : i32 to index
    %c0 = arith.constant 0 : index
    %5 = vector.load %arg3[%4, %c0] : memref<256x128xf32, #tpu.memory_space<vmem>>, vector<1x128xf32>
    %c0_0 = arith.constant 0 : index
    %c0_1 = arith.constant 0 : index
    %6 = vector.load %arg7[%c0_0, %c0_1] : memref<8x128xf32, #tpu.memory_space<vmem>>, vector<1x128xf32>
    tpu.vector_store %arg7[%c0_0, %c0_1], %5 {strides = array<i32>} : memref<8x128xf32, #tpu.memory_space<vmem>>, vector<1x128xf32>,
    %7 = arith.index_cast %1 : i32 to index
    %c0_2 = arith.constant 0 : index
    %8 = memref.load %arg1[%7, %c0_2] : memref<16x16xi32, #tpu.memory_space<smem>>
    %9 = arith.index_cast %8 : i32 to index
    %c0_3 = arith.constant 0 : index
    %10 = vector.load %arg3[%9, %c0_3] : memref<256x128xf32, #tpu.memory_space<vmem>>, vector<1x128xf32>
    %c0_4 = arith.constant 0 : index
    %c0_5 = arith.constant 0 : index
    %c0_6 = arith.constant 0 : index
    %11 = vector.load %arg6[%c0_4, %c0_5, %c0_6] : memref<8x16x128xf32, #tpu.memory_space<vmem>>, vector<1x1x128xf32>
    %12 = vector.shape_cast %11 : vector<1x1x128xf32> to vector<1x128xf32>
    %13 = vector.shape_cast %10 : vector<1x128xf32> to vector<1x1x128xf32>
    tpu.vector_store %arg6[%c0_4, %c0_5, %c0_6], %13 {strides = array<i32>} : memref<8x16x128xf32, #tpu.memory_space<vmem>>, vector<1x1x128xf32>,
    %14 = arith.index_cast %1 : i32 to index
    %c1 = arith.constant 1 : index
    %15 = memref.load %arg1[%14, %c1] : memref<16x16xi32, #tpu.memory_space<smem>>
    %16 = arith.index_cast %15 : i32 to index
    %c0_7 = arith.constant 0 : index
    %17 = vector.load %arg3[%16, %c0_7] : memref<256x128xf32, #tpu.memory_space<vmem>>, vector<1x128xf32>
    %c0_8 = arith.constant 0 : index
    %c1_9 = arith.constant 1 : index
    %c0_10 = arith.constant 0 : index
    %18 = vector.load %arg6[%c0_8, %c1_9, %c0_10] : memref<8x16x128xf32, #tpu.memory_space<vmem>>, vector<1x1x128xf32>
    %19 = vector.shape_cast %18 : vector<1x1x128xf32> to vector<1x128xf32>
    %20 = vector.shape_cast %17 : vector<1x128xf32> to vector<1x1x128xf32>
    tpu.vector_store %arg6[%c0_8, %c1_9, %c0_10], %20 {strides = array<i32>} : memref<8x16x128xf32, #tpu.memory_space<vmem>>, vector<1x1x128xf32>,
    %21 = arith.index_cast %1 : i32 to index
    %c2 = arith.constant 2 : index
    %22 = memref.load %arg1[%21, %c2] : memref<16x16xi32, #tpu.memory_space<smem>>
    %23 = arith.index_cast %22 : i32 to index
    %c0_11 = arith.constant 0 : index
    %24 = vector.load %arg3[%23, %c0_11] : memref<256x128xf32, #tpu.memory_space<vmem>>, vector<1x128xf32>
    %c0_12 = arith.constant 0 : index
    %c2_13 = arith.constant 2 : index
    %c0_14 = arith.constant 0 : index
    %25 = vector.load %arg6[%c0_12, %c2_13, %c0_14] : memref<8x16x128xf32, #tpu.memory_space<vmem>>, vector<1x1x128xf32>
    %26 = vector.shape_cast %25 : vector<1x1x128xf32> to vector<1x128xf32>
    %27 = vector.shape_cast %24 : vector<1x128xf32> to vector<1x1x128xf32>
    tpu.vector_store %arg6[%c0_12, %c2_13, %c0_14], %27 {strides = array<i32>} : memref<8x16x128xf32, #tpu.memory_space<vmem>>, vector<1x1x128xf32>,
    %28 = arith.index_cast %1 : i32 to index
    %c3 = arith.constant 3 : index
    %29 = memref.load %arg1[%28, %c3] : memref<16x16xi32, #tpu.memory_space<smem>>
    %30 = arith.index_cast %29 : i32 to index
    %c0_15 = arith.constant 0 : index
    %31 = vector.load %arg3[%30, %c0_15] : memref<256x128xf32, #tpu.memory_space<vmem>>, vector<1x128xf32>
    %c0_16 = arith.constant 0 : index
    %c3_17 = arith.constant 3 : index
    %c0_18 = arith.constant 0 : index
    %32 = vector.load %arg6[%c0_16, %c3_17, %c0_18] : memref<8x16x128xf32, #tpu.memory_space<vmem>>, vector<1x1x128xf32>
    %33 = vector.shape_cast %32 : vector<1x1x128xf32> to vector<1x128xf32>
    %34 = vector.shape_cast %31 : vector<1x128xf32> to vector<1x1x128xf32>
    tpu.vector_store %arg6[%c0_16, %c3_17, %c0_18], %34 {strides = array<i32>} : memref<8x16x128xf32, #tpu.memory_space<vmem>>, vector<1x1x128xf32>,
    %35 = arith.index_cast %1 : i32 to index
    %c4 = arith.constant 4 : index
    %36 = memref.load %arg1[%35, %c4] : memref<16x16xi32, #tpu.memory_space<smem>>
    %37 = arith.index_cast %36 : i32 to index
    %c0_19 = arith.constant 0 : index
    %38 = vector.load %arg3[%37, %c0_19] : memref<256x128xf32, #tpu.memory_space<vmem>>, vector<1x128xf32>
    %c0_20 = arith.constant 0 : index
    %c4_21 = arith.constant 4 : index
    %c0_22 = arith.constant 0 : index
    %39 = vector.load %arg6[%c0_20, %c4_21, %c0_22] : memref<8x16x128xf32, #tpu.memory_space<vmem>>, vector<1x1x128xf32>
    %40 = vector.shape_cast %39 : vector<1x1x128xf32> to vector<1x128xf32>
    %41 = vector.shape_cast %38 : vector<1x128xf32> to vector<1x1x128xf32>
    tpu.vector_store %arg6[%c0_20, %c4_21, %c0_22], %41 {strides = array<i32>} : memref<8x16x128xf32, #tpu.memory_space<vmem>>, vector<1x1x128xf32>,
    %42 = arith.index_cast %1 : i32 to index
    %c5 = arith.constant 5 : index
    %43 = memref.load %arg1[%42, %c5] : memref<16x16xi32, #tpu.memory_space<smem>>
    %44 = arith.index_cast %43 : i32 to index
    %c0_23 = arith.constant 0 : index
    %45 = vector.load %arg3[%44, %c0_23] : memref<256x128xf32, #tpu.memory_space<vmem>>, vector<1x128xf32>
    %c0_24 = arith.constant 0 : index
    %c5_25 = arith.constant 5 : index
    %c0_26 = arith.constant 0 : index
    %46 = vector.load %arg6[%c0_24, %c5_25, %c0_26] : memref<8x16x128xf32, #tpu.memory_space<vmem>>, vector<1x1x128xf32>
    %47 = vector.shape_cast %46 : vector<1x1x128xf32> to vector<1x128xf32>
    %48 = vector.shape_cast %45 : vector<1x128xf32> to vector<1x1x128xf32>
    tpu.vector_store %arg6[%c0_24, %c5_25, %c0_26], %48 {strides = array<i32>} : memref<8x16x128xf32, #tpu.memory_space<vmem>>, vector<1x1x128xf32>,
    %49 = arith.index_cast %1 : i32 to index
    %c6 = arith.constant 6 : index
    %50 = memref.load %arg1[%49, %c6] : memref<16x16xi32, #tpu.memory_space<smem>>
    %51 = arith.index_cast %50 : i32 to index
    %c0_27 = arith.constant 0 : index
    %52 = vector.load %arg3[%51, %c0_27] : memref<256x128xf32, #tpu.memory_space<vmem>>, vector<1x128xf32>
    %c0_28 = arith.constant 0 : index
    %c6_29 = arith.constant 6 : index
    %c0_30 = arith.constant 0 : index
    %53 = vector.load %arg6[%c0_28, %c6_29, %c0_30] : memref<8x16x128xf32, #tpu.memory_space<vmem>>, vector<1x1x128xf32>
    %54 = vector.shape_cast %53 : vector<1x1x128xf32> to vector<1x128xf32>
    %55 = vector.shape_cast %52 : vector<1x128xf32> to vector<1x1x128xf32>
    tpu.vector_store %arg6[%c0_28, %c6_29, %c0_30], %55 {strides = array<i32>} : memref<8x16x128xf32, #tpu.memory_space<vmem>>, vector<1x1x128xf32>,
    %56 = arith.index_cast %1 : i32 to index
    %c7 = arith.constant 7 : index
    %57 = memref.load %arg1[%56, %c7] : memref<16x16xi32, #tpu.memory_space<smem>>
    %58 = arith.index_cast %57 : i32 to index
    %c0_31 = arith.constant 0 : index
    %59 = vector.load %arg3[%58, %c0_31] : memref<256x128xf32, #tpu.memory_space<vmem>>, vector<1x128xf32>
    %c0_32 = arith.constant 0 : index
    %c7_33 = arith.constant 7 : index
    %c0_34 = arith.constant 0 : index
    %60 = vector.load %arg6[%c0_32, %c7_33, %c0_34] : memref<8x16x128xf32, #tpu.memory_space<vmem>>, vector<1x1x128xf32>
    %61 = vector.shape_cast %60 : vector<1x1x128xf32> to vector<1x128xf32>
    %62 = vector.shape_cast %59 : vector<1x128xf32> to vector<1x1x128xf32>
    tpu.vector_store %arg6[%c0_32, %c7_33, %c0_34], %62 {strides = array<i32>} : memref<8x16x128xf32, #tpu.memory_space<vmem>>, vector<1x1x128xf32>,
    %63 = arith.index_cast %1 : i32 to index
    %c8 = arith.constant 8 : index
    %64 = memref.load %arg1[%63, %c8] : memref<16x16xi32, #tpu.memory_space<smem>>
    %65 = arith.index_cast %64 : i32 to index
    %c0_35 = arith.constant 0 : index
    %66 = vector.load %arg3[%65, %c0_35] : memref<256x128xf32, #tpu.memory_space<vmem>>, vector<1x128xf32>
    %c0_36 = arith.constant 0 : index
    %c8_37 = arith.constant 8 : index
    %c0_38 = arith.constant 0 : index
    %67 = vector.load %arg6[%c0_36, %c8_37, %c0_38] : memref<8x16x128xf32, #tpu.memory_space<vmem>>, vector<1x1x128xf32>
    %68 = vector.shape_cast %67 : vector<1x1x128xf32> to vector<1x128xf32>
    %69 = vector.shape_cast %66 : vector<1x128xf32> to vector<1x1x128xf32>
    tpu.vector_store %arg6[%c0_36, %c8_37, %c0_38], %69 {strides = array<i32>} : memref<8x16x128xf32, #tpu.memory_space<vmem>>, vector<1x1x128xf32>,
    %70 = arith.index_cast %1 : i32 to index
    %c9 = arith.constant 9 : index
    %71 = memref.load %arg1[%70, %c9] : memref<16x16xi32, #tpu.memory_space<smem>>
    %72 = arith.index_cast %71 : i32 to index
    %c0_39 = arith.constant 0 : index
    %73 = vector.load %arg3[%72, %c0_39] : memref<256x128xf32, #tpu.memory_space<vmem>>, vector<1x128xf32>
    %c0_40 = arith.constant 0 : index
    %c9_41 = arith.constant 9 : index
    %c0_42 = arith.constant 0 : index
    %74 = vector.load %arg6[%c0_40, %c9_41, %c0_42] : memref<8x16x128xf32, #tpu.memory_space<vmem>>, vector<1x1x128xf32>
    %75 = vector.shape_cast %74 : vector<1x1x128xf32> to vector<1x128xf32>
    %76 = vector.shape_cast %73 : vector<1x128xf32> to vector<1x1x128xf32>
    tpu.vector_store %arg6[%c0_40, %c9_41, %c0_42], %76 {strides = array<i32>} : memref<8x16x128xf32, #tpu.memory_space<vmem>>, vector<1x1x128xf32>,
    %77 = arith.index_cast %1 : i32 to index
    %c10 = arith.constant 10 : index
    %78 = memref.load %arg1[%77, %c10] : memref<16x16xi32, #tpu.memory_space<smem>>
    %79 = arith.index_cast %78 : i32 to index
    %c0_43 = arith.constant 0 : index
    %80 = vector.load %arg3[%79, %c0_43] : memref<256x128xf32, #tpu.memory_space<vmem>>, vector<1x128xf32>
    %c0_44 = arith.constant 0 : index
    %c10_45 = arith.constant 10 : index
    %c0_46 = arith.constant 0 : index
    %81 = vector.load %arg6[%c0_44, %c10_45, %c0_46] : memref<8x16x128xf32, #tpu.memory_space<vmem>>, vector<1x1x128xf32>
    %82 = vector.shape_cast %81 : vector<1x1x128xf32> to vector<1x128xf32>
    %83 = vector.shape_cast %80 : vector<1x128xf32> to vector<1x1x128xf32>
    tpu.vector_store %arg6[%c0_44, %c10_45, %c0_46], %83 {strides = array<i32>} : memref<8x16x128xf32, #tpu.memory_space<vmem>>, vector<1x1x128xf32>,
    %84 = arith.index_cast %1 : i32 to index
    %c11 = arith.constant 11 : index
    %85 = memref.load %arg1[%84, %c11] : memref<16x16xi32, #tpu.memory_space<smem>>
    %86 = arith.index_cast %85 : i32 to index
    %c0_47 = arith.constant 0 : index
    %87 = vector.load %arg3[%86, %c0_47] : memref<256x128xf32, #tpu.memory_space<vmem>>, vector<1x128xf32>
    %c0_48 = arith.constant 0 : index
    %c11_49 = arith.constant 11 : index
    %c0_50 = arith.constant 0 : index
    %88 = vector.load %arg6[%c0_48, %c11_49, %c0_50] : memref<8x16x128xf32, #tpu.memory_space<vmem>>, vector<1x1x128xf32>
    %89 = vector.shape_cast %88 : vector<1x1x128xf32> to vector<1x128xf32>
    %90 = vector.shape_cast %87 : vector<1x128xf32> to vector<1x1x128xf32>
    tpu.vector_store %arg6[%c0_48, %c11_49, %c0_50], %90 {strides = array<i32>} : memref<8x16x128xf32, #tpu.memory_space<vmem>>, vector<1x1x128xf32>,
    %91 = arith.index_cast %1 : i32 to index
    %c12 = arith.constant 12 : index
    %92 = memref.load %arg1[%91, %c12] : memref<16x16xi32, #tpu.memory_space<smem>>
    %93 = arith.index_cast %92 : i32 to index
    %c0_51 = arith.constant 0 : index
    %94 = vector.load %arg3[%93, %c0_51] : memref<256x128xf32, #tpu.memory_space<vmem>>, vector<1x128xf32>
    %c0_52 = arith.constant 0 : index
    %c12_53 = arith.constant 12 : index
    %c0_54 = arith.constant 0 : index
    %95 = vector.load %arg6[%c0_52, %c12_53, %c0_54] : memref<8x16x128xf32, #tpu.memory_space<vmem>>, vector<1x1x128xf32>
    %96 = vector.shape_cast %95 : vector<1x1x128xf32> to vector<1x128xf32>
    %97 = vector.shape_cast %94 : vector<1x128xf32> to vector<1x1x128xf32>
    tpu.vector_store %arg6[%c0_52, %c12_53, %c0_54], %97 {strides = array<i32>} : memref<8x16x128xf32, #tpu.memory_space<vmem>>, vector<1x1x128xf32>,
    %98 = arith.index_cast %1 : i32 to index
    %c13 = arith.constant 13 : index
    %99 = memref.load %arg1[%98, %c13] : memref<16x16xi32, #tpu.memory_space<smem>>
    %100 = arith.index_cast %99 : i32 to index
    %c0_55 = arith.constant 0 : index
    %101 = vector.load %arg3[%100, %c0_55] : memref<256x128xf32, #tpu.memory_space<vmem>>, vector<1x128xf32>
    %c0_56 = arith.constant 0 : index
    %c13_57 = arith.constant 13 : index
    %c0_58 = arith.constant 0 : index
    %102 = vector.load %arg6[%c0_56, %c13_57, %c0_58] : memref<8x16x128xf32, #tpu.memory_space<vmem>>, vector<1x1x128xf32>
    %103 = vector.shape_cast %102 : vector<1x1x128xf32> to vector<1x128xf32>
    %104 = vector.shape_cast %101 : vector<1x128xf32> to vector<1x1x128xf32>
    tpu.vector_store %arg6[%c0_56, %c13_57, %c0_58], %104 {strides = array<i32>} : memref<8x16x128xf32, #tpu.memory_space<vmem>>, vector<1x1x128xf32>,
    %105 = arith.index_cast %1 : i32 to index
    %c14 = arith.constant 14 : index
    %106 = memref.load %arg1[%105, %c14] : memref<16x16xi32, #tpu.memory_space<smem>>
    %107 = arith.index_cast %106 : i32 to index
    %c0_59 = arith.constant 0 : index
    %108 = vector.load %arg3[%107, %c0_59] : memref<256x128xf32, #tpu.memory_space<vmem>>, vector<1x128xf32>
    %c0_60 = arith.constant 0 : index
    %c14_61 = arith.constant 14 : index
    %c0_62 = arith.constant 0 : index
    %109 = vector.load %arg6[%c0_60, %c14_61, %c0_62] : memref<8x16x128xf32, #tpu.memory_space<vmem>>, vector<1x1x128xf32>
    %110 = vector.shape_cast %109 : vector<1x1x128xf32> to vector<1x128xf32>
    %111 = vector.shape_cast %108 : vector<1x128xf32> to vector<1x1x128xf32>
    tpu.vector_store %arg6[%c0_60, %c14_61, %c0_62], %111 {strides = array<i32>} : memref<8x16x128xf32, #tpu.memory_space<vmem>>, vector<1x1x128xf32>,
    %112 = arith.index_cast %1 : i32 to index
    %c15 = arith.constant 15 : index
    %113 = memref.load %arg1[%112, %c15] : memref<16x16xi32, #tpu.memory_space<smem>>
    %114 = arith.index_cast %113 : i32 to index
    %c0_63 = arith.constant 0 : index
    %115 = vector.load %arg3[%114, %c0_63] : memref<256x128xf32, #tpu.memory_space<vmem>>, vector<1x128xf32>
    %c0_64 = arith.constant 0 : index
    %c15_65 = arith.constant 15 : index
    %c0_66 = arith.constant 0 : index
    %116 = vector.load %arg6[%c0_64, %c15_65, %c0_66] : memref<8x16x128xf32, #tpu.memory_space<vmem>>, vector<1x1x128xf32>
    %117 = vector.shape_cast %116 : vector<1x1x128xf32> to vector<1x128xf32>
    %118 = vector.shape_cast %115 : vector<1x128xf32> to vector<1x1x128xf32>
    tpu.vector_store %arg6[%c0_64, %c15_65, %c0_66], %118 {strides = array<i32>} : memref<8x16x128xf32, #tpu.memory_space<vmem>>, vector<1x1x128xf32>,
    %c8_i32_67 = arith.constant 8 : i32
    %119 = arith.muli %arg0, %c8_i32_67 : i32
    %c1_i32 = arith.constant 1 : i32
    %120 = arith.addi %119, %c1_i32 : i32
    %121 = arith.index_cast %120 : i32 to index
    %122 = memref.load %arg2[%121] : memref<16xi32, #tpu.memory_space<smem>>
    %123 = arith.index_cast %122 : i32 to index
    %c0_68 = arith.constant 0 : index
    %124 = vector.load %arg3[%123, %c0_68] : memref<256x128xf32, #tpu.memory_space<vmem>>, vector<1x128xf32>
    %c1_69 = arith.constant 1 : index
    %c0_70 = arith.constant 0 : index
    %125 = vector.load %arg7[%c1_69, %c0_70] : memref<8x128xf32, #tpu.memory_space<vmem>>, vector<1x128xf32>
    tpu.vector_store %arg7[%c1_69, %c0_70], %124 {strides = array<i32>} : memref<8x128xf32, #tpu.memory_space<vmem>>, vector<1x128xf32>,
    %126 = arith.index_cast %120 : i32 to index
    %c0_71 = arith.constant 0 : index
    %127 = memref.load %arg1[%126, %c0_71] : memref<16x16xi32, #tpu.memory_space<smem>>
    %128 = arith.index_cast %127 : i32 to index
    %c0_72 = arith.constant 0 : index
    %129 = vector.load %arg3[%128, %c0_72] : memref<256x128xf32, #tpu.memory_space<vmem>>, vector<1x128xf32>
    %c1_73 = arith.constant 1 : index
    %c0_74 = arith.constant 0 : index
    %c0_75 = arith.constant 0 : index
    %130 = vector.load %arg6[%c1_73, %c0_74, %c0_75] : memref<8x16x128xf32, #tpu.memory_space<vmem>>, vector<1x1x128xf32>
    %131 = vector.shape_cast %130 : vector<1x1x128xf32> to vector<1x128xf32>
    %132 = vector.shape_cast %129 : vector<1x128xf32> to vector<1x1x128xf32>
    tpu.vector_store %arg6[%c1_73, %c0_74, %c0_75], %132 {strides = array<i32>} : memref<8x16x128xf32, #tpu.memory_space<vmem>>, vector<1x1x128xf32>,
    %133 = arith.index_cast %120 : i32 to index
    %c1_76 = arith.constant 1 : index
    %134 = memref.load %arg1[%133, %c1_76] : memref<16x16xi32, #tpu.memory_space<smem>>
    %135 = arith.index_cast %134 : i32 to index
    %c0_77 = arith.constant 0 : index
    %136 = vector.load %arg3[%135, %c0_77] : memref<256x128xf32, #tpu.memory_space<vmem>>, vector<1x128xf32>
    %c1_78 = arith.constant 1 : index
    %c1_79 = arith.constant 1 : index
    %c0_80 = arith.constant 0 : index
    %137 = vector.load %arg6[%c1_78, %c1_79, %c0_80] : memref<8x16x128xf32, #tpu.memory_space<vmem>>, vector<1x1x128xf32>
    %138 = vector.shape_cast %137 : vector<1x1x128xf32> to vector<1x128xf32>
    %139 = vector.shape_cast %136 : vector<1x128xf32> to vector<1x1x128xf32>
    tpu.vector_store %arg6[%c1_78, %c1_79, %c0_80], %139 {strides = array<i32>} : memref<8x16x128xf32, #tpu.memory_space<vmem>>, vector<1x1x128xf32>,
    %140 = arith.index_cast %120 : i32 to index
    %c2_81 = arith.constant 2 : index
    %141 = memref.load %arg1[%140, %c2_81] : memref<16x16xi32, #tpu.memory_space<smem>>
    %142 = arith.index_cast %141 : i32 to index
    %c0_82 = arith.constant 0 : index
    %143 = vector.load %arg3[%142, %c0_82] : memref<256x128xf32, #tpu.memory_space<vmem>>, vector<1x128xf32>
    %c1_83 = arith.constant 1 : index
    %c2_84 = arith.constant 2 : index
    %c0_85 = arith.constant 0 : index
    %144 = vector.load %arg6[%c1_83, %c2_84, %c0_85] : memref<8x16x128xf32, #tpu.memory_space<vmem>>, vector<1x1x128xf32>
    %145 = vector.shape_cast %144 : vector<1x1x128xf32> to vector<1x128xf32>
    %146 = vector.shape_cast %143 : vector<1x128xf32> to vector<1x1x128xf32>
    tpu.vector_store %arg6[%c1_83, %c2_84, %c0_85], %146 {strides = array<i32>} : memref<8x16x128xf32, #tpu.memory_space<vmem>>, vector<1x1x128xf32>,
    %147 = arith.index_cast %120 : i32 to index
    %c3_86 = arith.constant 3 : index
    %148 = memref.load %arg1[%147, %c3_86] : memref<16x16xi32, #tpu.memory_space<smem>>
    %149 = arith.index_cast %148 : i32 to index
    %c0_87 = arith.constant 0 : index
    %150 = vector.load %arg3[%149, %c0_87] : memref<256x128xf32, #tpu.memory_space<vmem>>, vector<1x128xf32>
    %c1_88 = arith.constant 1 : index
    %c3_89 = arith.constant 3 : index
    %c0_90 = arith.constant 0 : index
    %151 = vector.load %arg6[%c1_88, %c3_89, %c0_90] : memref<8x16x128xf32, #tpu.memory_space<vmem>>, vector<1x1x128xf32>
    %152 = vector.shape_cast %151 : vector<1x1x128xf32> to vector<1x128xf32>
    %153 = vector.shape_cast %150 : vector<1x128xf32> to vector<1x1x128xf32>
    tpu.vector_store %arg6[%c1_88, %c3_89, %c0_90], %153 {strides = array<i32>} : memref<8x16x128xf32, #tpu.memory_space<vmem>>, vector<1x1x128xf32>,
    %154 = arith.index_cast %120 : i32 to index
    %c4_91 = arith.constant 4 : index
    %155 = memref.load %arg1[%154, %c4_91] : memref<16x16xi32, #tpu.memory_space<smem>>
    %156 = arith.index_cast %155 : i32 to index
    %c0_92 = arith.constant 0 : index
    %157 = vector.load %arg3[%156, %c0_92] : memref<256x128xf32, #tpu.memory_space<vmem>>, vector<1x128xf32>
    %c1_93 = arith.constant 1 : index
    %c4_94 = arith.constant 4 : index
    %c0_95 = arith.constant 0 : index
    %158 = vector.load %arg6[%c1_93, %c4_94, %c0_95] : memref<8x16x128xf32, #tpu.memory_space<vmem>>, vector<1x1x128xf32>
    %159 = vector.shape_cast %158 : vector<1x1x128xf32> to vector<1x128xf32>
    %160 = vector.shape_cast %157 : vector<1x128xf32> to vector<1x1x128xf32>
    tpu.vector_store %arg6[%c1_93, %c4_94, %c0_95], %160 {strides = array<i32>} : memref<8x16x128xf32, #tpu.memory_space<vmem>>, vector<1x1x128xf32>,
    %161 = arith.index_cast %120 : i32 to index
    %c5_96 = arith.constant 5 : index
    %162 = memref.load %arg1[%161, %c5_96] : memref<16x16xi32, #tpu.memory_space<smem>>
    %163 = arith.index_cast %162 : i32 to index
    %c0_97 = arith.constant 0 : index
    %164 = vector.load %arg3[%163, %c0_97] : memref<256x128xf32, #tpu.memory_space<vmem>>, vector<1x128xf32>
    %c1_98 = arith.constant 1 : index
    %c5_99 = arith.constant 5 : index
    %c0_100 = arith.constant 0 : index
    %165 = vector.load %arg6[%c1_98, %c5_99, %c0_100] : memref<8x16x128xf32, #tpu.memory_space<vmem>>, vector<1x1x128xf32>
    %166 = vector.shape_cast %165 : vector<1x1x128xf32> to vector<1x128xf32>
    %167 = vector.shape_cast %164 : vector<1x128xf32> to vector<1x1x128xf32>
    tpu.vector_store %arg6[%c1_98, %c5_99, %c0_100], %167 {strides = array<i32>} : memref<8x16x128xf32, #tpu.memory_space<vmem>>, vector<1x1x128xf32>,
    %168 = arith.index_cast %120 : i32 to index
    %c6_101 = arith.constant 6 : index
    %169 = memref.load %arg1[%168, %c6_101] : memref<16x16xi32, #tpu.memory_space<smem>>
    %170 = arith.index_cast %169 : i32 to index
    %c0_102 = arith.constant 0 : index
    %171 = vector.load %arg3[%170, %c0_102] : memref<256x128xf32, #tpu.memory_space<vmem>>, vector<1x128xf32>
    %c1_103 = arith.constant 1 : index
    %c6_104 = arith.constant 6 : index
    %c0_105 = arith.constant 0 : index
    %172 = vector.load %arg6[%c1_103, %c6_104, %c0_105] : memref<8x16x128xf32, #tpu.memory_space<vmem>>, vector<1x1x128xf32>
    %173 = vector.shape_cast %172 : vector<1x1x128xf32> to vector<1x128xf32>
    %174 = vector.shape_cast %171 : vector<1x128xf32> to vector<1x1x128xf32>
    tpu.vector_store %arg6[%c1_103, %c6_104, %c0_105], %174 {strides = array<i32>} : memref<8x16x128xf32, #tpu.memory_space<vmem>>, vector<1x1x128xf32>,
    %175 = arith.index_cast %120 : i32 to index
    %c7_106 = arith.constant 7 : index
    %176 = memref.load %arg1[%175, %c7_106] : memref<16x16xi32, #tpu.memory_space<smem>>
    %177 = arith.index_cast %176 : i32 to index
    %c0_107 = arith.constant 0 : index
    %178 = vector.load %arg3[%177, %c0_107] : memref<256x128xf32, #tpu.memory_space<vmem>>, vector<1x128xf32>
    %c1_108 = arith.constant 1 : index
    %c7_109 = arith.constant 7 : index
    %c0_110 = arith.constant 0 : index
    %179 = vector.load %arg6[%c1_108, %c7_109, %c0_110] : memref<8x16x128xf32, #tpu.memory_space<vmem>>, vector<1x1x128xf32>
    %180 = vector.shape_cast %179 : vector<1x1x128xf32> to vector<1x128xf32>
    %181 = vector.shape_cast %178 : vector<1x128xf32> to vector<1x1x128xf32>
    tpu.vector_store %arg6[%c1_108, %c7_109, %c0_110], %181 {strides = array<i32>} : memref<8x16x128xf32, #tpu.memory_space<vmem>>, vector<1x1x128xf32>,
    %182 = arith.index_cast %120 : i32 to index
    %c8_111 = arith.constant 8 : index
    %183 = memref.load %arg1[%182, %c8_111] : memref<16x16xi32, #tpu.memory_space<smem>>
    %184 = arith.index_cast %183 : i32 to index
    %c0_112 = arith.constant 0 : index
    %185 = vector.load %arg3[%184, %c0_112] : memref<256x128xf32, #tpu.memory_space<vmem>>, vector<1x128xf32>
    %c1_113 = arith.constant 1 : index
    %c8_114 = arith.constant 8 : index
    %c0_115 = arith.constant 0 : index
    %186 = vector.load %arg6[%c1_113, %c8_114, %c0_115] : memref<8x16x128xf32, #tpu.memory_space<vmem>>, vector<1x1x128xf32>
    %187 = vector.shape_cast %186 : vector<1x1x128xf32> to vector<1x128xf32>
    %188 = vector.shape_cast %185 : vector<1x128xf32> to vector<1x1x128xf32>
    tpu.vector_store %arg6[%c1_113, %c8_114, %c0_115], %188 {strides = array<i32>} : memref<8x16x128xf32, #tpu.memory_space<vmem>>, vector<1x1x128xf32>,
    %189 = arith.index_cast %120 : i32 to index
    %c9_116 = arith.constant 9 : index
    %190 = memref.load %arg1[%189, %c9_116] : memref<16x16xi32, #tpu.memory_space<smem>>
    %191 = arith.index_cast %190 : i32 to index
    %c0_117 = arith.constant 0 : index
    %192 = vector.load %arg3[%191, %c0_117] : memref<256x128xf32, #tpu.memory_space<vmem>>, vector<1x128xf32>
    %c1_118 = arith.constant 1 : index
    %c9_119 = arith.constant 9 : index
    %c0_120 = arith.constant 0 : index
    %193 = vector.load %arg6[%c1_118, %c9_119, %c0_120] : memref<8x16x128xf32, #tpu.memory_space<vmem>>, vector<1x1x128xf32>
    %194 = vector.shape_cast %193 : vector<1x1x128xf32> to vector<1x128xf32>
    %195 = vector.shape_cast %192 : vector<1x128xf32> to vector<1x1x128xf32>
    tpu.vector_store %arg6[%c1_118, %c9_119, %c0_120], %195 {strides = array<i32>} : memref<8x16x128xf32, #tpu.memory_space<vmem>>, vector<1x1x128xf32>,
    %196 = arith.index_cast %120 : i32 to index
    %c10_121 = arith.constant 10 : index
    %197 = memref.load %arg1[%196, %c10_121] : memref<16x16xi32, #tpu.memory_space<smem>>
    %198 = arith.index_cast %197 : i32 to index
    %c0_122 = arith.constant 0 : index
    %199 = vector.load %arg3[%198, %c0_122] : memref<256x128xf32, #tpu.memory_space<vmem>>, vector<1x128xf32>
    %c1_123 = arith.constant 1 : index
    %c10_124 = arith.constant 10 : index
    %c0_125 = arith.constant 0 : index
    %200 = vector.load %arg6[%c1_123, %c10_124, %c0_125] : memref<8x16x128xf32, #tpu.memory_space<vmem>>, vector<1x1x128xf32>
    %201 = vector.shape_cast %200 : vector<1x1x128xf32> to vector<1x128xf32>
    %202 = vector.shape_cast %199 : vector<1x128xf32> to vector<1x1x128xf32>
    tpu.vector_store %arg6[%c1_123, %c10_124, %c0_125], %202 {strides = array<i32>} : memref<8x16x128xf32, #tpu.memory_space<vmem>>, vector<1x1x128xf32>,
    %203 = arith.index_cast %120 : i32 to index
    %c11_126 = arith.constant 11 : index
    %204 = memref.load %arg1[%203, %c11_126] : memref<16x16xi32, #tpu.memory_space<smem>>
    %205 = arith.index_cast %204 : i32 to index
    %c0_127 = arith.constant 0 : index
    %206 = vector.load %arg3[%205, %c0_127] : memref<256x128xf32, #tpu.memory_space<vmem>>, vector<1x128xf32>
    %c1_128 = arith.constant 1 : index
    %c11_129 = arith.constant 11 : index
    %c0_130 = arith.constant 0 : index
    %207 = vector.load %arg6[%c1_128, %c11_129, %c0_130] : memref<8x16x128xf32, #tpu.memory_space<vmem>>, vector<1x1x128xf32>
    %208 = vector.shape_cast %207 : vector<1x1x128xf32> to vector<1x128xf32>
    %209 = vector.shape_cast %206 : vector<1x128xf32> to vector<1x1x128xf32>
    tpu.vector_store %arg6[%c1_128, %c11_129, %c0_130], %209 {strides = array<i32>} : memref<8x16x128xf32, #tpu.memory_space<vmem>>, vector<1x1x128xf32>,
    %210 = arith.index_cast %120 : i32 to index
    %c12_131 = arith.constant 12 : index
    %211 = memref.load %arg1[%210, %c12_131] : memref<16x16xi32, #tpu.memory_space<smem>>
    %212 = arith.index_cast %211 : i32 to index
    %c0_132 = arith.constant 0 : index
    %213 = vector.load %arg3[%212, %c0_132] : memref<256x128xf32, #tpu.memory_space<vmem>>, vector<1x128xf32>
    %c1_133 = arith.constant 1 : index
    %c12_134 = arith.constant 12 : index
    %c0_135 = arith.constant 0 : index
    %214 = vector.load %arg6[%c1_133, %c12_134, %c0_135] : memref<8x16x128xf32, #tpu.memory_space<vmem>>, vector<1x1x128xf32>
    %215 = vector.shape_cast %214 : vector<1x1x128xf32> to vector<1x128xf32>
    %216 = vector.shape_cast %213 : vector<1x128xf32> to vector<1x1x128xf32>
    tpu.vector_store %arg6[%c1_133, %c12_134, %c0_135], %216 {strides = array<i32>} : memref<8x16x128xf32, #tpu.memory_space<vmem>>, vector<1x1x128xf32>,
    %217 = arith.index_cast %120 : i32 to index
    %c13_136 = arith.constant 13 : index
    %218 = memref.load %arg1[%217, %c13_136] : memref<16x16xi32, #tpu.memory_space<smem>>
    %219 = arith.index_cast %218 : i32 to index
    %c0_137 = arith.constant 0 : index
    %220 = vector.load %arg3[%219, %c0_137] : memref<256x128xf32, #tpu.memory_space<vmem>>, vector<1x128xf32>
    %c1_138 = arith.constant 1 : index
    %c13_139 = arith.constant 13 : index
    %c0_140 = arith.constant 0 : index
    %221 = vector.load %arg6[%c1_138, %c13_139, %c0_140] : memref<8x16x128xf32, #tpu.memory_space<vmem>>, vector<1x1x128xf32>
    %222 = vector.shape_cast %221 : vector<1x1x128xf32> to vector<1x128xf32>
    %223 = vector.shape_cast %220 : vector<1x128xf32> to vector<1x1x128xf32>
    tpu.vector_store %arg6[%c1_138, %c13_139, %c0_140], %223 {strides = array<i32>} : memref<8x16x128xf32, #tpu.memory_space<vmem>>, vector<1x1x128xf32>,
    %224 = arith.index_cast %120 : i32 to index
    %c14_141 = arith.constant 14 : index
    %225 = memref.load %arg1[%224, %c14_141] : memref<16x16xi32, #tpu.memory_space<smem>>
    %226 = arith.index_cast %225 : i32 to index
    %c0_142 = arith.constant 0 : index
    %227 = vector.load %arg3[%226, %c0_142] : memref<256x128xf32, #tpu.memory_space<vmem>>, vector<1x128xf32>
    %c1_143 = arith.constant 1 : index
    %c14_144 = arith.constant 14 : index
    %c0_145 = arith.constant 0 : index
    %228 = vector.load %arg6[%c1_143, %c14_144, %c0_145] : memref<8x16x128xf32, #tpu.memory_space<vmem>>, vector<1x1x128xf32>
    %229 = vector.shape_cast %228 : vector<1x1x128xf32> to vector<1x128xf32>
    %230 = vector.shape_cast %227 : vector<1x128xf32> to vector<1x1x128xf32>
    tpu.vector_store %arg6[%c1_143, %c14_144, %c0_145], %230 {strides = array<i32>} : memref<8x16x128xf32, #tpu.memory_space<vmem>>, vector<1x1x128xf32>,
    %231 = arith.index_cast %120 : i32 to index
    %c15_146 = arith.constant 15 : index
    %232 = memref.load %arg1[%231, %c15_146] : memref<16x16xi32, #tpu.memory_space<smem>>
    %233 = arith.index_cast %232 : i32 to index
    %c0_147 = arith.constant 0 : index
    %234 = vector.load %arg3[%233, %c0_147] : memref<256x128xf32, #tpu.memory_space<vmem>>, vector<1x128xf32>
    %c1_148 = arith.constant 1 : index
    %c15_149 = arith.constant 15 : index
    %c0_150 = arith.constant 0 : index
    %235 = vector.load %arg6[%c1_148, %c15_149, %c0_150] : memref<8x16x128xf32, #tpu.memory_space<vmem>>, vector<1x1x128xf32>
    %236 = vector.shape_cast %235 : vector<1x1x128xf32> to vector<1x128xf32>
    %237 = vector.shape_cast %234 : vector<1x128xf32> to vector<1x1x128xf32>
    tpu.vector_store %arg6[%c1_148, %c15_149, %c0_150], %237 {strides = array<i32>} : memref<8x16x128xf32, #tpu.memory_space<vmem>>, vector<1x1x128xf32>,
    %c8_i32_151 = arith.constant 8 : i32
    %238 = arith.muli %arg0, %c8_i32_151 : i32
    %c2_i32 = arith.constant 2 : i32
    %239 = arith.addi %238, %c2_i32 : i32
    %240 = arith.index_cast %239 : i32 to index
    %241 = memref.load %arg2[%240] : memref<16xi32, #tpu.memory_space<smem>>
    %242 = arith.index_cast %241 : i32 to index
    %c0_152 = arith.constant 0 : index
    %243 = vector.load %arg3[%242, %c0_152] : memref<256x128xf32, #tpu.memory_space<vmem>>, vector<1x128xf32>
    %c2_153 = arith.constant 2 : index
    %c0_154 = arith.constant 0 : index
    %244 = vector.load %arg7[%c2_153, %c0_154] : memref<8x128xf32, #tpu.memory_space<vmem>>, vector<1x128xf32>
    tpu.vector_store %arg7[%c2_153, %c0_154], %243 {strides = array<i32>} : memref<8x128xf32, #tpu.memory_space<vmem>>, vector<1x128xf32>,
    %245 = arith.index_cast %239 : i32 to index
    %c0_155 = arith.constant 0 : index
    %246 = memref.load %arg1[%245, %c0_155] : memref<16x16xi32, #tpu.memory_space<smem>>
    %247 = arith.index_cast %246 : i32 to index
    %c0_156 = arith.constant 0 : index
    %248 = vector.load %arg3[%247, %c0_156] : memref<256x128xf32, #tpu.memory_space<vmem>>, vector<1x128xf32>
    %c2_157 = arith.constant 2 : index
    %c0_158 = arith.constant 0 : index
    %c0_159 = arith.constant 0 : index
    %249 = vector.load %arg6[%c2_157, %c0_158, %c0_159] : memref<8x16x128xf32, #tpu.memory_space<vmem>>, vector<1x1x128xf32>
    %250 = vector.shape_cast %249 : vector<1x1x128xf32> to vector<1x128xf32>
    %251 = vector.shape_cast %248 : vector<1x128xf32> to vector<1x1x128xf32>
    tpu.vector_store %arg6[%c2_157, %c0_158, %c0_159], %251 {strides = array<i32>} : memref<8x16x128xf32, #tpu.memory_space<vmem>>, vector<1x1x128xf32>,
    %252 = arith.index_cast %239 : i32 to index
    %c1_160 = arith.constant 1 : index
    %253 = memref.load %arg1[%252, %c1_160] : memref<16x16xi32, #tpu.memory_space<smem>>
    %254 = arith.index_cast %253 : i32 to index
    %c0_161 = arith.constant 0 : index
    %255 = vector.load %arg3[%254, %c0_161] : memref<256x128xf32, #tpu.memory_space<vmem>>, vector<1x128xf32>
    %c2_162 = arith.constant 2 : index
    %c1_163 = arith.constant 1 : index
    %c0_164 = arith.constant 0 : index
    %256 = vector.load %arg6[%c2_162, %c1_163, %c0_164] : memref<8x16x128xf32, #tpu.memory_space<vmem>>, vector<1x1x128xf32>
    %257 = vector.shape_cast %256 : vector<1x1x128xf32> to vector<1x128xf32>
    %258 = vector.shape_cast %255 : vector<1x128xf32> to vector<1x1x128xf32>
    tpu.vector_store %arg6[%c2_162, %c1_163, %c0_164], %258 {strides = array<i32>} : memref<8x16x128xf32, #tpu.memory_space<vmem>>, vector<1x1x128xf32>,
    %259 = arith.index_cast %239 : i32 to index
    %c2_165 = arith.constant 2 : index
    %260 = memref.load %arg1[%259, %c2_165] : memref<16x16xi32, #tpu.memory_space<smem>>
    %261 = arith.index_cast %260 : i32 to index
    %c0_166 = arith.constant 0 : index
    %262 = vector.load %arg3[%261, %c0_166] : memref<256x128xf32, #tpu.memory_space<vmem>>, vector<1x128xf32>
    %c2_167 = arith.constant 2 : index
    %c2_168 = arith.constant 2 : index
    %c0_169 = arith.constant 0 : index
    %263 = vector.load %arg6[%c2_167, %c2_168, %c0_169] : memref<8x16x128xf32, #tpu.memory_space<vmem>>, vector<1x1x128xf32>
    %264 = vector.shape_cast %263 : vector<1x1x128xf32> to vector<1x128xf32>
    %265 = vector.shape_cast %262 : vector<1x128xf32> to vector<1x1x128xf32>
    tpu.vector_store %arg6[%c2_167, %c2_168, %c0_169], %265 {strides = array<i32>} : memref<8x16x128xf32, #tpu.memory_space<vmem>>, vector<1x1x128xf32>,
    %266 = arith.index_cast %239 : i32 to index
    %c3_170 = arith.constant 3 : index
    %267 = memref.load %arg1[%266, %c3_170] : memref<16x16xi32, #tpu.memory_space<smem>>
    %268 = arith.index_cast %267 : i32 to index
    %c0_171 = arith.constant 0 : index
    %269 = vector.load %arg3[%268, %c0_171] : memref<256x128xf32, #tpu.memory_space<vmem>>, vector<1x128xf32>
    %c2_172 = arith.constant 2 : index
    %c3_173 = arith.constant 3 : index
    %c0_174 = arith.constant 0 : index
    %270 = vector.load %arg6[%c2_172, %c3_173, %c0_174] : memref<8x16x128xf32, #tpu.memory_space<vmem>>, vector<1x1x128xf32>
    %271 = vector.shape_cast %270 : vector<1x1x128xf32> to vector<1x128xf32>
    %272 = vector.shape_cast %269 : vector<1x128xf32> to vector<1x1x128xf32>
    tpu.vector_store %arg6[%c2_172, %c3_173, %c0_174], %272 {strides = array<i32>} : memref<8x16x128xf32, #tpu.memory_space<vmem>>, vector<1x1x128xf32>,
    %273 = arith.index_cast %239 : i32 to index
    %c4_175 = arith.constant 4 : index
    %274 = memref.load %arg1[%273, %c4_175] : memref<16x16xi32, #tpu.memory_space<smem>>
    %275 = arith.index_cast %274 : i32 to index
    %c0_176 = arith.constant 0 : index
    %276 = vector.load %arg3[%275, %c0_176] : memref<256x128xf32, #tpu.memory_space<vmem>>, vector<1x128xf32>
    %c2_177 = arith.constant 2 : index
    %c4_178 = arith.constant 4 : index
    %c0_179 = arith.constant 0 : index
    %277 = vector.load %arg6[%c2_177, %c4_178, %c0_179] : memref<8x16x128xf32, #tpu.memory_space<vmem>>, vector<1x1x128xf32>
    %278 = vector.shape_cast %277 : vector<1x1x128xf32> to vector<1x128xf32>
    %279 = vector.shape_cast %276 : vector<1x128xf32> to vector<1x1x128xf32>
    tpu.vector_store %arg6[%c2_177, %c4_178, %c0_179], %279 {strides = array<i32>} : memref<8x16x128xf32, #tpu.memory_space<vmem>>, vector<1x1x128xf32>,
    %280 = arith.index_cast %239 : i32 to index
    %c5_180 = arith.constant 5 : index
    %281 = memref.load %arg1[%280, %c5_180] : memref<16x16xi32, #tpu.memory_space<smem>>
    %282 = arith.index_cast %281 : i32 to index
    %c0_181 = arith.constant 0 : index
    %283 = vector.load %arg3[%282, %c0_181] : memref<256x128xf32, #tpu.memory_space<vmem>>, vector<1x128xf32>
    %c2_182 = arith.constant 2 : index
    %c5_183 = arith.constant 5 : index
    %c0_184 = arith.constant 0 : index
    %284 = vector.load %arg6[%c2_182, %c5_183, %c0_184] : memref<8x16x128xf32, #tpu.memory_space<vmem>>, vector<1x1x128xf32>
    %285 = vector.shape_cast %284 : vector<1x1x128xf32> to vector<1x128xf32>
    %286 = vector.shape_cast %283 : vector<1x128xf32> to vector<1x1x128xf32>
    tpu.vector_store %arg6[%c2_182, %c5_183, %c0_184], %286 {strides = array<i32>} : memref<8x16x128xf32, #tpu.memory_space<vmem>>, vector<1x1x128xf32>,
    %287 = arith.index_cast %239 : i32 to index
    %c6_185 = arith.constant 6 : index
    %288 = memref.load %arg1[%287, %c6_185] : memref<16x16xi32, #tpu.memory_space<smem>>
    %289 = arith.index_cast %288 : i32 to index
    %c0_186 = arith.constant 0 : index
    %290 = vector.load %arg3[%289, %c0_186] : memref<256x128xf32, #tpu.memory_space<vmem>>, vector<1x128xf32>
    %c2_187 = arith.constant 2 : index
    %c6_188 = arith.constant 6 : index
    %c0_189 = arith.constant 0 : index
    %291 = vector.load %arg6[%c2_187, %c6_188, %c0_189] : memref<8x16x128xf32, #tpu.memory_space<vmem>>, vector<1x1x128xf32>
    %292 = vector.shape_cast %291 : vector<1x1x128xf32> to vector<1x128xf32>
    %293 = vector.shape_cast %290 : vector<1x128xf32> to vector<1x1x128xf32>
    tpu.vector_store %arg6[%c2_187, %c6_188, %c0_189], %293 {strides = array<i32>} : memref<8x16x128xf32, #tpu.memory_space<vmem>>, vector<1x1x128xf32>,
    %294 = arith.index_cast %239 : i32 to index
    %c7_190 = arith.constant 7 : index
    %295 = memref.load %arg1[%294, %c7_190] : memref<16x16xi32, #tpu.memory_space<smem>>
    %296 = arith.index_cast %295 : i32 to index
    %c0_191 = arith.constant 0 : index
    %297 = vector.load %arg3[%296, %c0_191] : memref<256x128xf32, #tpu.memory_space<vmem>>, vector<1x128xf32>
    %c2_192 = arith.constant 2 : index
    %c7_193 = arith.constant 7 : index
    %c0_194 = arith.constant 0 : index
    %298 = vector.load %arg6[%c2_192, %c7_193, %c0_194] : memref<8x16x128xf32, #tpu.memory_space<vmem>>, vector<1x1x128xf32>
    %299 = vector.shape_cast %298 : vector<1x1x128xf32> to vector<1x128xf32>
    %300 = vector.shape_cast %297 : vector<1x128xf32> to vector<1x1x128xf32>
    tpu.vector_store %arg6[%c2_192, %c7_193, %c0_194], %300 {strides = array<i32>} : memref<8x16x128xf32, #tpu.memory_space<vmem>>, vector<1x1x128xf32>,
    %301 = arith.index_cast %239 : i32 to index
    %c8_195 = arith.constant 8 : index
    %302 = memref.load %arg1[%301, %c8_195] : memref<16x16xi32, #tpu.memory_space<smem>>
    %303 = arith.index_cast %302 : i32 to index
    %c0_196 = arith.constant 0 : index
    %304 = vector.load %arg3[%303, %c0_196] : memref<256x128xf32, #tpu.memory_space<vmem>>, vector<1x128xf32>
    %c2_197 = arith.constant 2 : index
    %c8_198 = arith.constant 8 : index
    %c0_199 = arith.constant 0 : index
    %305 = vector.load %arg6[%c2_197, %c8_198, %c0_199] : memref<8x16x128xf32, #tpu.memory_space<vmem>>, vector<1x1x128xf32>
    %306 = vector.shape_cast %305 : vector<1x1x128xf32> to vector<1x128xf32>
    %307 = vector.shape_cast %304 : vector<1x128xf32> to vector<1x1x128xf32>
    tpu.vector_store %arg6[%c2_197, %c8_198, %c0_199], %307 {strides = array<i32>} : memref<8x16x128xf32, #tpu.memory_space<vmem>>, vector<1x1x128xf32>,
    %308 = arith.index_cast %239 : i32 to index
    %c9_200 = arith.constant 9 : index
    %309 = memref.load %arg1[%308, %c9_200] : memref<16x16xi32, #tpu.memory_space<smem>>
    %310 = arith.index_cast %309 : i32 to index
    %c0_201 = arith.constant 0 : index
    %311 = vector.load %arg3[%310, %c0_201] : memref<256x128xf32, #tpu.memory_space<vmem>>, vector<1x128xf32>
    %c2_202 = arith.constant 2 : index
    %c9_203 = arith.constant 9 : index
    %c0_204 = arith.constant 0 : index
    %312 = vector.load %arg6[%c2_202, %c9_203, %c0_204] : memref<8x16x128xf32, #tpu.memory_space<vmem>>, vector<1x1x128xf32>
    %313 = vector.shape_cast %312 : vector<1x1x128xf32> to vector<1x128xf32>
    %314 = vector.shape_cast %311 : vector<1x128xf32> to vector<1x1x128xf32>
    tpu.vector_store %arg6[%c2_202, %c9_203, %c0_204], %314 {strides = array<i32>} : memref<8x16x128xf32, #tpu.memory_space<vmem>>, vector<1x1x128xf32>,
    %315 = arith.index_cast %239 : i32 to index
    %c10_205 = arith.constant 10 : index
    %316 = memref.load %arg1[%315, %c10_205] : memref<16x16xi32, #tpu.memory_space<smem>>
    %317 = arith.index_cast %316 : i32 to index
    %c0_206 = arith.constant 0 : index
    %318 = vector.load %arg3[%317, %c0_206] : memref<256x128xf32, #tpu.memory_space<vmem>>, vector<1x128xf32>
    %c2_207 = arith.constant 2 : index
    %c10_208 = arith.constant 10 : index
    %c0_209 = arith.constant 0 : index
    %319 = vector.load %arg6[%c2_207, %c10_208, %c0_209] : memref<8x16x128xf32, #tpu.memory_space<vmem>>, vector<1x1x128xf32>
    %320 = vector.shape_cast %319 : vector<1x1x128xf32> to vector<1x128xf32>
    %321 = vector.shape_cast %318 : vector<1x128xf32> to vector<1x1x128xf32>
    tpu.vector_store %arg6[%c2_207, %c10_208, %c0_209], %321 {strides = array<i32>} : memref<8x16x128xf32, #tpu.memory_space<vmem>>, vector<1x1x128xf32>,
    %322 = arith.index_cast %239 : i32 to index
    %c11_210 = arith.constant 11 : index
    %323 = memref.load %arg1[%322, %c11_210] : memref<16x16xi32, #tpu.memory_space<smem>>
    %324 = arith.index_cast %323 : i32 to index
    %c0_211 = arith.constant 0 : index
    %325 = vector.load %arg3[%324, %c0_211] : memref<256x128xf32, #tpu.memory_space<vmem>>, vector<1x128xf32>
    %c2_212 = arith.constant 2 : index
    %c11_213 = arith.constant 11 : index
    %c0_214 = arith.constant 0 : index
    %326 = vector.load %arg6[%c2_212, %c11_213, %c0_214] : memref<8x16x128xf32, #tpu.memory_space<vmem>>, vector<1x1x128xf32>
    %327 = vector.shape_cast %326 : vector<1x1x128xf32> to vector<1x128xf32>
    %328 = vector.shape_cast %325 : vector<1x128xf32> to vector<1x1x128xf32>
    tpu.vector_store %arg6[%c2_212, %c11_213, %c0_214], %328 {strides = array<i32>} : memref<8x16x128xf32, #tpu.memory_space<vmem>>, vector<1x1x128xf32>,
    %329 = arith.index_cast %239 : i32 to index
    %c12_215 = arith.constant 12 : index
    %330 = memref.load %arg1[%329, %c12_215] : memref<16x16xi32, #tpu.memory_space<smem>>
    %331 = arith.index_cast %330 : i32 to index
    %c0_216 = arith.constant 0 : index
    %332 = vector.load %arg3[%331, %c0_216] : memref<256x128xf32, #tpu.memory_space<vmem>>, vector<1x128xf32>
    %c2_217 = arith.constant 2 : index
    %c12_218 = arith.constant 12 : index
    %c0_219 = arith.constant 0 : index
    %333 = vector.load %arg6[%c2_217, %c12_218, %c0_219] : memref<8x16x128xf32, #tpu.memory_space<vmem>>, vector<1x1x128xf32>
    %334 = vector.shape_cast %333 : vector<1x1x128xf32> to vector<1x128xf32>
    %335 = vector.shape_cast %332 : vector<1x128xf32> to vector<1x1x128xf32>
    tpu.vector_store %arg6[%c2_217, %c12_218, %c0_219], %335 {strides = array<i32>} : memref<8x16x128xf32, #tpu.memory_space<vmem>>, vector<1x1x128xf32>,
    %336 = arith.index_cast %239 : i32 to index
    %c13_220 = arith.constant 13 : index
    %337 = memref.load %arg1[%336, %c13_220] : memref<16x16xi32, #tpu.memory_space<smem>>
    %338 = arith.index_cast %337 : i32 to index
    %c0_221 = arith.constant 0 : index
    %339 = vector.load %arg3[%338, %c0_221] : memref<256x128xf32, #tpu.memory_space<vmem>>, vector<1x128xf32>
    %c2_222 = arith.constant 2 : index
    %c13_223 = arith.constant 13 : index
    %c0_224 = arith.constant 0 : index
    %340 = vector.load %arg6[%c2_222, %c13_223, %c0_224] : memref<8x16x128xf32, #tpu.memory_space<vmem>>, vector<1x1x128xf32>
    %341 = vector.shape_cast %340 : vector<1x1x128xf32> to vector<1x128xf32>
    %342 = vector.shape_cast %339 : vector<1x128xf32> to vector<1x1x128xf32>
    tpu.vector_store %arg6[%c2_222, %c13_223, %c0_224], %342 {strides = array<i32>} : memref<8x16x128xf32, #tpu.memory_space<vmem>>, vector<1x1x128xf32>,
    %343 = arith.index_cast %239 : i32 to index
    %c14_225 = arith.constant 14 : index
    %344 = memref.load %arg1[%343, %c14_225] : memref<16x16xi32, #tpu.memory_space<smem>>
    %345 = arith.index_cast %344 : i32 to index
    %c0_226 = arith.constant 0 : index
    %346 = vector.load %arg3[%345, %c0_226] : memref<256x128xf32, #tpu.memory_space<vmem>>, vector<1x128xf32>
    %c2_227 = arith.constant 2 : index
    %c14_228 = arith.constant 14 : index
    %c0_229 = arith.constant 0 : index
    %347 = vector.load %arg6[%c2_227, %c14_228, %c0_229] : memref<8x16x128xf32, #tpu.memory_space<vmem>>, vector<1x1x128xf32>
    %348 = vector.shape_cast %347 : vector<1x1x128xf32> to vector<1x128xf32>
    %349 = vector.shape_cast %346 : vector<1x128xf32> to vector<1x1x128xf32>
    tpu.vector_store %arg6[%c2_227, %c14_228, %c0_229], %349 {strides = array<i32>} : memref<8x16x128xf32, #tpu.memory_space<vmem>>, vector<1x1x128xf32>,
    %350 = arith.index_cast %239 : i32 to index
    %c15_230 = arith.constant 15 : index
    %351 = memref.load %arg1[%350, %c15_230] : memref<16x16xi32, #tpu.memory_space<smem>>
    %352 = arith.index_cast %351 : i32 to index
    %c0_231 = arith.constant 0 : index
    %353 = vector.load %arg3[%352, %c0_231] : memref<256x128xf32, #tpu.memory_space<vmem>>, vector<1x128xf32>
    %c2_232 = arith.constant 2 : index
    %c15_233 = arith.constant 15 : index
    %c0_234 = arith.constant 0 : index
    %354 = vector.load %arg6[%c2_232, %c15_233, %c0_234] : memref<8x16x128xf32, #tpu.memory_space<vmem>>, vector<1x1x128xf32>
    %355 = vector.shape_cast %354 : vector<1x1x128xf32> to vector<1x128xf32>
    %356 = vector.shape_cast %353 : vector<1x128xf32> to vector<1x1x128xf32>
    tpu.vector_store %arg6[%c2_232, %c15_233, %c0_234], %356 {strides = array<i32>} : memref<8x16x128xf32, #tpu.memory_space<vmem>>, vector<1x1x128xf32>,
    %c8_i32_235 = arith.constant 8 : i32
    %357 = arith.muli %arg0, %c8_i32_235 : i32
    %c3_i32 = arith.constant 3 : i32
    %358 = arith.addi %357, %c3_i32 : i32
    %359 = arith.index_cast %358 : i32 to index
    %360 = memref.load %arg2[%359] : memref<16xi32, #tpu.memory_space<smem>>
    %361 = arith.index_cast %360 : i32 to index
    %c0_236 = arith.constant 0 : index
    %362 = vector.load %arg3[%361, %c0_236] : memref<256x128xf32, #tpu.memory_space<vmem>>, vector<1x128xf32>
    %c3_237 = arith.constant 3 : index
    %c0_238 = arith.constant 0 : index
    %363 = vector.load %arg7[%c3_237, %c0_238] : memref<8x128xf32, #tpu.memory_space<vmem>>, vector<1x128xf32>
    tpu.vector_store %arg7[%c3_237, %c0_238], %362 {strides = array<i32>} : memref<8x128xf32, #tpu.memory_space<vmem>>, vector<1x128xf32>,
    %364 = arith.index_cast %358 : i32 to index
    %c0_239 = arith.constant 0 : index
    %365 = memref.load %arg1[%364, %c0_239] : memref<16x16xi32, #tpu.memory_space<smem>>
    %366 = arith.index_cast %365 : i32 to index
    %c0_240 = arith.constant 0 : index
    %367 = vector.load %arg3[%366, %c0_240] : memref<256x128xf32, #tpu.memory_space<vmem>>, vector<1x128xf32>
    %c3_241 = arith.constant 3 : index
    %c0_242 = arith.constant 0 : index
    %c0_243 = arith.constant 0 : index
    %368 = vector.load %arg6[%c3_241, %c0_242, %c0_243] : memref<8x16x128xf32, #tpu.memory_space<vmem>>, vector<1x1x128xf32>
    %369 = vector.shape_cast %368 : vector<1x1x128xf32> to vector<1x128xf32>
    %370 = vector.shape_cast %367 : vector<1x128xf32> to vector<1x1x128xf32>
    tpu.vector_store %arg6[%c3_241, %c0_242, %c0_243], %370 {strides = array<i32>} : memref<8x16x128xf32, #tpu.memory_space<vmem>>, vector<1x1x128xf32>,
    %371 = arith.index_cast %358 : i32 to index
    %c1_244 = arith.constant 1 : index
    %372 = memref.load %arg1[%371, %c1_244] : memref<16x16xi32, #tpu.memory_space<smem>>
    %373 = arith.index_cast %372 : i32 to index
    %c0_245 = arith.constant 0 : index
    %374 = vector.load %arg3[%373, %c0_245] : memref<256x128xf32, #tpu.memory_space<vmem>>, vector<1x128xf32>
    %c3_246 = arith.constant 3 : index
    %c1_247 = arith.constant 1 : index
    %c0_248 = arith.constant 0 : index
    %375 = vector.load %arg6[%c3_246, %c1_247, %c0_248] : memref<8x16x128xf32, #tpu.memory_space<vmem>>, vector<1x1x128xf32>
    %376 = vector.shape_cast %375 : vector<1x1x128xf32> to vector<1x128xf32>
    %377 = vector.shape_cast %374 : vector<1x128xf32> to vector<1x1x128xf32>
    tpu.vector_store %arg6[%c3_246, %c1_247, %c0_248], %377 {strides = array<i32>} : memref<8x16x128xf32, #tpu.memory_space<vmem>>, vector<1x1x128xf32>,
    %378 = arith.index_cast %358 : i32 to index
    %c2_249 = arith.constant 2 : index
    %379 = memref.load %arg1[%378, %c2_249] : memref<16x16xi32, #tpu.memory_space<smem>>
    %380 = arith.index_cast %379 : i32 to index
    %c0_250 = arith.constant 0 : index
    %381 = vector.load %arg3[%380, %c0_250] : memref<256x128xf32, #tpu.memory_space<vmem>>, vector<1x128xf32>
    %c3_251 = arith.constant 3 : index
    %c2_252 = arith.constant 2 : index
    %c0_253 = arith.constant 0 : index
    %382 = vector.load %arg6[%c3_251, %c2_252, %c0_253] : memref<8x16x128xf32, #tpu.memory_space<vmem>>, vector<1x1x128xf32>
    %383 = vector.shape_cast %382 : vector<1x1x128xf32> to vector<1x128xf32>
    %384 = vector.shape_cast %381 : vector<1x128xf32> to vector<1x1x128xf32>
    tpu.vector_store %arg6[%c3_251, %c2_252, %c0_253], %384 {strides = array<i32>} : memref<8x16x128xf32, #tpu.memory_space<vmem>>, vector<1x1x128xf32>,
    %385 = arith.index_cast %358 : i32 to index
    %c3_254 = arith.constant 3 : index
    %386 = memref.load %arg1[%385, %c3_254] : memref<16x16xi32, #tpu.memory_space<smem>>
    %387 = arith.index_cast %386 : i32 to index
    %c0_255 = arith.constant 0 : index
    %388 = vector.load %arg3[%387, %c0_255] : memref<256x128xf32, #tpu.memory_space<vmem>>, vector<1x128xf32>
    %c3_256 = arith.constant 3 : index
    %c3_257 = arith.constant 3 : index
    %c0_258 = arith.constant 0 : index
    %389 = vector.load %arg6[%c3_256, %c3_257, %c0_258] : memref<8x16x128xf32, #tpu.memory_space<vmem>>, vector<1x1x128xf32>
    %390 = vector.shape_cast %389 : vector<1x1x128xf32> to vector<1x128xf32>
    %391 = vector.shape_cast %388 : vector<1x128xf32> to vector<1x1x128xf32>
    tpu.vector_store %arg6[%c3_256, %c3_257, %c0_258], %391 {strides = array<i32>} : memref<8x16x128xf32, #tpu.memory_space<vmem>>, vector<1x1x128xf32>,
    %392 = arith.index_cast %358 : i32 to index
    %c4_259 = arith.constant 4 : index
    %393 = memref.load %arg1[%392, %c4_259] : memref<16x16xi32, #tpu.memory_space<smem>>
    %394 = arith.index_cast %393 : i32 to index
    %c0_260 = arith.constant 0 : index
    %395 = vector.load %arg3[%394, %c0_260] : memref<256x128xf32, #tpu.memory_space<vmem>>, vector<1x128xf32>
    %c3_261 = arith.constant 3 : index
    %c4_262 = arith.constant 4 : index
    %c0_263 = arith.constant 0 : index
    %396 = vector.load %arg6[%c3_261, %c4_262, %c0_263] : memref<8x16x128xf32, #tpu.memory_space<vmem>>, vector<1x1x128xf32>
    %397 = vector.shape_cast %396 : vector<1x1x128xf32> to vector<1x128xf32>
    %398 = vector.shape_cast %395 : vector<1x128xf32> to vector<1x1x128xf32>
    tpu.vector_store %arg6[%c3_261, %c4_262, %c0_263], %398 {strides = array<i32>} : memref<8x16x128xf32, #tpu.memory_space<vmem>>, vector<1x1x128xf32>,
    %399 = arith.index_cast %358 : i32 to index
    %c5_264 = arith.constant 5 : index
    %400 = memref.load %arg1[%399, %c5_264] : memref<16x16xi32, #tpu.memory_space<smem>>
    %401 = arith.index_cast %400 : i32 to index
    %c0_265 = arith.constant 0 : index
    %402 = vector.load %arg3[%401, %c0_265] : memref<256x128xf32, #tpu.memory_space<vmem>>, vector<1x128xf32>
    %c3_266 = arith.constant 3 : index
    %c5_267 = arith.constant 5 : index
    %c0_268 = arith.constant 0 : index
    %403 = vector.load %arg6[%c3_266, %c5_267, %c0_268] : memref<8x16x128xf32, #tpu.memory_space<vmem>>, vector<1x1x128xf32>
    %404 = vector.shape_cast %403 : vector<1x1x128xf32> to vector<1x128xf32>
    %405 = vector.shape_cast %402 : vector<1x128xf32> to vector<1x1x128xf32>
    tpu.vector_store %arg6[%c3_266, %c5_267, %c0_268], %405 {strides = array<i32>} : memref<8x16x128xf32, #tpu.memory_space<vmem>>, vector<1x1x128xf32>,
    %406 = arith.index_cast %358 : i32 to index
    %c6_269 = arith.constant 6 : index
    %407 = memref.load %arg1[%406, %c6_269] : memref<16x16xi32, #tpu.memory_space<smem>>
    %408 = arith.index_cast %407 : i32 to index
    %c0_270 = arith.constant 0 : index
    %409 = vector.load %arg3[%408, %c0_270] : memref<256x128xf32, #tpu.memory_space<vmem>>, vector<1x128xf32>
    %c3_271 = arith.constant 3 : index
    %c6_272 = arith.constant 6 : index
    %c0_273 = arith.constant 0 : index
    %410 = vector.load %arg6[%c3_271, %c6_272, %c0_273] : memref<8x16x128xf32, #tpu.memory_space<vmem>>, vector<1x1x128xf32>
    %411 = vector.shape_cast %410 : vector<1x1x128xf32> to vector<1x128xf32>
    %412 = vector.shape_cast %409 : vector<1x128xf32> to vector<1x1x128xf32>
    tpu.vector_store %arg6[%c3_271, %c6_272, %c0_273], %412 {strides = array<i32>} : memref<8x16x128xf32, #tpu.memory_space<vmem>>, vector<1x1x128xf32>,
    %413 = arith.index_cast %358 : i32 to index
    %c7_274 = arith.constant 7 : index
    %414 = memref.load %arg1[%413, %c7_274] : memref<16x16xi32, #tpu.memory_space<smem>>
    %415 = arith.index_cast %414 : i32 to index
    %c0_275 = arith.constant 0 : index
    %416 = vector.load %arg3[%415, %c0_275] : memref<256x128xf32, #tpu.memory_space<vmem>>, vector<1x128xf32>
    %c3_276 = arith.constant 3 : index
    %c7_277 = arith.constant 7 : index
    %c0_278 = arith.constant 0 : index
    %417 = vector.load %arg6[%c3_276, %c7_277, %c0_278] : memref<8x16x128xf32, #tpu.memory_space<vmem>>, vector<1x1x128xf32>
    %418 = vector.shape_cast %417 : vector<1x1x128xf32> to vector<1x128xf32>
    %419 = vector.shape_cast %416 : vector<1x128xf32> to vector<1x1x128xf32>
    tpu.vector_store %arg6[%c3_276, %c7_277, %c0_278], %419 {strides = array<i32>} : memref<8x16x128xf32, #tpu.memory_space<vmem>>, vector<1x1x128xf32>,
    %420 = arith.index_cast %358 : i32 to index
    %c8_279 = arith.constant 8 : index
    %421 = memref.load %arg1[%420, %c8_279] : memref<16x16xi32, #tpu.memory_space<smem>>
    %422 = arith.index_cast %421 : i32 to index
    %c0_280 = arith.constant 0 : index
    %423 = vector.load %arg3[%422, %c0_280] : memref<256x128xf32, #tpu.memory_space<vmem>>, vector<1x128xf32>
    %c3_281 = arith.constant 3 : index
    %c8_282 = arith.constant 8 : index
    %c0_283 = arith.constant 0 : index
    %424 = vector.load %arg6[%c3_281, %c8_282, %c0_283] : memref<8x16x128xf32, #tpu.memory_space<vmem>>, vector<1x1x128xf32>
    %425 = vector.shape_cast %424 : vector<1x1x128xf32> to vector<1x128xf32>
    %426 = vector.shape_cast %423 : vector<1x128xf32> to vector<1x1x128xf32>
    tpu.vector_store %arg6[%c3_281, %c8_282, %c0_283], %426 {strides = array<i32>} : memref<8x16x128xf32, #tpu.memory_space<vmem>>, vector<1x1x128xf32>,
    %427 = arith.index_cast %358 : i32 to index
    %c9_284 = arith.constant 9 : index
    %428 = memref.load %arg1[%427, %c9_284] : memref<16x16xi32, #tpu.memory_space<smem>>
    %429 = arith.index_cast %428 : i32 to index
    %c0_285 = arith.constant 0 : index
    %430 = vector.load %arg3[%429, %c0_285] : memref<256x128xf32, #tpu.memory_space<vmem>>, vector<1x128xf32>
    %c3_286 = arith.constant 3 : index
    %c9_287 = arith.constant 9 : index
    %c0_288 = arith.constant 0 : index
    %431 = vector.load %arg6[%c3_286, %c9_287, %c0_288] : memref<8x16x128xf32, #tpu.memory_space<vmem>>, vector<1x1x128xf32>
    %432 = vector.shape_cast %431 : vector<1x1x128xf32> to vector<1x128xf32>
    %433 = vector.shape_cast %430 : vector<1x128xf32> to vector<1x1x128xf32>
    tpu.vector_store %arg6[%c3_286, %c9_287, %c0_288], %433 {strides = array<i32>} : memref<8x16x128xf32, #tpu.memory_space<vmem>>, vector<1x1x128xf32>,
    %434 = arith.index_cast %358 : i32 to index
    %c10_289 = arith.constant 10 : index
    %435 = memref.load %arg1[%434, %c10_289] : memref<16x16xi32, #tpu.memory_space<smem>>
    %436 = arith.index_cast %435 : i32 to index
    %c0_290 = arith.constant 0 : index
    %437 = vector.load %arg3[%436, %c0_290] : memref<256x128xf32, #tpu.memory_space<vmem>>, vector<1x128xf32>
    %c3_291 = arith.constant 3 : index
    %c10_292 = arith.constant 10 : index
    %c0_293 = arith.constant 0 : index
    %438 = vector.load %arg6[%c3_291, %c10_292, %c0_293] : memref<8x16x128xf32, #tpu.memory_space<vmem>>, vector<1x1x128xf32>
    %439 = vector.shape_cast %438 : vector<1x1x128xf32> to vector<1x128xf32>
    %440 = vector.shape_cast %437 : vector<1x128xf32> to vector<1x1x128xf32>
    tpu.vector_store %arg6[%c3_291, %c10_292, %c0_293], %440 {strides = array<i32>} : memref<8x16x128xf32, #tpu.memory_space<vmem>>, vector<1x1x128xf32>,
    %441 = arith.index_cast %358 : i32 to index
    %c11_294 = arith.constant 11 : index
    %442 = memref.load %arg1[%441, %c11_294] : memref<16x16xi32, #tpu.memory_space<smem>>
    %443 = arith.index_cast %442 : i32 to index
    %c0_295 = arith.constant 0 : index
    %444 = vector.load %arg3[%443, %c0_295] : memref<256x128xf32, #tpu.memory_space<vmem>>, vector<1x128xf32>
    %c3_296 = arith.constant 3 : index
    %c11_297 = arith.constant 11 : index
    %c0_298 = arith.constant 0 : index
    %445 = vector.load %arg6[%c3_296, %c11_297, %c0_298] : memref<8x16x128xf32, #tpu.memory_space<vmem>>, vector<1x1x128xf32>
    %446 = vector.shape_cast %445 : vector<1x1x128xf32> to vector<1x128xf32>
    %447 = vector.shape_cast %444 : vector<1x128xf32> to vector<1x1x128xf32>
    tpu.vector_store %arg6[%c3_296, %c11_297, %c0_298], %447 {strides = array<i32>} : memref<8x16x128xf32, #tpu.memory_space<vmem>>, vector<1x1x128xf32>,
    %448 = arith.index_cast %358 : i32 to index
    %c12_299 = arith.constant 12 : index
    %449 = memref.load %arg1[%448, %c12_299] : memref<16x16xi32, #tpu.memory_space<smem>>
    %450 = arith.index_cast %449 : i32 to index
    %c0_300 = arith.constant 0 : index
    %451 = vector.load %arg3[%450, %c0_300] : memref<256x128xf32, #tpu.memory_space<vmem>>, vector<1x128xf32>
    %c3_301 = arith.constant 3 : index
    %c12_302 = arith.constant 12 : index
    %c0_303 = arith.constant 0 : index
    %452 = vector.load %arg6[%c3_301, %c12_302, %c0_303] : memref<8x16x128xf32, #tpu.memory_space<vmem>>, vector<1x1x128xf32>
    %453 = vector.shape_cast %452 : vector<1x1x128xf32> to vector<1x128xf32>
    %454 = vector.shape_cast %451 : vector<1x128xf32> to vector<1x1x128xf32>
    tpu.vector_store %arg6[%c3_301, %c12_302, %c0_303], %454 {strides = array<i32>} : memref<8x16x128xf32, #tpu.memory_space<vmem>>, vector<1x1x128xf32>,
    %455 = arith.index_cast %358 : i32 to index
    %c13_304 = arith.constant 13 : index
    %456 = memref.load %arg1[%455, %c13_304] : memref<16x16xi32, #tpu.memory_space<smem>>
    %457 = arith.index_cast %456 : i32 to index
    %c0_305 = arith.constant 0 : index
    %458 = vector.load %arg3[%457, %c0_305] : memref<256x128xf32, #tpu.memory_space<vmem>>, vector<1x128xf32>
    %c3_306 = arith.constant 3 : index
    %c13_307 = arith.constant 13 : index
    %c0_308 = arith.constant 0 : index
    %459 = vector.load %arg6[%c3_306, %c13_307, %c0_308] : memref<8x16x128xf32, #tpu.memory_space<vmem>>, vector<1x1x128xf32>
    %460 = vector.shape_cast %459 : vector<1x1x128xf32> to vector<1x128xf32>
    %461 = vector.shape_cast %458 : vector<1x128xf32> to vector<1x1x128xf32>
    tpu.vector_store %arg6[%c3_306, %c13_307, %c0_308], %461 {strides = array<i32>} : memref<8x16x128xf32, #tpu.memory_space<vmem>>, vector<1x1x128xf32>,
    %462 = arith.index_cast %358 : i32 to index
    %c14_309 = arith.constant 14 : index
    %463 = memref.load %arg1[%462, %c14_309] : memref<16x16xi32, #tpu.memory_space<smem>>
    %464 = arith.index_cast %463 : i32 to index
    %c0_310 = arith.constant 0 : index
    %465 = vector.load %arg3[%464, %c0_310] : memref<256x128xf32, #tpu.memory_space<vmem>>, vector<1x128xf32>
    %c3_311 = arith.constant 3 : index
    %c14_312 = arith.constant 14 : index
    %c0_313 = arith.constant 0 : index
    %466 = vector.load %arg6[%c3_311, %c14_312, %c0_313] : memref<8x16x128xf32, #tpu.memory_space<vmem>>, vector<1x1x128xf32>
    %467 = vector.shape_cast %466 : vector<1x1x128xf32> to vector<1x128xf32>
    %468 = vector.shape_cast %465 : vector<1x128xf32> to vector<1x1x128xf32>
    tpu.vector_store %arg6[%c3_311, %c14_312, %c0_313], %468 {strides = array<i32>} : memref<8x16x128xf32, #tpu.memory_space<vmem>>, vector<1x1x128xf32>,
    %469 = arith.index_cast %358 : i32 to index
    %c15_314 = arith.constant 15 : index
    %470 = memref.load %arg1[%469, %c15_314] : memref<16x16xi32, #tpu.memory_space<smem>>
    %471 = arith.index_cast %470 : i32 to index
    %c0_315 = arith.constant 0 : index
    %472 = vector.load %arg3[%471, %c0_315] : memref<256x128xf32, #tpu.memory_space<vmem>>, vector<1x128xf32>
    %c3_316 = arith.constant 3 : index
    %c15_317 = arith.constant 15 : index
    %c0_318 = arith.constant 0 : index
    %473 = vector.load %arg6[%c3_316, %c15_317, %c0_318] : memref<8x16x128xf32, #tpu.memory_space<vmem>>, vector<1x1x128xf32>
    %474 = vector.shape_cast %473 : vector<1x1x128xf32> to vector<1x128xf32>
    %475 = vector.shape_cast %472 : vector<1x128xf32> to vector<1x1x128xf32>
    tpu.vector_store %arg6[%c3_316, %c15_317, %c0_318], %475 {strides = array<i32>} : memref<8x16x128xf32, #tpu.memory_space<vmem>>, vector<1x1x128xf32>,
    %c8_i32_319 = arith.constant 8 : i32
    %476 = arith.muli %arg0, %c8_i32_319 : i32
    %c4_i32 = arith.constant 4 : i32
    %477 = arith.addi %476, %c4_i32 : i32
    %478 = arith.index_cast %477 : i32 to index
    %479 = memref.load %arg2[%478] : memref<16xi32, #tpu.memory_space<smem>>
    %480 = arith.index_cast %479 : i32 to index
    %c0_320 = arith.constant 0 : index
    %481 = vector.load %arg3[%480, %c0_320] : memref<256x128xf32, #tpu.memory_space<vmem>>, vector<1x128xf32>
    %c4_321 = arith.constant 4 : index
    %c0_322 = arith.constant 0 : index
    %482 = vector.load %arg7[%c4_321, %c0_322] : memref<8x128xf32, #tpu.memory_space<vmem>>, vector<1x128xf32>
    tpu.vector_store %arg7[%c4_321, %c0_322], %481 {strides = array<i32>} : memref<8x128xf32, #tpu.memory_space<vmem>>, vector<1x128xf32>,
    %483 = arith.index_cast %477 : i32 to index
    %c0_323 = arith.constant 0 : index
    %484 = memref.load %arg1[%483, %c0_323] : memref<16x16xi32, #tpu.memory_space<smem>>
    %485 = arith.index_cast %484 : i32 to index
    %c0_324 = arith.constant 0 : index
    %486 = vector.load %arg3[%485, %c0_324] : memref<256x128xf32, #tpu.memory_space<vmem>>, vector<1x128xf32>
    %c4_325 = arith.constant 4 : index
    %c0_326 = arith.constant 0 : index
    %c0_327 = arith.constant 0 : index
    %487 = vector.load %arg6[%c4_325, %c0_326, %c0_327] : memref<8x16x128xf32, #tpu.memory_space<vmem>>, vector<1x1x128xf32>
    %488 = vector.shape_cast %487 : vector<1x1x128xf32> to vector<1x128xf32>
    %489 = vector.shape_cast %486 : vector<1x128xf32> to vector<1x1x128xf32>
    tpu.vector_store %arg6[%c4_325, %c0_326, %c0_327], %489 {strides = array<i32>} : memref<8x16x128xf32, #tpu.memory_space<vmem>>, vector<1x1x128xf32>,
    %490 = arith.index_cast %477 : i32 to index
    %c1_328 = arith.constant 1 : index
    %491 = memref.load %arg1[%490, %c1_328] : memref<16x16xi32, #tpu.memory_space<smem>>
    %492 = arith.index_cast %491 : i32 to index
    %c0_329 = arith.constant 0 : index
    %493 = vector.load %arg3[%492, %c0_329] : memref<256x128xf32, #tpu.memory_space<vmem>>, vector<1x128xf32>
    %c4_330 = arith.constant 4 : index
    %c1_331 = arith.constant 1 : index
    %c0_332 = arith.constant 0 : index
    %494 = vector.load %arg6[%c4_330, %c1_331, %c0_332] : memref<8x16x128xf32, #tpu.memory_space<vmem>>, vector<1x1x128xf32>
    %495 = vector.shape_cast %494 : vector<1x1x128xf32> to vector<1x128xf32>
    %496 = vector.shape_cast %493 : vector<1x128xf32> to vector<1x1x128xf32>
    tpu.vector_store %arg6[%c4_330, %c1_331, %c0_332], %496 {strides = array<i32>} : memref<8x16x128xf32, #tpu.memory_space<vmem>>, vector<1x1x128xf32>,
    %497 = arith.index_cast %477 : i32 to index
    %c2_333 = arith.constant 2 : index
    %498 = memref.load %arg1[%497, %c2_333] : memref<16x16xi32, #tpu.memory_space<smem>>
    %499 = arith.index_cast %498 : i32 to index
    %c0_334 = arith.constant 0 : index
    %500 = vector.load %arg3[%499, %c0_334] : memref<256x128xf32, #tpu.memory_space<vmem>>, vector<1x128xf32>
    %c4_335 = arith.constant 4 : index
    %c2_336 = arith.constant 2 : index
    %c0_337 = arith.constant 0 : index
    %501 = vector.load %arg6[%c4_335, %c2_336, %c0_337] : memref<8x16x128xf32, #tpu.memory_space<vmem>>, vector<1x1x128xf32>
    %502 = vector.shape_cast %501 : vector<1x1x128xf32> to vector<1x128xf32>
    %503 = vector.shape_cast %500 : vector<1x128xf32> to vector<1x1x128xf32>
    tpu.vector_store %arg6[%c4_335, %c2_336, %c0_337], %503 {strides = array<i32>} : memref<8x16x128xf32, #tpu.memory_space<vmem>>, vector<1x1x128xf32>,
    %504 = arith.index_cast %477 : i32 to index
    %c3_338 = arith.constant 3 : index
    %505 = memref.load %arg1[%504, %c3_338] : memref<16x16xi32, #tpu.memory_space<smem>>
    %506 = arith.index_cast %505 : i32 to index
    %c0_339 = arith.constant 0 : index
    %507 = vector.load %arg3[%506, %c0_339] : memref<256x128xf32, #tpu.memory_space<vmem>>, vector<1x128xf32>
    %c4_340 = arith.constant 4 : index
    %c3_341 = arith.constant 3 : index
    %c0_342 = arith.constant 0 : index
    %508 = vector.load %arg6[%c4_340, %c3_341, %c0_342] : memref<8x16x128xf32, #tpu.memory_space<vmem>>, vector<1x1x128xf32>
    %509 = vector.shape_cast %508 : vector<1x1x128xf32> to vector<1x128xf32>
    %510 = vector.shape_cast %507 : vector<1x128xf32> to vector<1x1x128xf32>
    tpu.vector_store %arg6[%c4_340, %c3_341, %c0_342], %510 {strides = array<i32>} : memref<8x16x128xf32, #tpu.memory_space<vmem>>, vector<1x1x128xf32>,
    %511 = arith.index_cast %477 : i32 to index
    %c4_343 = arith.constant 4 : index
    %512 = memref.load %arg1[%511, %c4_343] : memref<16x16xi32, #tpu.memory_space<smem>>
    %513 = arith.index_cast %512 : i32 to index
    %c0_344 = arith.constant 0 : index
    %514 = vector.load %arg3[%513, %c0_344] : memref<256x128xf32, #tpu.memory_space<vmem>>, vector<1x128xf32>
    %c4_345 = arith.constant 4 : index
    %c4_346 = arith.constant 4 : index
    %c0_347 = arith.constant 0 : index
    %515 = vector.load %arg6[%c4_345, %c4_346, %c0_347] : memref<8x16x128xf32, #tpu.memory_space<vmem>>, vector<1x1x128xf32>
    %516 = vector.shape_cast %515 : vector<1x1x128xf32> to vector<1x128xf32>
    %517 = vector.shape_cast %514 : vector<1x128xf32> to vector<1x1x128xf32>
    tpu.vector_store %arg6[%c4_345, %c4_346, %c0_347], %517 {strides = array<i32>} : memref<8x16x128xf32, #tpu.memory_space<vmem>>, vector<1x1x128xf32>,
    %518 = arith.index_cast %477 : i32 to index
    %c5_348 = arith.constant 5 : index
    %519 = memref.load %arg1[%518, %c5_348] : memref<16x16xi32, #tpu.memory_space<smem>>
    %520 = arith.index_cast %519 : i32 to index
    %c0_349 = arith.constant 0 : index
    %521 = vector.load %arg3[%520, %c0_349] : memref<256x128xf32, #tpu.memory_space<vmem>>, vector<1x128xf32>
    %c4_350 = arith.constant 4 : index
    %c5_351 = arith.constant 5 : index
    %c0_352 = arith.constant 0 : index
    %522 = vector.load %arg6[%c4_350, %c5_351, %c0_352] : memref<8x16x128xf32, #tpu.memory_space<vmem>>, vector<1x1x128xf32>
    %523 = vector.shape_cast %522 : vector<1x1x128xf32> to vector<1x128xf32>
    %524 = vector.shape_cast %521 : vector<1x128xf32> to vector<1x1x128xf32>
    tpu.vector_store %arg6[%c4_350, %c5_351, %c0_352], %524 {strides = array<i32>} : memref<8x16x128xf32, #tpu.memory_space<vmem>>, vector<1x1x128xf32>,
    %525 = arith.index_cast %477 : i32 to index
    %c6_353 = arith.constant 6 : index
    %526 = memref.load %arg1[%525, %c6_353] : memref<16x16xi32, #tpu.memory_space<smem>>
    %527 = arith.index_cast %526 : i32 to index
    %c0_354 = arith.constant 0 : index
    %528 = vector.load %arg3[%527, %c0_354] : memref<256x128xf32, #tpu.memory_space<vmem>>, vector<1x128xf32>
    %c4_355 = arith.constant 4 : index
    %c6_356 = arith.constant 6 : index
    %c0_357 = arith.constant 0 : index
    %529 = vector.load %arg6[%c4_355, %c6_356, %c0_357] : memref<8x16x128xf32, #tpu.memory_space<vmem>>, vector<1x1x128xf32>
    %530 = vector.shape_cast %529 : vector<1x1x128xf32> to vector<1x128xf32>
    %531 = vector.shape_cast %528 : vector<1x128xf32> to vector<1x1x128xf32>
    tpu.vector_store %arg6[%c4_355, %c6_356, %c0_357], %531 {strides = array<i32>} : memref<8x16x128xf32, #tpu.memory_space<vmem>>, vector<1x1x128xf32>,
    %532 = arith.index_cast %477 : i32 to index
    %c7_358 = arith.constant 7 : index
    %533 = memref.load %arg1[%532, %c7_358] : memref<16x16xi32, #tpu.memory_space<smem>>
    %534 = arith.index_cast %533 : i32 to index
    %c0_359 = arith.constant 0 : index
    %535 = vector.load %arg3[%534, %c0_359] : memref<256x128xf32, #tpu.memory_space<vmem>>, vector<1x128xf32>
    %c4_360 = arith.constant 4 : index
    %c7_361 = arith.constant 7 : index
    %c0_362 = arith.constant 0 : index
    %536 = vector.load %arg6[%c4_360, %c7_361, %c0_362] : memref<8x16x128xf32, #tpu.memory_space<vmem>>, vector<1x1x128xf32>
    %537 = vector.shape_cast %536 : vector<1x1x128xf32> to vector<1x128xf32>
    %538 = vector.shape_cast %535 : vector<1x128xf32> to vector<1x1x128xf32>
    tpu.vector_store %arg6[%c4_360, %c7_361, %c0_362], %538 {strides = array<i32>} : memref<8x16x128xf32, #tpu.memory_space<vmem>>, vector<1x1x128xf32>,
    %539 = arith.index_cast %477 : i32 to index
    %c8_363 = arith.constant 8 : index
    %540 = memref.load %arg1[%539, %c8_363] : memref<16x16xi32, #tpu.memory_space<smem>>
    %541 = arith.index_cast %540 : i32 to index
    %c0_364 = arith.constant 0 : index
    %542 = vector.load %arg3[%541, %c0_364] : memref<256x128xf32, #tpu.memory_space<vmem>>, vector<1x128xf32>
    %c4_365 = arith.constant 4 : index
    %c8_366 = arith.constant 8 : index
    %c0_367 = arith.constant 0 : index
    %543 = vector.load %arg6[%c4_365, %c8_366, %c0_367] : memref<8x16x128xf32, #tpu.memory_space<vmem>>, vector<1x1x128xf32>
    %544 = vector.shape_cast %543 : vector<1x1x128xf32> to vector<1x128xf32>
    %545 = vector.shape_cast %542 : vector<1x128xf32> to vector<1x1x128xf32>
    tpu.vector_store %arg6[%c4_365, %c8_366, %c0_367], %545 {strides = array<i32>} : memref<8x16x128xf32, #tpu.memory_space<vmem>>, vector<1x1x128xf32>,
    %546 = arith.index_cast %477 : i32 to index
    %c9_368 = arith.constant 9 : index
    %547 = memref.load %arg1[%546, %c9_368] : memref<16x16xi32, #tpu.memory_space<smem>>
    %548 = arith.index_cast %547 : i32 to index
    %c0_369 = arith.constant 0 : index
    %549 = vector.load %arg3[%548, %c0_369] : memref<256x128xf32, #tpu.memory_space<vmem>>, vector<1x128xf32>
    %c4_370 = arith.constant 4 : index
    %c9_371 = arith.constant 9 : index
    %c0_372 = arith.constant 0 : index
    %550 = vector.load %arg6[%c4_370, %c9_371, %c0_372] : memref<8x16x128xf32, #tpu.memory_space<vmem>>, vector<1x1x128xf32>
    %551 = vector.shape_cast %550 : vector<1x1x128xf32> to vector<1x128xf32>
    %552 = vector.shape_cast %549 : vector<1x128xf32> to vector<1x1x128xf32>
    tpu.vector_store %arg6[%c4_370, %c9_371, %c0_372], %552 {strides = array<i32>} : memref<8x16x128xf32, #tpu.memory_space<vmem>>, vector<1x1x128xf32>,
    %553 = arith.index_cast %477 : i32 to index
    %c10_373 = arith.constant 10 : index
    %554 = memref.load %arg1[%553, %c10_373] : memref<16x16xi32, #tpu.memory_space<smem>>
    %555 = arith.index_cast %554 : i32 to index
    %c0_374 = arith.constant 0 : index
    %556 = vector.load %arg3[%555, %c0_374] : memref<256x128xf32, #tpu.memory_space<vmem>>, vector<1x128xf32>
    %c4_375 = arith.constant 4 : index
    %c10_376 = arith.constant 10 : index
    %c0_377 = arith.constant 0 : index
    %557 = vector.load %arg6[%c4_375, %c10_376, %c0_377] : memref<8x16x128xf32, #tpu.memory_space<vmem>>, vector<1x1x128xf32>
    %558 = vector.shape_cast %557 : vector<1x1x128xf32> to vector<1x128xf32>
    %559 = vector.shape_cast %556 : vector<1x128xf32> to vector<1x1x128xf32>
    tpu.vector_store %arg6[%c4_375, %c10_376, %c0_377], %559 {strides = array<i32>} : memref<8x16x128xf32, #tpu.memory_space<vmem>>, vector<1x1x128xf32>,
    %560 = arith.index_cast %477 : i32 to index
    %c11_378 = arith.constant 11 : index
    %561 = memref.load %arg1[%560, %c11_378] : memref<16x16xi32, #tpu.memory_space<smem>>
    %562 = arith.index_cast %561 : i32 to index
    %c0_379 = arith.constant 0 : index
    %563 = vector.load %arg3[%562, %c0_379] : memref<256x128xf32, #tpu.memory_space<vmem>>, vector<1x128xf32>
    %c4_380 = arith.constant 4 : index
    %c11_381 = arith.constant 11 : index
    %c0_382 = arith.constant 0 : index
    %564 = vector.load %arg6[%c4_380, %c11_381, %c0_382] : memref<8x16x128xf32, #tpu.memory_space<vmem>>, vector<1x1x128xf32>
    %565 = vector.shape_cast %564 : vector<1x1x128xf32> to vector<1x128xf32>
    %566 = vector.shape_cast %563 : vector<1x128xf32> to vector<1x1x128xf32>
    tpu.vector_store %arg6[%c4_380, %c11_381, %c0_382], %566 {strides = array<i32>} : memref<8x16x128xf32, #tpu.memory_space<vmem>>, vector<1x1x128xf32>,
    %567 = arith.index_cast %477 : i32 to index
    %c12_383 = arith.constant 12 : index
    %568 = memref.load %arg1[%567, %c12_383] : memref<16x16xi32, #tpu.memory_space<smem>>
    %569 = arith.index_cast %568 : i32 to index
    %c0_384 = arith.constant 0 : index
    %570 = vector.load %arg3[%569, %c0_384] : memref<256x128xf32, #tpu.memory_space<vmem>>, vector<1x128xf32>
    %c4_385 = arith.constant 4 : index
    %c12_386 = arith.constant 12 : index
    %c0_387 = arith.constant 0 : index
    %571 = vector.load %arg6[%c4_385, %c12_386, %c0_387] : memref<8x16x128xf32, #tpu.memory_space<vmem>>, vector<1x1x128xf32>
    %572 = vector.shape_cast %571 : vector<1x1x128xf32> to vector<1x128xf32>
    %573 = vector.shape_cast %570 : vector<1x128xf32> to vector<1x1x128xf32>
    tpu.vector_store %arg6[%c4_385, %c12_386, %c0_387], %573 {strides = array<i32>} : memref<8x16x128xf32, #tpu.memory_space<vmem>>, vector<1x1x128xf32>,
    %574 = arith.index_cast %477 : i32 to index
    %c13_388 = arith.constant 13 : index
    %575 = memref.load %arg1[%574, %c13_388] : memref<16x16xi32, #tpu.memory_space<smem>>
    %576 = arith.index_cast %575 : i32 to index
    %c0_389 = arith.constant 0 : index
    %577 = vector.load %arg3[%576, %c0_389] : memref<256x128xf32, #tpu.memory_space<vmem>>, vector<1x128xf32>
    %c4_390 = arith.constant 4 : index
    %c13_391 = arith.constant 13 : index
    %c0_392 = arith.constant 0 : index
    %578 = vector.load %arg6[%c4_390, %c13_391, %c0_392] : memref<8x16x128xf32, #tpu.memory_space<vmem>>, vector<1x1x128xf32>
    %579 = vector.shape_cast %578 : vector<1x1x128xf32> to vector<1x128xf32>
    %580 = vector.shape_cast %577 : vector<1x128xf32> to vector<1x1x128xf32>
    tpu.vector_store %arg6[%c4_390, %c13_391, %c0_392], %580 {strides = array<i32>} : memref<8x16x128xf32, #tpu.memory_space<vmem>>, vector<1x1x128xf32>,
    %581 = arith.index_cast %477 : i32 to index
    %c14_393 = arith.constant 14 : index
    %582 = memref.load %arg1[%581, %c14_393] : memref<16x16xi32, #tpu.memory_space<smem>>
    %583 = arith.index_cast %582 : i32 to index
    %c0_394 = arith.constant 0 : index
    %584 = vector.load %arg3[%583, %c0_394] : memref<256x128xf32, #tpu.memory_space<vmem>>, vector<1x128xf32>
    %c4_395 = arith.constant 4 : index
    %c14_396 = arith.constant 14 : index
    %c0_397 = arith.constant 0 : index
    %585 = vector.load %arg6[%c4_395, %c14_396, %c0_397] : memref<8x16x128xf32, #tpu.memory_space<vmem>>, vector<1x1x128xf32>
    %586 = vector.shape_cast %585 : vector<1x1x128xf32> to vector<1x128xf32>
    %587 = vector.shape_cast %584 : vector<1x128xf32> to vector<1x1x128xf32>
    tpu.vector_store %arg6[%c4_395, %c14_396, %c0_397], %587 {strides = array<i32>} : memref<8x16x128xf32, #tpu.memory_space<vmem>>, vector<1x1x128xf32>,
    %588 = arith.index_cast %477 : i32 to index
    %c15_398 = arith.constant 15 : index
    %589 = memref.load %arg1[%588, %c15_398] : memref<16x16xi32, #tpu.memory_space<smem>>
    %590 = arith.index_cast %589 : i32 to index
    %c0_399 = arith.constant 0 : index
    %591 = vector.load %arg3[%590, %c0_399] : memref<256x128xf32, #tpu.memory_space<vmem>>, vector<1x128xf32>
    %c4_400 = arith.constant 4 : index
    %c15_401 = arith.constant 15 : index
    %c0_402 = arith.constant 0 : index
    %592 = vector.load %arg6[%c4_400, %c15_401, %c0_402] : memref<8x16x128xf32, #tpu.memory_space<vmem>>, vector<1x1x128xf32>
    %593 = vector.shape_cast %592 : vector<1x1x128xf32> to vector<1x128xf32>
    %594 = vector.shape_cast %591 : vector<1x128xf32> to vector<1x1x128xf32>
    tpu.vector_store %arg6[%c4_400, %c15_401, %c0_402], %594 {strides = array<i32>} : memref<8x16x128xf32, #tpu.memory_space<vmem>>, vector<1x1x128xf32>,
    %c8_i32_403 = arith.constant 8 : i32
    %595 = arith.muli %arg0, %c8_i32_403 : i32
    %c5_i32 = arith.constant 5 : i32
    %596 = arith.addi %595, %c5_i32 : i32
    %597 = arith.index_cast %596 : i32 to index
    %598 = memref.load %arg2[%597] : memref<16xi32, #tpu.memory_space<smem>>
    %599 = arith.index_cast %598 : i32 to index
    %c0_404 = arith.constant 0 : index
    %600 = vector.load %arg3[%599, %c0_404] : memref<256x128xf32, #tpu.memory_space<vmem>>, vector<1x128xf32>
    %c5_405 = arith.constant 5 : index
    %c0_406 = arith.constant 0 : index
    %601 = vector.load %arg7[%c5_405, %c0_406] : memref<8x128xf32, #tpu.memory_space<vmem>>, vector<1x128xf32>
    tpu.vector_store %arg7[%c5_405, %c0_406], %600 {strides = array<i32>} : memref<8x128xf32, #tpu.memory_space<vmem>>, vector<1x128xf32>,
    %602 = arith.index_cast %596 : i32 to index
    %c0_407 = arith.constant 0 : index
    %603 = memref.load %arg1[%602, %c0_407] : memref<16x16xi32, #tpu.memory_space<smem>>
    %604 = arith.index_cast %603 : i32 to index
    %c0_408 = arith.constant 0 : index
    %605 = vector.load %arg3[%604, %c0_408] : memref<256x128xf32, #tpu.memory_space<vmem>>, vector<1x128xf32>
    %c5_409 = arith.constant 5 : index
    %c0_410 = arith.constant 0 : index
    %c0_411 = arith.constant 0 : index
    %606 = vector.load %arg6[%c5_409, %c0_410, %c0_411] : memref<8x16x128xf32, #tpu.memory_space<vmem>>, vector<1x1x128xf32>
    %607 = vector.shape_cast %606 : vector<1x1x128xf32> to vector<1x128xf32>
    %608 = vector.shape_cast %605 : vector<1x128xf32> to vector<1x1x128xf32>
    tpu.vector_store %arg6[%c5_409, %c0_410, %c0_411], %608 {strides = array<i32>} : memref<8x16x128xf32, #tpu.memory_space<vmem>>, vector<1x1x128xf32>,
    %609 = arith.index_cast %596 : i32 to index
    %c1_412 = arith.constant 1 : index
    %610 = memref.load %arg1[%609, %c1_412] : memref<16x16xi32, #tpu.memory_space<smem>>
    %611 = arith.index_cast %610 : i32 to index
    %c0_413 = arith.constant 0 : index
    %612 = vector.load %arg3[%611, %c0_413] : memref<256x128xf32, #tpu.memory_space<vmem>>, vector<1x128xf32>
    %c5_414 = arith.constant 5 : index
    %c1_415 = arith.constant 1 : index
    %c0_416 = arith.constant 0 : index
    %613 = vector.load %arg6[%c5_414, %c1_415, %c0_416] : memref<8x16x128xf32, #tpu.memory_space<vmem>>, vector<1x1x128xf32>
    %614 = vector.shape_cast %613 : vector<1x1x128xf32> to vector<1x128xf32>
    %615 = vector.shape_cast %612 : vector<1x128xf32> to vector<1x1x128xf32>
    tpu.vector_store %arg6[%c5_414, %c1_415, %c0_416], %615 {strides = array<i32>} : memref<8x16x128xf32, #tpu.memory_space<vmem>>, vector<1x1x128xf32>,
    %616 = arith.index_cast %596 : i32 to index
    %c2_417 = arith.constant 2 : index
    %617 = memref.load %arg1[%616, %c2_417] : memref<16x16xi32, #tpu.memory_space<smem>>
    %618 = arith.index_cast %617 : i32 to index
    %c0_418 = arith.constant 0 : index
    %619 = vector.load %arg3[%618, %c0_418] : memref<256x128xf32, #tpu.memory_space<vmem>>, vector<1x128xf32>
    %c5_419 = arith.constant 5 : index
    %c2_420 = arith.constant 2 : index
    %c0_421 = arith.constant 0 : index
    %620 = vector.load %arg6[%c5_419, %c2_420, %c0_421] : memref<8x16x128xf32, #tpu.memory_space<vmem>>, vector<1x1x128xf32>
    %621 = vector.shape_cast %620 : vector<1x1x128xf32> to vector<1x128xf32>
    %622 = vector.shape_cast %619 : vector<1x128xf32> to vector<1x1x128xf32>
    tpu.vector_store %arg6[%c5_419, %c2_420, %c0_421], %622 {strides = array<i32>} : memref<8x16x128xf32, #tpu.memory_space<vmem>>, vector<1x1x128xf32>,
    %623 = arith.index_cast %596 : i32 to index
    %c3_422 = arith.constant 3 : index
    %624 = memref.load %arg1[%623, %c3_422] : memref<16x16xi32, #tpu.memory_space<smem>>
    %625 = arith.index_cast %624 : i32 to index
    %c0_423 = arith.constant 0 : index
    %626 = vector.load %arg3[%625, %c0_423] : memref<256x128xf32, #tpu.memory_space<vmem>>, vector<1x128xf32>
    %c5_424 = arith.constant 5 : index
    %c3_425 = arith.constant 3 : index
    %c0_426 = arith.constant 0 : index
    %627 = vector.load %arg6[%c5_424, %c3_425, %c0_426] : memref<8x16x128xf32, #tpu.memory_space<vmem>>, vector<1x1x128xf32>
    %628 = vector.shape_cast %627 : vector<1x1x128xf32> to vector<1x128xf32>
    %629 = vector.shape_cast %626 : vector<1x128xf32> to vector<1x1x128xf32>
    tpu.vector_store %arg6[%c5_424, %c3_425, %c0_426], %629 {strides = array<i32>} : memref<8x16x128xf32, #tpu.memory_space<vmem>>, vector<1x1x128xf32>,
    %630 = arith.index_cast %596 : i32 to index
    %c4_427 = arith.constant 4 : index
    %631 = memref.load %arg1[%630, %c4_427] : memref<16x16xi32, #tpu.memory_space<smem>>
    %632 = arith.index_cast %631 : i32 to index
    %c0_428 = arith.constant 0 : index
    %633 = vector.load %arg3[%632, %c0_428] : memref<256x128xf32, #tpu.memory_space<vmem>>, vector<1x128xf32>
    %c5_429 = arith.constant 5 : index
    %c4_430 = arith.constant 4 : index
    %c0_431 = arith.constant 0 : index
    %634 = vector.load %arg6[%c5_429, %c4_430, %c0_431] : memref<8x16x128xf32, #tpu.memory_space<vmem>>, vector<1x1x128xf32>
    %635 = vector.shape_cast %634 : vector<1x1x128xf32> to vector<1x128xf32>
    %636 = vector.shape_cast %633 : vector<1x128xf32> to vector<1x1x128xf32>
    tpu.vector_store %arg6[%c5_429, %c4_430, %c0_431], %636 {strides = array<i32>} : memref<8x16x128xf32, #tpu.memory_space<vmem>>, vector<1x1x128xf32>,
    %637 = arith.index_cast %596 : i32 to index
    %c5_432 = arith.constant 5 : index
    %638 = memref.load %arg1[%637, %c5_432] : memref<16x16xi32, #tpu.memory_space<smem>>
    %639 = arith.index_cast %638 : i32 to index
    %c0_433 = arith.constant 0 : index
    %640 = vector.load %arg3[%639, %c0_433] : memref<256x128xf32, #tpu.memory_space<vmem>>, vector<1x128xf32>
    %c5_434 = arith.constant 5 : index
    %c5_435 = arith.constant 5 : index
    %c0_436 = arith.constant 0 : index
    %641 = vector.load %arg6[%c5_434, %c5_435, %c0_436] : memref<8x16x128xf32, #tpu.memory_space<vmem>>, vector<1x1x128xf32>
    %642 = vector.shape_cast %641 : vector<1x1x128xf32> to vector<1x128xf32>
    %643 = vector.shape_cast %640 : vector<1x128xf32> to vector<1x1x128xf32>
    tpu.vector_store %arg6[%c5_434, %c5_435, %c0_436], %643 {strides = array<i32>} : memref<8x16x128xf32, #tpu.memory_space<vmem>>, vector<1x1x128xf32>,
    %644 = arith.index_cast %596 : i32 to index
    %c6_437 = arith.constant 6 : index
    %645 = memref.load %arg1[%644, %c6_437] : memref<16x16xi32, #tpu.memory_space<smem>>
    %646 = arith.index_cast %645 : i32 to index
    %c0_438 = arith.constant 0 : index
    %647 = vector.load %arg3[%646, %c0_438] : memref<256x128xf32, #tpu.memory_space<vmem>>, vector<1x128xf32>
    %c5_439 = arith.constant 5 : index
    %c6_440 = arith.constant 6 : index
    %c0_441 = arith.constant 0 : index
    %648 = vector.load %arg6[%c5_439, %c6_440, %c0_441] : memref<8x16x128xf32, #tpu.memory_space<vmem>>, vector<1x1x128xf32>
    %649 = vector.shape_cast %648 : vector<1x1x128xf32> to vector<1x128xf32>
    %650 = vector.shape_cast %647 : vector<1x128xf32> to vector<1x1x128xf32>
    tpu.vector_store %arg6[%c5_439, %c6_440, %c0_441], %650 {strides = array<i32>} : memref<8x16x128xf32, #tpu.memory_space<vmem>>, vector<1x1x128xf32>,
    %651 = arith.index_cast %596 : i32 to index
    %c7_442 = arith.constant 7 : index
    %652 = memref.load %arg1[%651, %c7_442] : memref<16x16xi32, #tpu.memory_space<smem>>
    %653 = arith.index_cast %652 : i32 to index
    %c0_443 = arith.constant 0 : index
    %654 = vector.load %arg3[%653, %c0_443] : memref<256x128xf32, #tpu.memory_space<vmem>>, vector<1x128xf32>
    %c5_444 = arith.constant 5 : index
    %c7_445 = arith.constant 7 : index
    %c0_446 = arith.constant 0 : index
    %655 = vector.load %arg6[%c5_444, %c7_445, %c0_446] : memref<8x16x128xf32, #tpu.memory_space<vmem>>, vector<1x1x128xf32>
    %656 = vector.shape_cast %655 : vector<1x1x128xf32> to vector<1x128xf32>
    %657 = vector.shape_cast %654 : vector<1x128xf32> to vector<1x1x128xf32>
    tpu.vector_store %arg6[%c5_444, %c7_445, %c0_446], %657 {strides = array<i32>} : memref<8x16x128xf32, #tpu.memory_space<vmem>>, vector<1x1x128xf32>,
    %658 = arith.index_cast %596 : i32 to index
    %c8_447 = arith.constant 8 : index
    %659 = memref.load %arg1[%658, %c8_447] : memref<16x16xi32, #tpu.memory_space<smem>>
    %660 = arith.index_cast %659 : i32 to index
    %c0_448 = arith.constant 0 : index
    %661 = vector.load %arg3[%660, %c0_448] : memref<256x128xf32, #tpu.memory_space<vmem>>, vector<1x128xf32>
    %c5_449 = arith.constant 5 : index
    %c8_450 = arith.constant 8 : index
    %c0_451 = arith.constant 0 : index
    %662 = vector.load %arg6[%c5_449, %c8_450, %c0_451] : memref<8x16x128xf32, #tpu.memory_space<vmem>>, vector<1x1x128xf32>
    %663 = vector.shape_cast %662 : vector<1x1x128xf32> to vector<1x128xf32>
    %664 = vector.shape_cast %661 : vector<1x128xf32> to vector<1x1x128xf32>
    tpu.vector_store %arg6[%c5_449, %c8_450, %c0_451], %664 {strides = array<i32>} : memref<8x16x128xf32, #tpu.memory_space<vmem>>, vector<1x1x128xf32>,
    %665 = arith.index_cast %596 : i32 to index
    %c9_452 = arith.constant 9 : index
    %666 = memref.load %arg1[%665, %c9_452] : memref<16x16xi32, #tpu.memory_space<smem>>
    %667 = arith.index_cast %666 : i32 to index
    %c0_453 = arith.constant 0 : index
    %668 = vector.load %arg3[%667, %c0_453] : memref<256x128xf32, #tpu.memory_space<vmem>>, vector<1x128xf32>
    %c5_454 = arith.constant 5 : index
    %c9_455 = arith.constant 9 : index
    %c0_456 = arith.constant 0 : index
    %669 = vector.load %arg6[%c5_454, %c9_455, %c0_456] : memref<8x16x128xf32, #tpu.memory_space<vmem>>, vector<1x1x128xf32>
    %670 = vector.shape_cast %669 : vector<1x1x128xf32> to vector<1x128xf32>
    %671 = vector.shape_cast %668 : vector<1x128xf32> to vector<1x1x128xf32>
    tpu.vector_store %arg6[%c5_454, %c9_455, %c0_456], %671 {strides = array<i32>} : memref<8x16x128xf32, #tpu.memory_space<vmem>>, vector<1x1x128xf32>,
    %672 = arith.index_cast %596 : i32 to index
    %c10_457 = arith.constant 10 : index
    %673 = memref.load %arg1[%672, %c10_457] : memref<16x16xi32, #tpu.memory_space<smem>>
    %674 = arith.index_cast %673 : i32 to index
    %c0_458 = arith.constant 0 : index
    %675 = vector.load %arg3[%674, %c0_458] : memref<256x128xf32, #tpu.memory_space<vmem>>, vector<1x128xf32>
    %c5_459 = arith.constant 5 : index
    %c10_460 = arith.constant 10 : index
    %c0_461 = arith.constant 0 : index
    %676 = vector.load %arg6[%c5_459, %c10_460, %c0_461] : memref<8x16x128xf32, #tpu.memory_space<vmem>>, vector<1x1x128xf32>
    %677 = vector.shape_cast %676 : vector<1x1x128xf32> to vector<1x128xf32>
    %678 = vector.shape_cast %675 : vector<1x128xf32> to vector<1x1x128xf32>
    tpu.vector_store %arg6[%c5_459, %c10_460, %c0_461], %678 {strides = array<i32>} : memref<8x16x128xf32, #tpu.memory_space<vmem>>, vector<1x1x128xf32>,
    %679 = arith.index_cast %596 : i32 to index
    %c11_462 = arith.constant 11 : index
    %680 = memref.load %arg1[%679, %c11_462] : memref<16x16xi32, #tpu.memory_space<smem>>
    %681 = arith.index_cast %680 : i32 to index
    %c0_463 = arith.constant 0 : index
    %682 = vector.load %arg3[%681, %c0_463] : memref<256x128xf32, #tpu.memory_space<vmem>>, vector<1x128xf32>
    %c5_464 = arith.constant 5 : index
    %c11_465 = arith.constant 11 : index
    %c0_466 = arith.constant 0 : index
    %683 = vector.load %arg6[%c5_464, %c11_465, %c0_466] : memref<8x16x128xf32, #tpu.memory_space<vmem>>, vector<1x1x128xf32>
    %684 = vector.shape_cast %683 : vector<1x1x128xf32> to vector<1x128xf32>
    %685 = vector.shape_cast %682 : vector<1x128xf32> to vector<1x1x128xf32>
    tpu.vector_store %arg6[%c5_464, %c11_465, %c0_466], %685 {strides = array<i32>} : memref<8x16x128xf32, #tpu.memory_space<vmem>>, vector<1x1x128xf32>,
    %686 = arith.index_cast %596 : i32 to index
    %c12_467 = arith.constant 12 : index
    %687 = memref.load %arg1[%686, %c12_467] : memref<16x16xi32, #tpu.memory_space<smem>>
    %688 = arith.index_cast %687 : i32 to index
    %c0_468 = arith.constant 0 : index
    %689 = vector.load %arg3[%688, %c0_468] : memref<256x128xf32, #tpu.memory_space<vmem>>, vector<1x128xf32>
    %c5_469 = arith.constant 5 : index
    %c12_470 = arith.constant 12 : index
    %c0_471 = arith.constant 0 : index
    %690 = vector.load %arg6[%c5_469, %c12_470, %c0_471] : memref<8x16x128xf32, #tpu.memory_space<vmem>>, vector<1x1x128xf32>
    %691 = vector.shape_cast %690 : vector<1x1x128xf32> to vector<1x128xf32>
    %692 = vector.shape_cast %689 : vector<1x128xf32> to vector<1x1x128xf32>
    tpu.vector_store %arg6[%c5_469, %c12_470, %c0_471], %692 {strides = array<i32>} : memref<8x16x128xf32, #tpu.memory_space<vmem>>, vector<1x1x128xf32>,
    %693 = arith.index_cast %596 : i32 to index
    %c13_472 = arith.constant 13 : index
    %694 = memref.load %arg1[%693, %c13_472] : memref<16x16xi32, #tpu.memory_space<smem>>
    %695 = arith.index_cast %694 : i32 to index
    %c0_473 = arith.constant 0 : index
    %696 = vector.load %arg3[%695, %c0_473] : memref<256x128xf32, #tpu.memory_space<vmem>>, vector<1x128xf32>
    %c5_474 = arith.constant 5 : index
    %c13_475 = arith.constant 13 : index
    %c0_476 = arith.constant 0 : index
    %697 = vector.load %arg6[%c5_474, %c13_475, %c0_476] : memref<8x16x128xf32, #tpu.memory_space<vmem>>, vector<1x1x128xf32>
    %698 = vector.shape_cast %697 : vector<1x1x128xf32> to vector<1x128xf32>
    %699 = vector.shape_cast %696 : vector<1x128xf32> to vector<1x1x128xf32>
    tpu.vector_store %arg6[%c5_474, %c13_475, %c0_476], %699 {strides = array<i32>} : memref<8x16x128xf32, #tpu.memory_space<vmem>>, vector<1x1x128xf32>,
    %700 = arith.index_cast %596 : i32 to index
    %c14_477 = arith.constant 14 : index
    %701 = memref.load %arg1[%700, %c14_477] : memref<16x16xi32, #tpu.memory_space<smem>>
    %702 = arith.index_cast %701 : i32 to index
    %c0_478 = arith.constant 0 : index
    %703 = vector.load %arg3[%702, %c0_478] : memref<256x128xf32, #tpu.memory_space<vmem>>, vector<1x128xf32>
    %c5_479 = arith.constant 5 : index
    %c14_480 = arith.constant 14 : index
    %c0_481 = arith.constant 0 : index
    %704 = vector.load %arg6[%c5_479, %c14_480, %c0_481] : memref<8x16x128xf32, #tpu.memory_space<vmem>>, vector<1x1x128xf32>
    %705 = vector.shape_cast %704 : vector<1x1x128xf32> to vector<1x128xf32>
    %706 = vector.shape_cast %703 : vector<1x128xf32> to vector<1x1x128xf32>
    tpu.vector_store %arg6[%c5_479, %c14_480, %c0_481], %706 {strides = array<i32>} : memref<8x16x128xf32, #tpu.memory_space<vmem>>, vector<1x1x128xf32>,
    %707 = arith.index_cast %596 : i32 to index
    %c15_482 = arith.constant 15 : index
    %708 = memref.load %arg1[%707, %c15_482] : memref<16x16xi32, #tpu.memory_space<smem>>
    %709 = arith.index_cast %708 : i32 to index
    %c0_483 = arith.constant 0 : index
    %710 = vector.load %arg3[%709, %c0_483] : memref<256x128xf32, #tpu.memory_space<vmem>>, vector<1x128xf32>
    %c5_484 = arith.constant 5 : index
    %c15_485 = arith.constant 15 : index
    %c0_486 = arith.constant 0 : index
    %711 = vector.load %arg6[%c5_484, %c15_485, %c0_486] : memref<8x16x128xf32, #tpu.memory_space<vmem>>, vector<1x1x128xf32>
    %712 = vector.shape_cast %711 : vector<1x1x128xf32> to vector<1x128xf32>
    %713 = vector.shape_cast %710 : vector<1x128xf32> to vector<1x1x128xf32>
    tpu.vector_store %arg6[%c5_484, %c15_485, %c0_486], %713 {strides = array<i32>} : memref<8x16x128xf32, #tpu.memory_space<vmem>>, vector<1x1x128xf32>,
    %c8_i32_487 = arith.constant 8 : i32
    %714 = arith.muli %arg0, %c8_i32_487 : i32
    %c6_i32 = arith.constant 6 : i32
    %715 = arith.addi %714, %c6_i32 : i32
    %716 = arith.index_cast %715 : i32 to index
    %717 = memref.load %arg2[%716] : memref<16xi32, #tpu.memory_space<smem>>
    %718 = arith.index_cast %717 : i32 to index
    %c0_488 = arith.constant 0 : index
    %719 = vector.load %arg3[%718, %c0_488] : memref<256x128xf32, #tpu.memory_space<vmem>>, vector<1x128xf32>
    %c6_489 = arith.constant 6 : index
    %c0_490 = arith.constant 0 : index
    %720 = vector.load %arg7[%c6_489, %c0_490] : memref<8x128xf32, #tpu.memory_space<vmem>>, vector<1x128xf32>
    tpu.vector_store %arg7[%c6_489, %c0_490], %719 {strides = array<i32>} : memref<8x128xf32, #tpu.memory_space<vmem>>, vector<1x128xf32>,
    %721 = arith.index_cast %715 : i32 to index
    %c0_491 = arith.constant 0 : index
    %722 = memref.load %arg1[%721, %c0_491] : memref<16x16xi32, #tpu.memory_space<smem>>
    %723 = arith.index_cast %722 : i32 to index
    %c0_492 = arith.constant 0 : index
    %724 = vector.load %arg3[%723, %c0_492] : memref<256x128xf32, #tpu.memory_space<vmem>>, vector<1x128xf32>
    %c6_493 = arith.constant 6 : index
    %c0_494 = arith.constant 0 : index
    %c0_495 = arith.constant 0 : index
    %725 = vector.load %arg6[%c6_493, %c0_494, %c0_495] : memref<8x16x128xf32, #tpu.memory_space<vmem>>, vector<1x1x128xf32>
    %726 = vector.shape_cast %725 : vector<1x1x128xf32> to vector<1x128xf32>
    %727 = vector.shape_cast %724 : vector<1x128xf32> to vector<1x1x128xf32>
    tpu.vector_store %arg6[%c6_493, %c0_494, %c0_495], %727 {strides = array<i32>} : memref<8x16x128xf32, #tpu.memory_space<vmem>>, vector<1x1x128xf32>,
    %728 = arith.index_cast %715 : i32 to index
    %c1_496 = arith.constant 1 : index
    %729 = memref.load %arg1[%728, %c1_496] : memref<16x16xi32, #tpu.memory_space<smem>>
    %730 = arith.index_cast %729 : i32 to index
    %c0_497 = arith.constant 0 : index
    %731 = vector.load %arg3[%730, %c0_497] : memref<256x128xf32, #tpu.memory_space<vmem>>, vector<1x128xf32>
    %c6_498 = arith.constant 6 : index
    %c1_499 = arith.constant 1 : index
    %c0_500 = arith.constant 0 : index
    %732 = vector.load %arg6[%c6_498, %c1_499, %c0_500] : memref<8x16x128xf32, #tpu.memory_space<vmem>>, vector<1x1x128xf32>
    %733 = vector.shape_cast %732 : vector<1x1x128xf32> to vector<1x128xf32>
    %734 = vector.shape_cast %731 : vector<1x128xf32> to vector<1x1x128xf32>
    tpu.vector_store %arg6[%c6_498, %c1_499, %c0_500], %734 {strides = array<i32>} : memref<8x16x128xf32, #tpu.memory_space<vmem>>, vector<1x1x128xf32>,
    %735 = arith.index_cast %715 : i32 to index
    %c2_501 = arith.constant 2 : index
    %736 = memref.load %arg1[%735, %c2_501] : memref<16x16xi32, #tpu.memory_space<smem>>
    %737 = arith.index_cast %736 : i32 to index
    %c0_502 = arith.constant 0 : index
    %738 = vector.load %arg3[%737, %c0_502] : memref<256x128xf32, #tpu.memory_space<vmem>>, vector<1x128xf32>
    %c6_503 = arith.constant 6 : index
    %c2_504 = arith.constant 2 : index
    %c0_505 = arith.constant 0 : index
    %739 = vector.load %arg6[%c6_503, %c2_504, %c0_505] : memref<8x16x128xf32, #tpu.memory_space<vmem>>, vector<1x1x128xf32>
    %740 = vector.shape_cast %739 : vector<1x1x128xf32> to vector<1x128xf32>
    %741 = vector.shape_cast %738 : vector<1x128xf32> to vector<1x1x128xf32>
    tpu.vector_store %arg6[%c6_503, %c2_504, %c0_505], %741 {strides = array<i32>} : memref<8x16x128xf32, #tpu.memory_space<vmem>>, vector<1x1x128xf32>,
    %742 = arith.index_cast %715 : i32 to index
    %c3_506 = arith.constant 3 : index
    %743 = memref.load %arg1[%742, %c3_506] : memref<16x16xi32, #tpu.memory_space<smem>>
    %744 = arith.index_cast %743 : i32 to index
    %c0_507 = arith.constant 0 : index
    %745 = vector.load %arg3[%744, %c0_507] : memref<256x128xf32, #tpu.memory_space<vmem>>, vector<1x128xf32>
    %c6_508 = arith.constant 6 : index
    %c3_509 = arith.constant 3 : index
    %c0_510 = arith.constant 0 : index
    %746 = vector.load %arg6[%c6_508, %c3_509, %c0_510] : memref<8x16x128xf32, #tpu.memory_space<vmem>>, vector<1x1x128xf32>
    %747 = vector.shape_cast %746 : vector<1x1x128xf32> to vector<1x128xf32>
    %748 = vector.shape_cast %745 : vector<1x128xf32> to vector<1x1x128xf32>
    tpu.vector_store %arg6[%c6_508, %c3_509, %c0_510], %748 {strides = array<i32>} : memref<8x16x128xf32, #tpu.memory_space<vmem>>, vector<1x1x128xf32>,
    %749 = arith.index_cast %715 : i32 to index
    %c4_511 = arith.constant 4 : index
    %750 = memref.load %arg1[%749, %c4_511] : memref<16x16xi32, #tpu.memory_space<smem>>
    %751 = arith.index_cast %750 : i32 to index
    %c0_512 = arith.constant 0 : index
    %752 = vector.load %arg3[%751, %c0_512] : memref<256x128xf32, #tpu.memory_space<vmem>>, vector<1x128xf32>
    %c6_513 = arith.constant 6 : index
    %c4_514 = arith.constant 4 : index
    %c0_515 = arith.constant 0 : index
    %753 = vector.load %arg6[%c6_513, %c4_514, %c0_515] : memref<8x16x128xf32, #tpu.memory_space<vmem>>, vector<1x1x128xf32>
    %754 = vector.shape_cast %753 : vector<1x1x128xf32> to vector<1x128xf32>
    %755 = vector.shape_cast %752 : vector<1x128xf32> to vector<1x1x128xf32>
    tpu.vector_store %arg6[%c6_513, %c4_514, %c0_515], %755 {strides = array<i32>} : memref<8x16x128xf32, #tpu.memory_space<vmem>>, vector<1x1x128xf32>,
    %756 = arith.index_cast %715 : i32 to index
    %c5_516 = arith.constant 5 : index
    %757 = memref.load %arg1[%756, %c5_516] : memref<16x16xi32, #tpu.memory_space<smem>>
    %758 = arith.index_cast %757 : i32 to index
    %c0_517 = arith.constant 0 : index
    %759 = vector.load %arg3[%758, %c0_517] : memref<256x128xf32, #tpu.memory_space<vmem>>, vector<1x128xf32>
    %c6_518 = arith.constant 6 : index
    %c5_519 = arith.constant 5 : index
    %c0_520 = arith.constant 0 : index
    %760 = vector.load %arg6[%c6_518, %c5_519, %c0_520] : memref<8x16x128xf32, #tpu.memory_space<vmem>>, vector<1x1x128xf32>
    %761 = vector.shape_cast %760 : vector<1x1x128xf32> to vector<1x128xf32>
    %762 = vector.shape_cast %759 : vector<1x128xf32> to vector<1x1x128xf32>
    tpu.vector_store %arg6[%c6_518, %c5_519, %c0_520], %762 {strides = array<i32>} : memref<8x16x128xf32, #tpu.memory_space<vmem>>, vector<1x1x128xf32>,
    %763 = arith.index_cast %715 : i32 to index
    %c6_521 = arith.constant 6 : index
    %764 = memref.load %arg1[%763, %c6_521] : memref<16x16xi32, #tpu.memory_space<smem>>
    %765 = arith.index_cast %764 : i32 to index
    %c0_522 = arith.constant 0 : index
    %766 = vector.load %arg3[%765, %c0_522] : memref<256x128xf32, #tpu.memory_space<vmem>>, vector<1x128xf32>
    %c6_523 = arith.constant 6 : index
    %c6_524 = arith.constant 6 : index
    %c0_525 = arith.constant 0 : index
    %767 = vector.load %arg6[%c6_523, %c6_524, %c0_525] : memref<8x16x128xf32, #tpu.memory_space<vmem>>, vector<1x1x128xf32>
    %768 = vector.shape_cast %767 : vector<1x1x128xf32> to vector<1x128xf32>
    %769 = vector.shape_cast %766 : vector<1x128xf32> to vector<1x1x128xf32>
    tpu.vector_store %arg6[%c6_523, %c6_524, %c0_525], %769 {strides = array<i32>} : memref<8x16x128xf32, #tpu.memory_space<vmem>>, vector<1x1x128xf32>,
    %770 = arith.index_cast %715 : i32 to index
    %c7_526 = arith.constant 7 : index
    %771 = memref.load %arg1[%770, %c7_526] : memref<16x16xi32, #tpu.memory_space<smem>>
    %772 = arith.index_cast %771 : i32 to index
    %c0_527 = arith.constant 0 : index
    %773 = vector.load %arg3[%772, %c0_527] : memref<256x128xf32, #tpu.memory_space<vmem>>, vector<1x128xf32>
    %c6_528 = arith.constant 6 : index
    %c7_529 = arith.constant 7 : index
    %c0_530 = arith.constant 0 : index
    %774 = vector.load %arg6[%c6_528, %c7_529, %c0_530] : memref<8x16x128xf32, #tpu.memory_space<vmem>>, vector<1x1x128xf32>
    %775 = vector.shape_cast %774 : vector<1x1x128xf32> to vector<1x128xf32>
    %776 = vector.shape_cast %773 : vector<1x128xf32> to vector<1x1x128xf32>
    tpu.vector_store %arg6[%c6_528, %c7_529, %c0_530], %776 {strides = array<i32>} : memref<8x16x128xf32, #tpu.memory_space<vmem>>, vector<1x1x128xf32>,
    %777 = arith.index_cast %715 : i32 to index
    %c8_531 = arith.constant 8 : index
    %778 = memref.load %arg1[%777, %c8_531] : memref<16x16xi32, #tpu.memory_space<smem>>
    %779 = arith.index_cast %778 : i32 to index
    %c0_532 = arith.constant 0 : index
    %780 = vector.load %arg3[%779, %c0_532] : memref<256x128xf32, #tpu.memory_space<vmem>>, vector<1x128xf32>
    %c6_533 = arith.constant 6 : index
    %c8_534 = arith.constant 8 : index
    %c0_535 = arith.constant 0 : index
    %781 = vector.load %arg6[%c6_533, %c8_534, %c0_535] : memref<8x16x128xf32, #tpu.memory_space<vmem>>, vector<1x1x128xf32>
    %782 = vector.shape_cast %781 : vector<1x1x128xf32> to vector<1x128xf32>
    %783 = vector.shape_cast %780 : vector<1x128xf32> to vector<1x1x128xf32>
    tpu.vector_store %arg6[%c6_533, %c8_534, %c0_535], %783 {strides = array<i32>} : memref<8x16x128xf32, #tpu.memory_space<vmem>>, vector<1x1x128xf32>,
    %784 = arith.index_cast %715 : i32 to index
    %c9_536 = arith.constant 9 : index
    %785 = memref.load %arg1[%784, %c9_536] : memref<16x16xi32, #tpu.memory_space<smem>>
    %786 = arith.index_cast %785 : i32 to index
    %c0_537 = arith.constant 0 : index
    %787 = vector.load %arg3[%786, %c0_537] : memref<256x128xf32, #tpu.memory_space<vmem>>, vector<1x128xf32>
    %c6_538 = arith.constant 6 : index
    %c9_539 = arith.constant 9 : index
    %c0_540 = arith.constant 0 : index
    %788 = vector.load %arg6[%c6_538, %c9_539, %c0_540] : memref<8x16x128xf32, #tpu.memory_space<vmem>>, vector<1x1x128xf32>
    %789 = vector.shape_cast %788 : vector<1x1x128xf32> to vector<1x128xf32>
    %790 = vector.shape_cast %787 : vector<1x128xf32> to vector<1x1x128xf32>
    tpu.vector_store %arg6[%c6_538, %c9_539, %c0_540], %790 {strides = array<i32>} : memref<8x16x128xf32, #tpu.memory_space<vmem>>, vector<1x1x128xf32>,
    %791 = arith.index_cast %715 : i32 to index
    %c10_541 = arith.constant 10 : index
    %792 = memref.load %arg1[%791, %c10_541] : memref<16x16xi32, #tpu.memory_space<smem>>
    %793 = arith.index_cast %792 : i32 to index
    %c0_542 = arith.constant 0 : index
    %794 = vector.load %arg3[%793, %c0_542] : memref<256x128xf32, #tpu.memory_space<vmem>>, vector<1x128xf32>
    %c6_543 = arith.constant 6 : index
    %c10_544 = arith.constant 10 : index
    %c0_545 = arith.constant 0 : index
    %795 = vector.load %arg6[%c6_543, %c10_544, %c0_545] : memref<8x16x128xf32, #tpu.memory_space<vmem>>, vector<1x1x128xf32>
    %796 = vector.shape_cast %795 : vector<1x1x128xf32> to vector<1x128xf32>
    %797 = vector.shape_cast %794 : vector<1x128xf32> to vector<1x1x128xf32>
    tpu.vector_store %arg6[%c6_543, %c10_544, %c0_545], %797 {strides = array<i32>} : memref<8x16x128xf32, #tpu.memory_space<vmem>>, vector<1x1x128xf32>,
    %798 = arith.index_cast %715 : i32 to index
    %c11_546 = arith.constant 11 : index
    %799 = memref.load %arg1[%798, %c11_546] : memref<16x16xi32, #tpu.memory_space<smem>>
    %800 = arith.index_cast %799 : i32 to index
    %c0_547 = arith.constant 0 : index
    %801 = vector.load %arg3[%800, %c0_547] : memref<256x128xf32, #tpu.memory_space<vmem>>, vector<1x128xf32>
    %c6_548 = arith.constant 6 : index
    %c11_549 = arith.constant 11 : index
    %c0_550 = arith.constant 0 : index
    %802 = vector.load %arg6[%c6_548, %c11_549, %c0_550] : memref<8x16x128xf32, #tpu.memory_space<vmem>>, vector<1x1x128xf32>
    %803 = vector.shape_cast %802 : vector<1x1x128xf32> to vector<1x128xf32>
    %804 = vector.shape_cast %801 : vector<1x128xf32> to vector<1x1x128xf32>
    tpu.vector_store %arg6[%c6_548, %c11_549, %c0_550], %804 {strides = array<i32>} : memref<8x16x128xf32, #tpu.memory_space<vmem>>, vector<1x1x128xf32>,
    %805 = arith.index_cast %715 : i32 to index
    %c12_551 = arith.constant 12 : index
    %806 = memref.load %arg1[%805, %c12_551] : memref<16x16xi32, #tpu.memory_space<smem>>
    %807 = arith.index_cast %806 : i32 to index
    %c0_552 = arith.constant 0 : index
    %808 = vector.load %arg3[%807, %c0_552] : memref<256x128xf32, #tpu.memory_space<vmem>>, vector<1x128xf32>
    %c6_553 = arith.constant 6 : index
    %c12_554 = arith.constant 12 : index
    %c0_555 = arith.constant 0 : index
    %809 = vector.load %arg6[%c6_553, %c12_554, %c0_555] : memref<8x16x128xf32, #tpu.memory_space<vmem>>, vector<1x1x128xf32>
    %810 = vector.shape_cast %809 : vector<1x1x128xf32> to vector<1x128xf32>
    %811 = vector.shape_cast %808 : vector<1x128xf32> to vector<1x1x128xf32>
    tpu.vector_store %arg6[%c6_553, %c12_554, %c0_555], %811 {strides = array<i32>} : memref<8x16x128xf32, #tpu.memory_space<vmem>>, vector<1x1x128xf32>,
    %812 = arith.index_cast %715 : i32 to index
    %c13_556 = arith.constant 13 : index
    %813 = memref.load %arg1[%812, %c13_556] : memref<16x16xi32, #tpu.memory_space<smem>>
    %814 = arith.index_cast %813 : i32 to index
    %c0_557 = arith.constant 0 : index
    %815 = vector.load %arg3[%814, %c0_557] : memref<256x128xf32, #tpu.memory_space<vmem>>, vector<1x128xf32>
    %c6_558 = arith.constant 6 : index
    %c13_559 = arith.constant 13 : index
    %c0_560 = arith.constant 0 : index
    %816 = vector.load %arg6[%c6_558, %c13_559, %c0_560] : memref<8x16x128xf32, #tpu.memory_space<vmem>>, vector<1x1x128xf32>
    %817 = vector.shape_cast %816 : vector<1x1x128xf32> to vector<1x128xf32>
    %818 = vector.shape_cast %815 : vector<1x128xf32> to vector<1x1x128xf32>
    tpu.vector_store %arg6[%c6_558, %c13_559, %c0_560], %818 {strides = array<i32>} : memref<8x16x128xf32, #tpu.memory_space<vmem>>, vector<1x1x128xf32>,
    %819 = arith.index_cast %715 : i32 to index
    %c14_561 = arith.constant 14 : index
    %820 = memref.load %arg1[%819, %c14_561] : memref<16x16xi32, #tpu.memory_space<smem>>
    %821 = arith.index_cast %820 : i32 to index
    %c0_562 = arith.constant 0 : index
    %822 = vector.load %arg3[%821, %c0_562] : memref<256x128xf32, #tpu.memory_space<vmem>>, vector<1x128xf32>
    %c6_563 = arith.constant 6 : index
    %c14_564 = arith.constant 14 : index
    %c0_565 = arith.constant 0 : index
    %823 = vector.load %arg6[%c6_563, %c14_564, %c0_565] : memref<8x16x128xf32, #tpu.memory_space<vmem>>, vector<1x1x128xf32>
    %824 = vector.shape_cast %823 : vector<1x1x128xf32> to vector<1x128xf32>
    %825 = vector.shape_cast %822 : vector<1x128xf32> to vector<1x1x128xf32>
    tpu.vector_store %arg6[%c6_563, %c14_564, %c0_565], %825 {strides = array<i32>} : memref<8x16x128xf32, #tpu.memory_space<vmem>>, vector<1x1x128xf32>,
    %826 = arith.index_cast %715 : i32 to index
    %c15_566 = arith.constant 15 : index
    %827 = memref.load %arg1[%826, %c15_566] : memref<16x16xi32, #tpu.memory_space<smem>>
    %828 = arith.index_cast %827 : i32 to index
    %c0_567 = arith.constant 0 : index
    %829 = vector.load %arg3[%828, %c0_567] : memref<256x128xf32, #tpu.memory_space<vmem>>, vector<1x128xf32>
    %c6_568 = arith.constant 6 : index
    %c15_569 = arith.constant 15 : index
    %c0_570 = arith.constant 0 : index
    %830 = vector.load %arg6[%c6_568, %c15_569, %c0_570] : memref<8x16x128xf32, #tpu.memory_space<vmem>>, vector<1x1x128xf32>
    %831 = vector.shape_cast %830 : vector<1x1x128xf32> to vector<1x128xf32>
    %832 = vector.shape_cast %829 : vector<1x128xf32> to vector<1x1x128xf32>
    tpu.vector_store %arg6[%c6_568, %c15_569, %c0_570], %832 {strides = array<i32>} : memref<8x16x128xf32, #tpu.memory_space<vmem>>, vector<1x1x128xf32>,
    %c8_i32_571 = arith.constant 8 : i32
    %833 = arith.muli %arg0, %c8_i32_571 : i32
    %c7_i32 = arith.constant 7 : i32
    %834 = arith.addi %833, %c7_i32 : i32
    %835 = arith.index_cast %834 : i32 to index
    %836 = memref.load %arg2[%835] : memref<16xi32, #tpu.memory_space<smem>>
    %837 = arith.index_cast %836 : i32 to index
    %c0_572 = arith.constant 0 : index
    %838 = vector.load %arg3[%837, %c0_572] : memref<256x128xf32, #tpu.memory_space<vmem>>, vector<1x128xf32>
    %c7_573 = arith.constant 7 : index
    %c0_574 = arith.constant 0 : index
    %839 = vector.load %arg7[%c7_573, %c0_574] : memref<8x128xf32, #tpu.memory_space<vmem>>, vector<1x128xf32>
    tpu.vector_store %arg7[%c7_573, %c0_574], %838 {strides = array<i32>} : memref<8x128xf32, #tpu.memory_space<vmem>>, vector<1x128xf32>,
    %840 = arith.index_cast %834 : i32 to index
    %c0_575 = arith.constant 0 : index
    %841 = memref.load %arg1[%840, %c0_575] : memref<16x16xi32, #tpu.memory_space<smem>>
    %842 = arith.index_cast %841 : i32 to index
    %c0_576 = arith.constant 0 : index
    %843 = vector.load %arg3[%842, %c0_576] : memref<256x128xf32, #tpu.memory_space<vmem>>, vector<1x128xf32>
    %c7_577 = arith.constant 7 : index
    %c0_578 = arith.constant 0 : index
    %c0_579 = arith.constant 0 : index
    %844 = vector.load %arg6[%c7_577, %c0_578, %c0_579] : memref<8x16x128xf32, #tpu.memory_space<vmem>>, vector<1x1x128xf32>
    %845 = vector.shape_cast %844 : vector<1x1x128xf32> to vector<1x128xf32>
    %846 = vector.shape_cast %843 : vector<1x128xf32> to vector<1x1x128xf32>
    tpu.vector_store %arg6[%c7_577, %c0_578, %c0_579], %846 {strides = array<i32>} : memref<8x16x128xf32, #tpu.memory_space<vmem>>, vector<1x1x128xf32>,
    %847 = arith.index_cast %834 : i32 to index
    %c1_580 = arith.constant 1 : index
    %848 = memref.load %arg1[%847, %c1_580] : memref<16x16xi32, #tpu.memory_space<smem>>
    %849 = arith.index_cast %848 : i32 to index
    %c0_581 = arith.constant 0 : index
    %850 = vector.load %arg3[%849, %c0_581] : memref<256x128xf32, #tpu.memory_space<vmem>>, vector<1x128xf32>
    %c7_582 = arith.constant 7 : index
    %c1_583 = arith.constant 1 : index
    %c0_584 = arith.constant 0 : index
    %851 = vector.load %arg6[%c7_582, %c1_583, %c0_584] : memref<8x16x128xf32, #tpu.memory_space<vmem>>, vector<1x1x128xf32>
    %852 = vector.shape_cast %851 : vector<1x1x128xf32> to vector<1x128xf32>
    %853 = vector.shape_cast %850 : vector<1x128xf32> to vector<1x1x128xf32>
    tpu.vector_store %arg6[%c7_582, %c1_583, %c0_584], %853 {strides = array<i32>} : memref<8x16x128xf32, #tpu.memory_space<vmem>>, vector<1x1x128xf32>,
    %854 = arith.index_cast %834 : i32 to index
    %c2_585 = arith.constant 2 : index
    %855 = memref.load %arg1[%854, %c2_585] : memref<16x16xi32, #tpu.memory_space<smem>>
    %856 = arith.index_cast %855 : i32 to index
    %c0_586 = arith.constant 0 : index
    %857 = vector.load %arg3[%856, %c0_586] : memref<256x128xf32, #tpu.memory_space<vmem>>, vector<1x128xf32>
    %c7_587 = arith.constant 7 : index
    %c2_588 = arith.constant 2 : index
    %c0_589 = arith.constant 0 : index
    %858 = vector.load %arg6[%c7_587, %c2_588, %c0_589] : memref<8x16x128xf32, #tpu.memory_space<vmem>>, vector<1x1x128xf32>
    %859 = vector.shape_cast %858 : vector<1x1x128xf32> to vector<1x128xf32>
    %860 = vector.shape_cast %857 : vector<1x128xf32> to vector<1x1x128xf32>
    tpu.vector_store %arg6[%c7_587, %c2_588, %c0_589], %860 {strides = array<i32>} : memref<8x16x128xf32, #tpu.memory_space<vmem>>, vector<1x1x128xf32>,
    %861 = arith.index_cast %834 : i32 to index
    %c3_590 = arith.constant 3 : index
    %862 = memref.load %arg1[%861, %c3_590] : memref<16x16xi32, #tpu.memory_space<smem>>
    %863 = arith.index_cast %862 : i32 to index
    %c0_591 = arith.constant 0 : index
    %864 = vector.load %arg3[%863, %c0_591] : memref<256x128xf32, #tpu.memory_space<vmem>>, vector<1x128xf32>
    %c7_592 = arith.constant 7 : index
    %c3_593 = arith.constant 3 : index
    %c0_594 = arith.constant 0 : index
    %865 = vector.load %arg6[%c7_592, %c3_593, %c0_594] : memref<8x16x128xf32, #tpu.memory_space<vmem>>, vector<1x1x128xf32>
    %866 = vector.shape_cast %865 : vector<1x1x128xf32> to vector<1x128xf32>
    %867 = vector.shape_cast %864 : vector<1x128xf32> to vector<1x1x128xf32>
    tpu.vector_store %arg6[%c7_592, %c3_593, %c0_594], %867 {strides = array<i32>} : memref<8x16x128xf32, #tpu.memory_space<vmem>>, vector<1x1x128xf32>,
    %868 = arith.index_cast %834 : i32 to index
    %c4_595 = arith.constant 4 : index
    %869 = memref.load %arg1[%868, %c4_595] : memref<16x16xi32, #tpu.memory_space<smem>>
    %870 = arith.index_cast %869 : i32 to index
    %c0_596 = arith.constant 0 : index
    %871 = vector.load %arg3[%870, %c0_596] : memref<256x128xf32, #tpu.memory_space<vmem>>, vector<1x128xf32>
    %c7_597 = arith.constant 7 : index
    %c4_598 = arith.constant 4 : index
    %c0_599 = arith.constant 0 : index
    %872 = vector.load %arg6[%c7_597, %c4_598, %c0_599] : memref<8x16x128xf32, #tpu.memory_space<vmem>>, vector<1x1x128xf32>
    %873 = vector.shape_cast %872 : vector<1x1x128xf32> to vector<1x128xf32>
    %874 = vector.shape_cast %871 : vector<1x128xf32> to vector<1x1x128xf32>
    tpu.vector_store %arg6[%c7_597, %c4_598, %c0_599], %874 {strides = array<i32>} : memref<8x16x128xf32, #tpu.memory_space<vmem>>, vector<1x1x128xf32>,
    %875 = arith.index_cast %834 : i32 to index
    %c5_600 = arith.constant 5 : index
    %876 = memref.load %arg1[%875, %c5_600] : memref<16x16xi32, #tpu.memory_space<smem>>
    %877 = arith.index_cast %876 : i32 to index
    %c0_601 = arith.constant 0 : index
    %878 = vector.load %arg3[%877, %c0_601] : memref<256x128xf32, #tpu.memory_space<vmem>>, vector<1x128xf32>
    %c7_602 = arith.constant 7 : index
    %c5_603 = arith.constant 5 : index
    %c0_604 = arith.constant 0 : index
    %879 = vector.load %arg6[%c7_602, %c5_603, %c0_604] : memref<8x16x128xf32, #tpu.memory_space<vmem>>, vector<1x1x128xf32>
    %880 = vector.shape_cast %879 : vector<1x1x128xf32> to vector<1x128xf32>
    %881 = vector.shape_cast %878 : vector<1x128xf32> to vector<1x1x128xf32>
    tpu.vector_store %arg6[%c7_602, %c5_603, %c0_604], %881 {strides = array<i32>} : memref<8x16x128xf32, #tpu.memory_space<vmem>>, vector<1x1x128xf32>,
    %882 = arith.index_cast %834 : i32 to index
    %c6_605 = arith.constant 6 : index
    %883 = memref.load %arg1[%882, %c6_605] : memref<16x16xi32, #tpu.memory_space<smem>>
    %884 = arith.index_cast %883 : i32 to index
    %c0_606 = arith.constant 0 : index
    %885 = vector.load %arg3[%884, %c0_606] : memref<256x128xf32, #tpu.memory_space<vmem>>, vector<1x128xf32>
    %c7_607 = arith.constant 7 : index
    %c6_608 = arith.constant 6 : index
    %c0_609 = arith.constant 0 : index
    %886 = vector.load %arg6[%c7_607, %c6_608, %c0_609] : memref<8x16x128xf32, #tpu.memory_space<vmem>>, vector<1x1x128xf32>
    %887 = vector.shape_cast %886 : vector<1x1x128xf32> to vector<1x128xf32>
    %888 = vector.shape_cast %885 : vector<1x128xf32> to vector<1x1x128xf32>
    tpu.vector_store %arg6[%c7_607, %c6_608, %c0_609], %888 {strides = array<i32>} : memref<8x16x128xf32, #tpu.memory_space<vmem>>, vector<1x1x128xf32>,
    %889 = arith.index_cast %834 : i32 to index
    %c7_610 = arith.constant 7 : index
    %890 = memref.load %arg1[%889, %c7_610] : memref<16x16xi32, #tpu.memory_space<smem>>
    %891 = arith.index_cast %890 : i32 to index
    %c0_611 = arith.constant 0 : index
    %892 = vector.load %arg3[%891, %c0_611] : memref<256x128xf32, #tpu.memory_space<vmem>>, vector<1x128xf32>
    %c7_612 = arith.constant 7 : index
    %c7_613 = arith.constant 7 : index
    %c0_614 = arith.constant 0 : index
    %893 = vector.load %arg6[%c7_612, %c7_613, %c0_614] : memref<8x16x128xf32, #tpu.memory_space<vmem>>, vector<1x1x128xf32>
    %894 = vector.shape_cast %893 : vector<1x1x128xf32> to vector<1x128xf32>
    %895 = vector.shape_cast %892 : vector<1x128xf32> to vector<1x1x128xf32>
    tpu.vector_store %arg6[%c7_612, %c7_613, %c0_614], %895 {strides = array<i32>} : memref<8x16x128xf32, #tpu.memory_space<vmem>>, vector<1x1x128xf32>,
    %896 = arith.index_cast %834 : i32 to index
    %c8_615 = arith.constant 8 : index
    %897 = memref.load %arg1[%896, %c8_615] : memref<16x16xi32, #tpu.memory_space<smem>>
    %898 = arith.index_cast %897 : i32 to index
    %c0_616 = arith.constant 0 : index
    %899 = vector.load %arg3[%898, %c0_616] : memref<256x128xf32, #tpu.memory_space<vmem>>, vector<1x128xf32>
    %c7_617 = arith.constant 7 : index
    %c8_618 = arith.constant 8 : index
    %c0_619 = arith.constant 0 : index
    %900 = vector.load %arg6[%c7_617, %c8_618, %c0_619] : memref<8x16x128xf32, #tpu.memory_space<vmem>>, vector<1x1x128xf32>
    %901 = vector.shape_cast %900 : vector<1x1x128xf32> to vector<1x128xf32>
    %902 = vector.shape_cast %899 : vector<1x128xf32> to vector<1x1x128xf32>
    tpu.vector_store %arg6[%c7_617, %c8_618, %c0_619], %902 {strides = array<i32>} : memref<8x16x128xf32, #tpu.memory_space<vmem>>, vector<1x1x128xf32>,
    %903 = arith.index_cast %834 : i32 to index
    %c9_620 = arith.constant 9 : index
    %904 = memref.load %arg1[%903, %c9_620] : memref<16x16xi32, #tpu.memory_space<smem>>
    %905 = arith.index_cast %904 : i32 to index
    %c0_621 = arith.constant 0 : index
    %906 = vector.load %arg3[%905, %c0_621] : memref<256x128xf32, #tpu.memory_space<vmem>>, vector<1x128xf32>
    %c7_622 = arith.constant 7 : index
    %c9_623 = arith.constant 9 : index
    %c0_624 = arith.constant 0 : index
    %907 = vector.load %arg6[%c7_622, %c9_623, %c0_624] : memref<8x16x128xf32, #tpu.memory_space<vmem>>, vector<1x1x128xf32>
    %908 = vector.shape_cast %907 : vector<1x1x128xf32> to vector<1x128xf32>
    %909 = vector.shape_cast %906 : vector<1x128xf32> to vector<1x1x128xf32>
    tpu.vector_store %arg6[%c7_622, %c9_623, %c0_624], %909 {strides = array<i32>} : memref<8x16x128xf32, #tpu.memory_space<vmem>>, vector<1x1x128xf32>,
    %910 = arith.index_cast %834 : i32 to index
    %c10_625 = arith.constant 10 : index
    %911 = memref.load %arg1[%910, %c10_625] : memref<16x16xi32, #tpu.memory_space<smem>>
    %912 = arith.index_cast %911 : i32 to index
    %c0_626 = arith.constant 0 : index
    %913 = vector.load %arg3[%912, %c0_626] : memref<256x128xf32, #tpu.memory_space<vmem>>, vector<1x128xf32>
    %c7_627 = arith.constant 7 : index
    %c10_628 = arith.constant 10 : index
    %c0_629 = arith.constant 0 : index
    %914 = vector.load %arg6[%c7_627, %c10_628, %c0_629] : memref<8x16x128xf32, #tpu.memory_space<vmem>>, vector<1x1x128xf32>
    %915 = vector.shape_cast %914 : vector<1x1x128xf32> to vector<1x128xf32>
    %916 = vector.shape_cast %913 : vector<1x128xf32> to vector<1x1x128xf32>
    tpu.vector_store %arg6[%c7_627, %c10_628, %c0_629], %916 {strides = array<i32>} : memref<8x16x128xf32, #tpu.memory_space<vmem>>, vector<1x1x128xf32>,
    %917 = arith.index_cast %834 : i32 to index
    %c11_630 = arith.constant 11 : index
    %918 = memref.load %arg1[%917, %c11_630] : memref<16x16xi32, #tpu.memory_space<smem>>
    %919 = arith.index_cast %918 : i32 to index
    %c0_631 = arith.constant 0 : index
    %920 = vector.load %arg3[%919, %c0_631] : memref<256x128xf32, #tpu.memory_space<vmem>>, vector<1x128xf32>
    %c7_632 = arith.constant 7 : index
    %c11_633 = arith.constant 11 : index
    %c0_634 = arith.constant 0 : index
    %921 = vector.load %arg6[%c7_632, %c11_633, %c0_634] : memref<8x16x128xf32, #tpu.memory_space<vmem>>, vector<1x1x128xf32>
    %922 = vector.shape_cast %921 : vector<1x1x128xf32> to vector<1x128xf32>
    %923 = vector.shape_cast %920 : vector<1x128xf32> to vector<1x1x128xf32>
    tpu.vector_store %arg6[%c7_632, %c11_633, %c0_634], %923 {strides = array<i32>} : memref<8x16x128xf32, #tpu.memory_space<vmem>>, vector<1x1x128xf32>,
    %924 = arith.index_cast %834 : i32 to index
    %c12_635 = arith.constant 12 : index
    %925 = memref.load %arg1[%924, %c12_635] : memref<16x16xi32, #tpu.memory_space<smem>>
    %926 = arith.index_cast %925 : i32 to index
    %c0_636 = arith.constant 0 : index
    %927 = vector.load %arg3[%926, %c0_636] : memref<256x128xf32, #tpu.memory_space<vmem>>, vector<1x128xf32>
    %c7_637 = arith.constant 7 : index
    %c12_638 = arith.constant 12 : index
    %c0_639 = arith.constant 0 : index
    %928 = vector.load %arg6[%c7_637, %c12_638, %c0_639] : memref<8x16x128xf32, #tpu.memory_space<vmem>>, vector<1x1x128xf32>
    %929 = vector.shape_cast %928 : vector<1x1x128xf32> to vector<1x128xf32>
    %930 = vector.shape_cast %927 : vector<1x128xf32> to vector<1x1x128xf32>
    tpu.vector_store %arg6[%c7_637, %c12_638, %c0_639], %930 {strides = array<i32>} : memref<8x16x128xf32, #tpu.memory_space<vmem>>, vector<1x1x128xf32>,
    %931 = arith.index_cast %834 : i32 to index
    %c13_640 = arith.constant 13 : index
    %932 = memref.load %arg1[%931, %c13_640] : memref<16x16xi32, #tpu.memory_space<smem>>
    %933 = arith.index_cast %932 : i32 to index
    %c0_641 = arith.constant 0 : index
    %934 = vector.load %arg3[%933, %c0_641] : memref<256x128xf32, #tpu.memory_space<vmem>>, vector<1x128xf32>
    %c7_642 = arith.constant 7 : index
    %c13_643 = arith.constant 13 : index
    %c0_644 = arith.constant 0 : index
    %935 = vector.load %arg6[%c7_642, %c13_643, %c0_644] : memref<8x16x128xf32, #tpu.memory_space<vmem>>, vector<1x1x128xf32>
    %936 = vector.shape_cast %935 : vector<1x1x128xf32> to vector<1x128xf32>
    %937 = vector.shape_cast %934 : vector<1x128xf32> to vector<1x1x128xf32>
    tpu.vector_store %arg6[%c7_642, %c13_643, %c0_644], %937 {strides = array<i32>} : memref<8x16x128xf32, #tpu.memory_space<vmem>>, vector<1x1x128xf32>,
    %938 = arith.index_cast %834 : i32 to index
    %c14_645 = arith.constant 14 : index
    %939 = memref.load %arg1[%938, %c14_645] : memref<16x16xi32, #tpu.memory_space<smem>>
    %940 = arith.index_cast %939 : i32 to index
    %c0_646 = arith.constant 0 : index
    %941 = vector.load %arg3[%940, %c0_646] : memref<256x128xf32, #tpu.memory_space<vmem>>, vector<1x128xf32>
    %c7_647 = arith.constant 7 : index
    %c14_648 = arith.constant 14 : index
    %c0_649 = arith.constant 0 : index
    %942 = vector.load %arg6[%c7_647, %c14_648, %c0_649] : memref<8x16x128xf32, #tpu.memory_space<vmem>>, vector<1x1x128xf32>
    %943 = vector.shape_cast %942 : vector<1x1x128xf32> to vector<1x128xf32>
    %944 = vector.shape_cast %941 : vector<1x128xf32> to vector<1x1x128xf32>
    tpu.vector_store %arg6[%c7_647, %c14_648, %c0_649], %944 {strides = array<i32>} : memref<8x16x128xf32, #tpu.memory_space<vmem>>, vector<1x1x128xf32>,
    %945 = arith.index_cast %834 : i32 to index
    %c15_650 = arith.constant 15 : index
    %946 = memref.load %arg1[%945, %c15_650] : memref<16x16xi32, #tpu.memory_space<smem>>
    %947 = arith.index_cast %946 : i32 to index
    %c0_651 = arith.constant 0 : index
    %948 = vector.load %arg3[%947, %c0_651] : memref<256x128xf32, #tpu.memory_space<vmem>>, vector<1x128xf32>
    %c7_652 = arith.constant 7 : index
    %c15_653 = arith.constant 15 : index
    %c0_654 = arith.constant 0 : index
    %949 = vector.load %arg6[%c7_652, %c15_653, %c0_654] : memref<8x16x128xf32, #tpu.memory_space<vmem>>, vector<1x1x128xf32>
    %950 = vector.shape_cast %949 : vector<1x1x128xf32> to vector<1x128xf32>
    %951 = vector.shape_cast %948 : vector<1x128xf32> to vector<1x1x128xf32>
    tpu.vector_store %arg6[%c7_652, %c15_653, %c0_654], %951 {strides = array<i32>} : memref<8x16x128xf32, #tpu.memory_space<vmem>>, vector<1x1x128xf32>,
    %c0_655 = arith.constant 0 : index
    %c0_656 = arith.constant 0 : index
    %c0_657 = arith.constant 0 : index
    %952 = vector.load %arg6[%c0_655, %c0_656, %c0_657] : memref<8x16x128xf32, #tpu.memory_space<vmem>>, vector<8x16x128xf32>
    %c0_658 = arith.constant 0 : index
    %c0_659 = arith.constant 0 : index
    %953 = vector.load %arg7[%c0_658, %c0_659] : memref<8x128xf32, #tpu.memory_space<vmem>>, vector<8x128xf32>
    %954 = vector.shape_cast %953 : vector<8x128xf32> to vector<8x1x128xf32>
    %955 = vector.broadcast %954 : vector<8x1x128xf32> to vector<8x16x128xf32>
    %956 = arith.mulf %952, %955 : vector<8x16x128xf32>
    %cst = arith.constant dense<0.000000e+00> : vector<8x16xf32>
    %957 = vector.multi_reduction <add>, %956, %cst [2] : vector<8x16x128xf32> to vector<8x16xf32>
    %958 = math.exp %957 : vector<8x16xf32>
    %959 = tpu.iota {dimensions = array<i32: 1>} : vector<8x16xi32>
    %c8_i32_660 = arith.constant 8 : i32
    %960 = vector.broadcast %c8_i32_660 : i32 to vector<8x16xi32>
    %961 = arith.cmpi slt, %959, %960 : vector<8x16xi32>
    %cst_661 = arith.constant 0.000000e+00 : f32
    %962 = vector.broadcast %cst_661 : f32 to vector<8x16xf32>
    %963 = arith.select %961, %958, %962 : vector<8x16xi1>, vector<8x16xf32>
    %cst_662 = arith.constant dense<0.000000e+00> : vector<8xf32>
    %964 = vector.multi_reduction <add>, %963, %cst_662 [1] : vector<8x16xf32> to vector<8xf32>
    %965 = vector.shape_cast %964 : vector<8xf32> to vector<8x1xf32>
    %cst_663 = arith.constant 0.000000e+00 : f32
    %966 = vector.broadcast %cst_663 : f32 to vector<8x16xf32>
    %967 = arith.select %961, %966, %958 : vector<8x16xi1>, vector<8x16xf32>
    %cst_664 = arith.constant dense<0.000000e+00> : vector<8xf32>
    %968 = vector.multi_reduction <add>, %967, %cst_664 [1] : vector<8x16xf32> to vector<8xf32>
    %969 = vector.shape_cast %968 : vector<8xf32> to vector<8x1xf32>
    %970 = tpu.reciprocal %969 {approx = true} : vector<8x1xf32> -> vector<8x1xf32>
    %971 = arith.mulf %965, %970 : vector<8x1xf32>
    %972 = tpu.iota {dimensions = array<i32: 1>} : vector<8x16x128xi32>
    %c8_i32_665 = arith.constant 8 : i32
    %973 = vector.broadcast %c8_i32_665 : i32 to vector<8x16x128xi32>
    %974 = arith.cmpi slt, %972, %973 : vector<8x16x128xi32>
    %cst_666 = arith.constant 0.000000e+00 : f32
    %975 = vector.broadcast %cst_666 : f32 to vector<8x16x128xf32>
    %976 = arith.select %974, %952, %975 : vector<8x16x128xi1>, vector<8x16x128xf32>
    %cst_667 = arith.constant dense<0.000000e+00> : vector<8x128xf32>
    %977 = vector.multi_reduction <add>, %976, %cst_667 [1] : vector<8x16x128xf32> to vector<8x128xf32>
    %c0_668 = arith.constant 0 : index
    %c0_669 = arith.constant 0 : index
    %978 = vector.load %arg4[%c0_668, %c0_669] : memref<8x128xf32, #tpu.memory_space<vmem>>, vector<8x128xf32>
    tpu.vector_store %arg4[%c0_668, %c0_669], %977 {strides = array<i32>} : memref<8x128xf32, #tpu.memory_space<vmem>>, vector<8x128xf32>,
    %979 = vector.shape_cast %971 : vector<8x1xf32> to vector<8x1xf32>
    %980 = vector.broadcast %979 : vector<8x1xf32> to vector<8x128xf32>
    %c0_670 = arith.constant 0 : index
    %c0_671 = arith.constant 0 : index
    %981 = vector.load %arg5[%c0_670, %c0_671] : memref<8x128xf32, #tpu.memory_space<vmem>>, vector<8x128xf32>
    tpu.vector_store %arg5[%c0_670, %c0_671], %980 {strides = array<i32>} : memref<8x128xf32, #tpu.memory_space<vmem>>, vector<8x128xf32>,
    return
  }
  func.func @transform_0(%arg0: i32, %arg1: memref<16x16xi32, #tpu.memory_space<smem>>, %arg2: memref<16xi32, #tpu.memory_space<smem>>) -> (i32, i32) {
    %c0_i32 = arith.constant 0 : i32
    %c0_i32_0 = arith.constant 0 : i32
    %c0_i32_1 = arith.constant 0 : i32
    return %c0_i32, %c0_i32_0 : i32, i32
  }
  func.func @transform_1(%arg0: i32, %arg1: memref<16x16xi32, #tpu.memory_space<smem>>, %arg2: memref<16xi32, #tpu.memory_space<smem>>) -> (i32, i32) {
    %c0_i32 = arith.constant 0 : i32
    %c0_i32_0 = arith.constant 0 : i32
    return %arg0, %c0_i32 : i32, i32
  }
  func.func @transform_2(%arg0: i32, %arg1: memref<16x16xi32, #tpu.memory_space<smem>>, %arg2: memref<16xi32, #tpu.memory_space<smem>>) -> (i32, i32) {
    %c0_i32 = arith.constant 0 : i32
    %c0_i32_0 = arith.constant 0 : i32
    return %arg0, %c0_i32 : i32, i32
  }
}

</mosaic_0001>

<bundles_post_ra>
// kernel: tpu_custom_call.1
= control target key start
LH: loop header
LB: loop body
LE: loop exit
PB: predicated region body
PF: predicated region fallthrough
CT: control target
= control target key end

     0   :  { %s2357_s0 = inlined_call_operand.hbm [shape: s32[16,16], index: 0, kind: input, shape index: {}]   ;;  %s2358_s2 = inlined_call_operand.hbm [shape: f32[256,128], index: 2, kind: input, shape index: {}]   ;;  %s2359_s3 = inlined_call_operand.hbm [shape: f32[16,128], index: 3, kind: output, shape index: {0}]   ;;  %s2360_s4 = inlined_call_operand.hbm [shape: f32[16,128], index: 4, kind: output, shape index: {1}]   ;;  %s2361_s1 = inlined_call_operand.vmem [shape: s32[16], index: 1, kind: input, shape index: {}]  }
   0x1   :  { %2365 = sst [smem:[#allocation17_spill]] %s2358_s2  ;;  %s1644_s17 = scalar_lea.hbm %s2357_s0, 256 }
   0x2   :  { %p1645_p0 = scmp.ne.s32.totalorder %s2357_s0, %s1644_s17  ;;  %p1648_p1 = scmp.lt.u32.totalorder %s1644_s17, %s2357_s0 }
   0x4   :  { %p1650_p2 = pnand %p1648_p1, %p1645_p0 }
   0x6   :  { %1653 = shalt.err (!%p1650_p2)  }
   0x7   :  { %s1796_s22 = smov [#allocation5]   ;;  %s12_s27 = sshll.u32 %s2361_s1, 4  ;;  %s13_s27 = int_to_ptr.vmem [resolvable:$true] %s12_s27 }
   0x8   :  { %11 = dma.hbm_to_smem %s2357_s0, 256, %s1796_s22, [#allocation4] }
   0x9   :  { %s1654_s28 = scalar_lea.vmem %s13_s27, 16  ;;  %p1659_p4 = scmp.lt.s32.totalorder %s13_s27, %s13_s27 }
   0xa   :  { %p1655_p3 = scmp.ne.s32.totalorder %s13_s27, %s1654_s28  ;;  %p1660_p5 = scmp.lt.s32.totalorder %s1654_s28, %s1654_s28 }
   0xc   :  { %p1661_p6 = por %p1660_p5, %p1659_p4 }
   0xe   :  { %p1662_p7 = pnand %p1661_p6, %p1655_p3 }
  0x10   :  { %1665 = shalt.err (!%p1662_p7)  }
  0x11   :  { %s1797_s29 = smov [#allocation6]  }
  0x12   :  { %15 = dma.vmem_to_smem %s13_s27, 16, %s1797_s29, [#allocation4] }
  0x13   :  { %1766 = dma.done.wait [#allocation4], 272 }
  0x14   :  { %1767 = vsyncadd [#allocation4], 4294967024 }
  0x15   :  { %17 = sfence }
  0x16   :  { %18 = vsyncpa [#allocation8], 0 }
  0x17   :  { %19 = vsyncpa [#allocation9], 0 }
  0x18   :  { %21 = vsyncpa [#allocation9 + $0x1], 0 }
  0x19   :  { %22 = vsyncpa [#allocation12], 0 }
  0x1a   :  { %24 = vsyncpa [#allocation12 + $0x1], 0  ;;  %s1844_s0 = smov 0   ;;  %s1846_s1 = smov 0  }
  0x1b   :  { %s1848_s30 = smov 0   ;;  %s1850_s5 = smov 0  }
  0x1c LB: > { %s1865_s6 = sadd.s32 4294967295, %s1794_s5   ;;  %s1505_s7 = sadd.s32 4294967294, %s1794_s5   ;;  %s1794_s5 = sphi %s1850_s5, %s2379_s5   ;;  %s1790_s30 = sphi %s1848_s30, %s2378_s30   ;;  %s1786_s1 = sphi %s1846_s1, %s2377_s1   ;;  %s1782_s0 = sphi %s1844_s0, %s2376_s0  }
  0x1d   : > { %s1869_s8 = sadd.s32 1, %s1794_s5   ;;  %s58_s9 = sadd.s32 1, %s1790_s30 }
  0x1e   : > { %s55_s10 = ssub.s32 %s1794_s5, %s1869_s8  ;;  %p68_p8 = scmp.ne.s32.totalorder %s1790_s30, %s1786_s1 }
  0x1f   : > { %p56_p9 = scmp.eq.s32.totalorder %s55_s10, 0  ;;  %p69_p10 = scmp.eq.s32.totalorder %s1865_s6, 1 }
  0x20   : > { %p74_p11 = scmp.ne.s32.totalorder %s1786_s1, %s1782_s0  ;;  %p75_p12 = scmp.eq.s32.totalorder %s1505_s7, 1 }
  0x21   : > { %s1880_s11 = scalar_select %p56_p9, %s1790_s30, %s58_s9  }
  0x22   : > { %p1882_p13 = por %p69_p10, %p68_p8  ;;  %p1886_p0 = por %p75_p12, %p74_p11 }
  0x23   : > { %p1506_p1 = scmp.ge.s32.totalorder %s1794_s5, 1  ;;  %p108_p2 = scmp.lt.s32.totalorder %s1794_s5, 3 }
  0x24   : > { %s2366_s12 = scalar_select %p1882_p13, 1, 0 }
  0x25   : > { %s2367_s13 = scalar_select %p1886_p0, 1, 0 }
  0x26   : > { %p2362_p3 = scmp.eq.s32.totalorder %s1865_s6, 0  ;;  %p1893_p4 = pnand %p1506_p1, %p108_p2 }
  0x27   : > { %s1798_s15 = smov [#allocation7]   ;;  %s2370_s2 = sld [smem:[#allocation17_spill]] }
  0x28   : > { %s2368_s14 = scalar_select %p1893_p4, 1, 0 }
  0x29   : > { %s120_s16 = sshll.u32 %s1798_s15, 4  ;;  %p1557_p5 = pneg %p1893_p4  ;;  %s121_s16 = int_to_ptr.vmem [resolvable:$true] %s120_s16 }
  0x2b   : > { %p1901_p6 = pnand %p2362_p3, %p1557_p5 }
  0x2d   : > { %s1666_s20 = scalar_lea.hbm %s2370_s2, 4096  ;;  %p1668_p8 = pneg %p1901_p6 }
  0x2e   : > { %p1667_p7 = scmp.ne.s32.totalorder %s2370_s2, %s1666_s20  ;;  %p1673_p11 = scmp.lt.u32.totalorder %s1666_s20, %s2370_s2 }
  0x30   : > { %p1669_p9 = pnand %p1668_p8, %p1667_p7 }
  0x32   : > { %p1670_p10 = pneg %p1669_p9 }
  0x34   : > { %p1675_p12 = pnand %p1673_p11, %p1670_p10 }
  0x36   : > { %1678 = shalt.err (!%p1675_p12)
}
  0x37   : > { %s1679_s25 = scalar_lea.vmem %s121_s16, 4096  ;;  %p1687_p3 = scmp.lt.s32.totalorder %s121_s16, %s121_s16 }
  0x38   : > { %p1680_p1 = scmp.ne.s32.totalorder %s121_s16, %s1679_s25  ;;  %p1688_p0 = scmp.lt.s32.totalorder %s1679_s25, %s1679_s25 }
  0x3a   : > { %p1682_p2 = pnand %p1680_p1, %p1668_p8  ;;  %p1689_p13 = por %p1688_p0, %p1687_p3 }
  0x3c   : > { %p1683_p5 = pneg %p1682_p2 }
  0x3e   : > { %p1690_p4 = pnand %p1689_p13, %p1683_p5 }
  0x40   : > { %1693 = shalt.err (!%p1690_p4)
}
  0x41   : > { %s1799_s26 = smov 128   ;;  %s1800_s27 = smov 8  }
  0x42   : > { %1560 = dma.hbm_to_vmem [thread:$0]  (!%p1901_p6), %s2370_s2, 4096, %s121_s16, [#allocation8], %s1799_s26, %s1799_s26, %s1800_s27  }
  0x43   : > { %p2371_p7 = scmp.ne.s32.totalorder %s2368_s14, 0 }
  0x44   : > { %p2372_p9 = scmp.eq.s32.totalorder (!%p2371_p7), %s1865_s6, 0 }
  0x45   : > { %136 = sbr.rel (%p2371_p7) target bundleno = 631 (0x277), region = 24 }
  0x4c   : > { %1769 = dma.done.wait (%p2372_p9), [#allocation8], 4096   ;;  %p2373_p8 = pmov %p2372_p9 }
  0x4d   : > { %s1928_s7 = sshll.u32 %s1865_s6, 3  ;;  %s1931_s9 = sshll.u32 %s1865_s6, 10  ;;  %v1801_v14 = vmov 1966171168   ;;  %v867_v16 = vlaneseq  ;;  %vm1125_vm0 = vcmask 1041409   ;;  %vm1127_vm1 = vcmask 1042434  }
  0x4e   : > { %1771 = vsyncadd (%p2373_p8), [#allocation8], 4294963200  ;;  %s159_s10 = sld [smem:[#allocation6 + %s1928_s7]]  ;;  %s168_s15 = sadd.s32 1, %s1931_s9  ;;  %v865_v15 = vunpack.c.l.s4 %v1801_v14  ;;  %vm1129_vm2 = vcmask 1043459   ;;  %vm1131_vm3 = vcmask 1044484  }
  0x4f   : > { %s164_s14 = sld [smem:[#allocation5 + %s1931_s9]]  ;;  %s173_s16 = sadd.s32 2, %s1931_s9  ;;  %v1957_v20 = vshrl.u32 %v867_v16, 7  ;;  %vm1133_vm4 = vcmask 1045509   ;;  %vm1135_vm5 = vcmask 1046534   ;;  %vm1137_vm6 = vcmask 1047559  }
  0x50   : > { %s169_s17 = sld [smem:[#allocation5 + %s168_s15]]  ;;  %s178_s19 = sadd.s32 3, %s1931_s9  ;;  %v866_v19 = vunpack.c.0.s8 %v865_v15  ;;  %vm1060_vm7 = vcmask 130112   ;;  %vm1141_vm9 = vcmask 130048  }
  0x51   : > { %s174_s18 = sld [smem:[#allocation5 + %s173_s16]]  ;;  %s183_s20 = sadd.s32 4, %s1931_s9  ;;  %v1974_v27 = vsub.s32 0, %v1957_v20 }
  0x52   : > { %s179_s21 = sld [smem:[#allocation5 + %s178_s19]]  ;;  %s188_s23 = sadd.s32 5, %s1931_s9  ;;  %v869_v22 = vsub.s32 %v866_v19, %v1957_v20 }
  0x53   : > { %s184_s22 = sld [smem:[#allocation5 + %s183_s20]]  ;;  %s193_s24 = sadd.s32 6, %s1931_s9 }
  0x54   : > { %s160_s25 = scalar_lea.vmem [#allocation7], %s159_s10  ;;  %s189_s27 = sld [smem:[#allocation5 + %s188_s23]] }
  0x55   : > { %v161_v0 = vld [vmem:[%s160_s25] sm:$0x1]  ;;  %s165_s26 = scalar_lea.vmem [#allocation7], %s164_s14  ;;  %s194_s28 = sld [smem:[#allocation5 + %s193_s24]] }
  0x56   : > { %v166_v1 = vld [vmem:[%s165_s26] sm:$0x1]  ;;  %162 = vst [vmem:[#allocation3] sm:$0x1] %v161_v0  ;;  %s170_s29 = scalar_lea.vmem [#allocation7], %s169_s17  ;;  %s198_s16 = sadd.s32 7, %s1931_s9 }
  0x57   : > { %167 = vst [vmem:[#allocation2] sm:$0x1] %v166_v1  ;;  %v171_v2 = vld [vmem:[%s170_s29] sm:$0x1]  ;;  %s175_s15 = scalar_lea.vmem [#allocation7], %s174_s18  ;;  %s243_s19 = sadd.s32 1, %s1928_s7 }
  0x58   : > { %v176_v3 = vld [vmem:[%s175_s15] sm:$0x1]  ;;  %172 = vst [vmem:[#allocation2 + $0x1] sm:$0x1] %v171_v2  ;;  %s180_s20 = scalar_lea.vmem [#allocation7], %s179_s21  ;;  %s199_s14 = sld [smem:[#allocation5 + %s198_s16]] }
  0x59   : > { %177 = vst [vmem:[#allocation2 + $0x2] sm:$0x1] %v176_v3  ;;  %v181_v4 = vld [vmem:[%s180_s20] sm:$0x1]  ;;  %s185_s10 = scalar_lea.vmem [#allocation7], %s184_s22  ;;  %s244_s23 = sld [smem:[#allocation6 + %s243_s19]] }
  0x5a   : > { %v186_v5 = vld [vmem:[%s185_s10] sm:$0x1]  ;;  %182 = vst [vmem:[#allocation2 + $0x3] sm:$0x1] %v181_v4  ;;  %s329_s17 = sadd.s32 2, %s1928_s7  ;;  %s415_s24 = sadd.s32 3, %s1928_s7 }
  0x5b   : > { %187 = vst [vmem:[#allocation2 + $0x4] sm:$0x1] %v186_v5  ;;  %s190_s25 = scalar_lea.vmem [#allocation7], %s189_s27  ;;  %s195_s18 = scalar_lea.vmem [#allocation7], %s194_s28 }
  0x5c   : > { %v191_v6 = vld [vmem:[%s190_s25] sm:$0x1]  ;;  %s330_s26 = sld [smem:[#allocation6 + %s329_s17]]  ;;  %s501_s21 = sadd.s32 4, %s1928_s7 }
  0x5d   : > { %v196_v7 = vld [vmem:[%s195_s18] sm:$0x1]  ;;  %s416_s29 = sld [smem:[#allocation6 + %s415_s24]]  ;;  %192 = vst [vmem:[#allocation2 + $0x5] sm:$0x1] %v191_v6  ;;  %s587_s22 = sadd.s32 5, %s1928_s7 }
  0x5e   : > { %197 = vst [vmem:[#allocation2 + $0x6] sm:$0x1] %v196_v7  ;;  %s502_s15 = sld [smem:[#allocation6 + %s501_s21]]  ;;  %s200_s19 = scalar_lea.vmem [#allocation7], %s199_s14 }
  0x5f   : > { %s588_s16 = sld [smem:[#allocation6 + %s587_s22]]  ;;  %v201_v8 = vld [vmem:[%s200_s19] sm:$0x1]  ;;  %s245_s20 = scalar_lea.vmem [#allocation7], %s244_s23 }
  0x60   : > { %v246_v9 = vld [vmem:[%s245_s20] sm:$0x1]  ;;  %s673_s10 = sadd.s32 6, %s1928_s7  ;;  %s759_s27 = sadd.s32 7, %s1928_s7  ;;  %202 = vst [vmem:[#allocation2 + $0x7] sm:$0x1] %v201_v8 }
  0x61   : > { %247 = vst [vmem:[#allocation3 + $0x1] sm:$0x1] %v246_v9  ;;  %s674_s25 = sld [smem:[#allocation6 + %s673_s10]]  ;;  %s1950_s24 = sadd.s32 128, %s1931_s9 }
  0x62   : > { %s760_s28 = sld [smem:[#allocation6 + %s759_s27]]  ;;  %s331_s18 = scalar_lea.vmem [#allocation7], %s330_s26 }
  0x63   : > { %v332_v10 = vld [vmem:[%s331_s18] sm:$0x1]  ;;  %s417_s17 = scalar_lea.vmem [#allocation7], %s416_s29  ;;  %s249_s7 = sld [smem:[#allocation5 + %s1950_s24]] }
  0x64   : > { %v418_v11 = vld [vmem:[%s417_s17] sm:$0x1]  ;;  %333 = vst [vmem:[#allocation3 + $0x2] sm:$0x1] %v332_v10  ;;  %s503_s14 = scalar_lea.vmem [#allocation7], %s502_s15  ;;  %s254_s26 = sadd.s32 1, %s1950_s24 }
  0x65   : > { %419 = vst [vmem:[#allocation3 + $0x3] sm:$0x1] %v418_v11  ;;  %v504_v12 = vld [vmem:[%s503_s14] sm:$0x1]  ;;  %s589_s23 = scalar_lea.vmem [#allocation7], %s588_s16  ;;  %s255_s29 = sld [smem:[#allocation5 + %s254_s26]] }
  0x66   : > { %v590_v13 = vld [vmem:[%s589_s23] sm:$0x1]  ;;  %505 = vst [vmem:[#allocation3 + $0x4] sm:$0x1] %v504_v12  ;;  %s259_s21 = sadd.s32 2, %s1950_s24  ;;  %s203_s16 = sadd.s32 8, %s1931_s9 }
  0x67   : > { %591 = vst [vmem:[#allocation3 + $0x5] sm:$0x1] %v590_v13  ;;  %s675_s22 = scalar_lea.vmem [#allocation7], %s674_s25  ;;  %s260_s15 = sld [smem:[#allocation5 + %s259_s21]]  ;;  %v845_v31 = vld [vmem:[#allocation2] sm:$0xff] }
  0x68   : > { %v676_v17 = vld [vmem:[%s675_s22] sm:$0x1]  ;;  %s761_s19 = scalar_lea.vmem [#allocation7], %s760_s28  ;;  %s264_s20 = sadd.s32 3, %s1950_s24  ;;  %v1173_v33 = vrot.slane %v845_v31, 4 }
  0x69   : > { %v762_v18 = vld [vmem:[%s761_s19] sm:$0x1]  ;;  %677 = vst [vmem:[#allocation3 + $0x6] sm:$0x1] %v676_v17  ;;  %s269_s10 = sadd.s32 4, %s1950_s24  ;;  %s265_s27 = sld [smem:[#allocation5 + %s264_s20]] }
  0x6a   : > { %763 = vst [vmem:[#allocation3 + $0x7] sm:$0x1] %v762_v18  ;;  %s270_s18 = sld [smem:[#allocation5 + %s269_s10]]  ;;  %s274_s17 = sadd.s32 5, %s1950_s24  ;;  %v1174_v45 = vadd.f32 %v1173_v33, %v845_v31 }
  0x6b   : > { %s250_s14 = scalar_lea.vmem [#allocation7], %s249_s7  ;;  %s1962_s25 = sld [smem:[#allocation5 + %s274_s17]] }
  0x6c   : > { %v251_v21 = vld [vmem:[%s250_s14] sm:$0x1]  ;;  %s256_s28 = scalar_lea.vmem [#allocation7], %s255_s29  ;;  %s279_s23 = sadd.s32 6, %s1950_s24  ;;  %v1175_v52 = vrot.slane %v1174_v45, 2 }
  0x6d   : > { %253 = vst [vmem:[#allocation2 + $0x10] sm:$0x1] %v251_v21  ;;  %v257_v23 = vld [vmem:[%s256_s28] sm:$0x1]  ;;  %s284_s26 = sadd.s32 7, %s1950_s24  ;;  %s1967_s21 = sld [smem:[#allocation5 + %s279_s23]] }
  0x6e   : > { %258 = vst [vmem:[#allocation2 + $0x11] sm:$0x1] %v257_v23  ;;  %s261_s22 = scalar_lea.vmem [#allocation7], %s260_s15  ;;  %s1969_s19 = sld [smem:[#allocation5 + %s284_s26]]  ;;  %v1176_v58 = vadd.f32 %v1175_v52, %v1174_v45 }
  0x6f   : > { %v262_v24 = vld [vmem:[%s261_s22] sm:$0x1]  ;;  %s1971_s20 = sld [smem:[#allocation5 + %s203_s16]]  ;;  %s266_s7 = scalar_lea.vmem [#allocation7], %s265_s27 }
  0x70   : > { %263 = vst [vmem:[#allocation2 + $0x12] sm:$0x1] %v262_v24  ;;  %v267_v29 = vld [vmem:[%s266_s7] sm:$0x1]  ;;  %s271_s29 = scalar_lea.vmem [#allocation7], %s270_s18  ;;  %s208_s15 = sadd.s32 9, %s1931_s9 }
  0x71   : > { %v861_v25 = vld [vmem:[#allocation3] sm:$0xff]  ;;  %268 = vst [vmem:[#allocation2 + $0x13] sm:$0x1] %v267_v29  ;;  %s1977_s16 = sld [smem:[#allocation5 + %s208_s15]]  ;;  %s276_s10 = scalar_lea.vmem [#allocation7], %s1962_s25  ;;  %v1177_v2 = vrot.slane %v1176_v58, 1 }
  0x72   : > { %v870_v26 = vrot.slane %v861_v25, %v869_v22  ;;  %v863_v28 = vcombine.high %v861_v25, %v861_v25  ;;  %v272_v30 = vld [vmem:[%s271_s29] sm:$0x1]  ;;  %s213_s17 = sadd.s32 10, %s1931_s9  ;;  %s218_s27 = sadd.s32 11, %s1931_s9 }
  0x73   : > { %273 = vst [vmem:[#allocation2 + $0x14] sm:$0x1] %v272_v30  ;;  %v277_v34 = vld [vmem:[%s276_s10] sm:$0x1]  ;;  %s1984_s18 = sld [smem:[#allocation5 + %s213_s17]]  ;;  %s281_s14 = scalar_lea.vmem [#allocation7], %s1967_s21  ;;  %v1178_v8 = vadd.f32 %v1177_v2, %v1176_v58 }
  0x74   : > { %v1979_v32 = vrot.slane %v870_v26, %v869_v22  ;;  %v878_v35 = vcombine.high %v870_v26, %v870_v26  ;;  %v877_v36 = vrot.slane %v863_v28, %v869_v22  ;;  %278 = vst [vmem:[#allocation2 + $0x15] sm:$0x1] %v277_v34  ;;  %v282_v38 = vld [vmem:[%s281_s14] sm:$0x1]  ;;  %s286_s25 = scalar_lea.vmem [#allocation7], %s1969_s19  ;;  %s1995_s23 = sld [smem:[#allocation5 + %s218_s27]] }
  0x75   : > { %283 = vst [vmem:[#allocation2 + $0x16] sm:$0x1] %v282_v38  ;;  %v287_v40 = vld [vmem:[%s286_s25] sm:$0x1]  ;;  %s205_s28 = scalar_lea.vmem [#allocation7], %s1971_s20  ;;  %s223_s26 = sadd.s32 12, %s1931_s9 }
  0x76   : > { %v1988_v37 = vrot.slane %v1979_v32, %v1974_v27  ;;  %v1991_v39 = vrot.slane %v877_v36, %v869_v22  ;;  %v900_v41 = vrot.slane %v878_v35, %v869_v22  ;;  %v206_v42 = vld [vmem:[%s205_s28] sm:$0x1]  ;;  %v879_v43 = vcombine.high %v877_v36, %v877_v36  ;;  %288 = vst [vmem:[#allocation2 + $0x17] sm:$0x1] %v287_v40  ;;  %s1999_s21 = sld [smem:[#allocation5 + %s223_s26]]  ;;  %s228_s22 = sadd.s32 13, %s1931_s9 }
  0x77   : > { %207 = vst [vmem:[#allocation2 + $0x8] sm:$0x1] %v206_v42  ;;  %s2006_s19 = sld [smem:[#allocation5 + %s228_s22]]  ;;  %s210_s20 = scalar_lea.vmem [#allocation7], %s1977_s16  ;;  %v908_v35 = vcombine.high %v1979_v32, %v1979_v32 }
  0x78   : > { %v952_v44 = vmul.f32 %v1988_v37, %v845_v31  ;;  %v2004_v46 = vrot.slane %v1991_v39, %v1974_v27  ;;  %v910_v47 = vcombine.high %v900_v41, %v900_v41  ;;  %v2008_v48 = vrot.slane %v879_v43, %v869_v22  ;;  %v211_v49 = vld [vmem:[%s210_s20] sm:$0x1]  ;;  %s233_s7 = sadd.s32 14, %s1931_s9  ;;  %s238_s29 = sadd.s32 15, %s1931_s9 }
  0x79   : > { %212 = vst [vmem:[#allocation2 + $0x9] sm:$0x1] %v211_v49  ;;  %s2013_s15 = sld [smem:[#allocation5 + %s233_s7]]  ;;  %v2023_v53 = vrot.slane %v900_v41, %v1974_v27  ;;  %s215_s16 = scalar_lea.vmem [#allocation7], %s1984_s18  ;;  %v909_v0 = vcombine.high %v1991_v39, %v1991_v39  ;;  %v2104_v32 = vrot.slane %v908_v35, %v1974_v27 }
  0x7a   : > { %968 = vadd.xlane.f32.xlu0 %v952_v44  ;;  %v2016_v50 = vrot.slane %v910_v47, %v1974_v27  ;;  %v2020_v51 = vrot.slane %v2008_v48, %v1974_v27  ;;  %v216_v54 = vld [vmem:[%s215_s16] sm:$0x1]  ;;  %s2026_s10 = sld [smem:[#allocation5 + %s238_s29]]  ;;  %s289_s17 = sadd.s32 8, %s1950_s24  ;;  %v911_v33 = vcombine.high %v2008_v48, %v2008_v48 }
  0x7b   : > { %217 = vst [vmem:[#allocation2 + $0xa] sm:$0x1] %v216_v54  ;;  %s2029_s27 = sld [smem:[#allocation5 + %s289_s17]]  ;;  %s220_s14 = scalar_lea.vmem [#allocation7], %s1995_s23  ;;  %v2052_v5 = vrot.slane %v909_v0, %v1974_v27 }
  0x7c   : > { %v221_v55 = vld [vmem:[%s220_s14] sm:$0x1]  ;;  %s294_s25 = sadd.s32 9, %s1950_s24  ;;  %s225_s28 = scalar_lea.vmem [#allocation7], %s1999_s21 }
  0x7d   : > { %v847_v56 = vld [vmem:[#allocation2 + $0x10] sm:$0xff]  ;;  %222 = vst [vmem:[#allocation2 + $0xb] sm:$0x1] %v221_v55  ;;  %v226_v57 = vld [vmem:[%s225_s28] sm:$0x1]  ;;  %s2034_s26 = sld [smem:[#allocation5 + %s294_s25]] }
  0x7e   : > { %v954_v59 = vmul.f32 %v2023_v53, %v847_v56  ;;  %v1180_v60 = vrot.slane %v847_v56, 4  ;;  %227 = vst [vmem:[#allocation2 + $0xc] sm:$0x1] %v226_v57  ;;  %s230_s18 = scalar_lea.vmem [#allocation7], %s2006_s19  ;;  %s299_s22 = sadd.s32 10, %s1950_s24 }
  0x7f   : > { %v231_v61 = vld [vmem:[%s230_s18] sm:$0x1]  ;;  %s304_s23 = sadd.s32 11, %s1950_s24  ;;  %s2040_s20 = sld [smem:[#allocation5 + %s299_s22]] }
  0x80   : > { %232 = vst [vmem:[#allocation2 + $0xd] sm:$0x1] %v231_v61  ;;  %v1181_v62 = vadd.f32 %v1180_v60, %v847_v56  ;;  %972 = vadd.xlane.f32.xlu1 %v954_v59  ;;  %s235_s21 = scalar_lea.vmem [#allocation7], %s2013_s15  ;;  %s2043_s7 = sld [smem:[#allocation5 + %s304_s23]] }
  0x81   : > { %v236_v63 = vld [vmem:[%s235_s21] sm:$0x1]  ;;  %s240_s19 = scalar_lea.vmem [#allocation7], %s2026_s10  ;;  %s309_s29 = sadd.s32 12, %s1950_s24 }
  0x82   : > { %237 = vst [vmem:[#allocation2 + $0xe] sm:$0x1] %v236_v63  ;;  %v241_v1 = vld [vmem:[%s240_s19] sm:$0x1]  ;;  %v1182_v3 = vrot.slane %v1181_v62, 2  ;;  %s291_s16 = scalar_lea.vmem [#allocation7], %s2029_s27 }
  0x83   : > { %242 = vst [vmem:[#allocation2 + $0xf] sm:$0x1] %v241_v1  ;;  %v292_v4 = vld [vmem:[%s291_s16] sm:$0x1]  ;;  %s310_s15 = sld [smem:[#allocation5 + %s309_s29]]  ;;  %s314_s17 = sadd.s32 13, %s1950_s24 }
  0x84   : > { %293 = vst [vmem:[#allocation2 + $0x18] sm:$0x1] %v292_v4  ;;  %s2054_s14 = sld [smem:[#allocation5 + %s314_s17]]  ;;  %v1183_v6 = vadd.f32 %v1182_v3, %v1181_v62  ;;  %s296_s10 = scalar_lea.vmem [#allocation7], %s2034_s26 }
  0x85   : > { %v297_v7 = vld [vmem:[%s296_s10] sm:$0x1]  ;;  %s319_s25 = sadd.s32 14, %s1950_s24  ;;  %s324_s28 = sadd.s32 15, %s1950_s24 }
  0x86   : > { %298 = vst [vmem:[#allocation2 + $0x19] sm:$0x1] %v297_v7  ;;  %s2059_s27 = sld [smem:[#allocation5 + %s319_s25]]  ;;  %v1184_v9 = vrot.slane %v1183_v6, 1  ;;  %s301_s18 = scalar_lea.vmem [#allocation7], %s2040_s20 }
  0x87   : > { %v302_v10 = vld [vmem:[%s301_s18] sm:$0x1]  ;;  %s2062_s22 = sld [smem:[#allocation5 + %s324_s28]]  ;;  %s306_s23 = scalar_lea.vmem [#allocation7], %s2043_s7 }
  0x88   : > { %303 = vst [vmem:[#allocation2 + $0x1a] sm:$0x1] %v302_v10  ;;  %v307_v11 = vld [vmem:[%s306_s23] sm:$0x1]  ;;  %s2066_s21 = sadd.s32 256, %s1931_s9  ;;  %s2069_s26 = sadd.s32 512, %s1931_s9  ;;  %v1185_v12 = vadd.f32 %v1184_v9, %v1183_v6 }
  0x89   : > { %308 = vst [vmem:[#allocation2 + $0x1b] sm:$0x1] %v307_v11  ;;  %s335_s24 = sld [smem:[#allocation5 + %s2066_s21]]  ;;  %s311_s20 = scalar_lea.vmem [#allocation7], %s310_s15 }
  0x8a   : > { %v846_v13 = vld [vmem:[#allocation2 + $0x8] sm:$0xff]  ;;  %v312_v14 = vld [vmem:[%s311_s20] sm:$0x1]  ;;  %s340_s19 = sadd.s32 1, %s2066_s21  ;;  %v2074_v15 = vsel %vm1125_vm0, %v1185_v12, %v1178_v8  ;;  %s316_s7 = scalar_lea.vmem [#allocation7], %s2054_s14 }
  0x8b   : > { %v953_v17 = vmul.f32 %v1988_v37, %v846_v13  ;;  %313 = vst [vmem:[#allocation2 + $0x1c] sm:$0x1] %v312_v14  ;;  %v317_v18 = vld [vmem:[%s316_s7] sm:$0x1]  ;;  %s341_s29 = sld [smem:[#allocation5 + %s340_s19]]  ;;  %s345_s16 = sadd.s32 2, %s2066_s21  ;;  %v2099_v37 = vrot.slane %v911_v33, %v1974_v27 }
  0x8c   : > { %318 = vst [vmem:[#allocation2 + $0x1d] sm:$0x1] %v317_v18  ;;  %s346_s17 = sld [smem:[#allocation5 + %s345_s16]]  ;;  %s321_s15 = scalar_lea.vmem [#allocation7], %s2059_s27 }
  0x8d   : > { %970 = vadd.xlane.f32.xlu0 %v953_v17  ;;  %v322_v19 = vld [vmem:[%s321_s15] sm:$0x1]  ;;  %s350_s10 = sadd.s32 3, %s2066_s21  ;;  %s326_s25 = scalar_lea.vmem [#allocation7], %s2062_s22 }
  0x8e   : > { %323 = vst [vmem:[#allocation2 + $0x1e] sm:$0x1] %v322_v19  ;;  %v327_v21 = vld [vmem:[%s326_s25] sm:$0x1]  ;;  %s351_s28 = sld [smem:[#allocation5 + %s350_s10]]  ;;  %s355_s18 = sadd.s32 4, %s2066_s21 }
  0x8f   : > { %328 = vst [vmem:[#allocation2 + $0x1f] sm:$0x1] %v327_v21  ;;  %s356_s14 = sld [smem:[#allocation5 + %s355_s18]]  ;;  %s336_s23 = scalar_lea.vmem [#allocation7], %s335_s24 }
  0x90   : > { %v337_v22 = vld [vmem:[%s336_s23] sm:$0x1]  ;;  %s360_s20 = sadd.s32 5, %s2066_s21  ;;  %s365_s19 = sadd.s32 6, %s2066_s21 }
  0x91   : > { %339 = vst [vmem:[#allocation2 + $0x20] sm:$0x1] %v337_v22  ;;  %s361_s7 = sld [smem:[#allocation5 + %s360_s20]]  ;;  %s342_s16 = scalar_lea.vmem [#allocation7], %s341_s29 }
  0x92   : > { %v343_v23 = vld [vmem:[%s342_s16] sm:$0x1]  ;;  %s366_s27 = sld [smem:[#allocation5 + %s365_s19]]  ;;  %s347_s22 = scalar_lea.vmem [#allocation7], %s346_s17 }
  0x93   : > { %344 = vst [vmem:[#allocation2 + $0x21] sm:$0x1] %v343_v23  ;;  %v348_v24 = vld [vmem:[%s347_s22] sm:$0x1]  ;;  %s370_s15 = sadd.s32 7, %s2066_s21  ;;  %s375_s10 = sadd.s32 8, %s2066_s21 }
  0x94   : > { %349 = vst [vmem:[#allocation2 + $0x22] sm:$0x1] %v348_v24  ;;  %s371_s25 = sld [smem:[#allocation5 + %s370_s15]]  ;;  %s352_s2 = scalar_lea.vmem [#allocation7], %s351_s28 }
  0x95   : > { %v353_v25 = vld [vmem:[%s352_s2] sm:$0x1]  ;;  %s376_s24 = sld [smem:[#allocation5 + %s375_s10]]  ;;  %s357_s18 = scalar_lea.vmem [#allocation7], %s356_s14 }
  0x96   : > { %v848_v26 = vld [vmem:[#allocation2 + $0x18] sm:$0xff]  ;;  %354 = vst [vmem:[#allocation2 + $0x23] sm:$0x1] %v353_v25  ;;  %v358_v28 = vld [vmem:[%s357_s18] sm:$0x1]  ;;  %s380_s29 = sadd.s32 9, %s2066_s21 }
  0x97   : > { %s385_s23 = sadd.s32 10, %s2066_s21  ;;  %v955_v29 = vmul.f32 %v2023_v53, %v848_v26  ;;  %359 = vst [vmem:[#allocation2 + $0x24] sm:$0x1] %v358_v28  ;;  %s381_s17 = sld [smem:[#allocation5 + %s380_s29]] }
  0x98   : > { %s362_s20 = scalar_lea.vmem [#allocation7], %s361_s7  ;;  %s386_s19 = sld [smem:[#allocation5 + %s385_s23]] }
  0x99   : > { %v363_v30 = vld [vmem:[%s362_s20] sm:$0x1]  ;;  %974 = vadd.xlane.f32.xlu1 %v955_v29  ;;  %s367_s2 = scalar_lea.vmem [#allocation7], %s366_s27  ;;  %s390_s28 = sadd.s32 11, %s2066_s21 }
  0x9a   : > { %364 = vst [vmem:[#allocation2 + $0x25] sm:$0x1] %v363_v30  ;;  %v368_v31 = vld [vmem:[%s367_s2] sm:$0x1]  ;;  %s395_s16 = sadd.s32 12, %s2066_s21  ;;  %s391_s14 = sld [smem:[#allocation5 + %s390_s28]] }
  0x9b   : > { %369 = vst [vmem:[#allocation2 + $0x26] sm:$0x1] %v368_v31  ;;  %s372_s22 = scalar_lea.vmem [#allocation7], %s371_s25  ;;  %s396_s15 = sld [smem:[#allocation5 + %s395_s16]] }
  0x9c   : > { %v373_v34 = vld [vmem:[%s372_s22] sm:$0x1]  ;;  %s377_s7 = scalar_lea.vmem [#allocation7], %s376_s24  ;;  %s400_s27 = sadd.s32 13, %s2066_s21 }
  0x9d   : > { %374 = vst [vmem:[#allocation2 + $0x27] sm:$0x1] %v373_v34  ;;  %v378_v36 = vld [vmem:[%s377_s7] sm:$0x1]  ;;  %s405_s10 = sadd.s32 14, %s2066_s21  ;;  %s401_s18 = sld [smem:[#allocation5 + %s400_s27]] }
  0x9e   : > { %379 = vst [vmem:[#allocation2 + $0x28] sm:$0x1] %v378_v36  ;;  %s382_s29 = scalar_lea.vmem [#allocation7], %s381_s17  ;;  %s406_s25 = sld [smem:[#allocation5 + %s405_s10]] }
  0x9f   : > { %v383_v38 = vld [vmem:[%s382_s29] sm:$0x1]  ;;  %s387_s23 = scalar_lea.vmem [#allocation7], %s386_s19  ;;  %s410_s20 = sadd.s32 15, %s2066_s21 }
  0xa0   : > { %384 = vst [vmem:[#allocation2 + $0x29] sm:$0x1] %v383_v38  ;;  %v388_v39 = vld [vmem:[%s387_s23] sm:$0x1]  ;;  %s547_s2 = sadd.s32 8, %s2069_s26  ;;  %s411_s24 = sld [smem:[#allocation5 + %s410_s20]] }
  0xa1   : > { %389 = vst [vmem:[#allocation2 + $0x2a] sm:$0x1] %v388_v39  ;;  %s392_s28 = scalar_lea.vmem [#allocation7], %s391_s14  ;;  %s2106_s16 = sld [smem:[#allocation5 + %s547_s2]] }
  0xa2   : > { %v393_v40 = vld [vmem:[%s392_s28] sm:$0x1]  ;;  %s397_s17 = scalar_lea.vmem [#allocation7], %s396_s15  ;;  %s552_s22 = sadd.s32 9, %s2069_s26 }
  0xa3   : > { %394 = vst [vmem:[#allocation2 + $0x2b] sm:$0x1] %v393_v40  ;;  %v398_v41 = vld [vmem:[%s397_s17] sm:$0x1]  ;;  %s557_s7 = sadd.s32 10, %s2069_s26  ;;  %s553_s21 = sld [smem:[#allocation5 + %s552_s22]] }
  0xa4   : > { %v849_v42 = vld [vmem:[#allocation2 + $0x20] sm:$0xff]  ;;  %399 = vst [vmem:[#allocation2 + $0x2c] sm:$0x1] %v398_v41  ;;  %s402_s19 = scalar_lea.vmem [#allocation7], %s401_s18  ;;  %s558_s14 = sld [smem:[#allocation5 + %s557_s7]] }
  0xa5   : > { %v956_v43 = vmul.f32 %v2104_v32, %v849_v42  ;;  %v1187_v27 = vrot.slane %v849_v42, 4  ;;  %v403_v44 = vld [vmem:[%s402_s19] sm:$0x1]  ;;  %s407_s27 = scalar_lea.vmem [#allocation7], %s406_s25  ;;  %s562_s15 = sadd.s32 11, %s2069_s26 }
  0xa6   : > { %404 = vst [vmem:[#allocation2 + $0x2d] sm:$0x1] %v403_v44  ;;  %v408_v45 = vld [vmem:[%s407_s27] sm:$0x1]  ;;  %s567_s10 = sadd.s32 12, %s2069_s26  ;;  %s563_s29 = sld [smem:[#allocation5 + %s562_s15]] }
  0xa7   : > { %v1188_v47 = vadd.f32 %v1187_v27, %v849_v42  ;;  %976 = vadd.xlane.f32.xlu0 %v956_v43  ;;  %409 = vst [vmem:[#allocation2 + $0x2e] sm:$0x1] %v408_v45  ;;  %s412_s23 = scalar_lea.vmem [#allocation7], %s411_s24  ;;  %s568_s20 = sld [smem:[#allocation5 + %s567_s10]] }
  0xa8   : > { %v413_v48 = vld [vmem:[%s412_s23] sm:$0x1]  ;;  %s549_s18 = scalar_lea.vmem [#allocation7], %s2106_s16  ;;  %s572_s2 = sadd.s32 13, %s2069_s26 }
  0xa9   : > { %v1189_v49 = vrot.slane %v1188_v47, 2  ;;  %414 = vst [vmem:[#allocation2 + $0x2f] sm:$0x1] %v413_v48  ;;  %v550_v52 = vld [vmem:[%s549_s18] sm:$0x1]  ;;  %s577_s28 = sadd.s32 14, %s2069_s26 }
  0xaa   : > { %551 = vst [vmem:[#allocation2 + $0x48] sm:$0x1] %v550_v52  ;;  %s2116_s25 = sld [smem:[#allocation5 + %s572_s2]]  ;;  %s554_s17 = scalar_lea.vmem [#allocation7], %s553_s21 }
  0xab   : > { %v1190_v53 = vadd.f32 %v1189_v49, %v1188_v47  ;;  %v555_v54 = vld [vmem:[%s554_s17] sm:$0x1]  ;;  %s2118_s22 = sld [smem:[#allocation5 + %s577_s28]]  ;;  %s559_s24 = scalar_lea.vmem [#allocation7], %s558_s14 }
  0xac   : > { %556 = vst [vmem:[#allocation2 + $0x49] sm:$0x1] %v555_v54  ;;  %v560_v55 = vld [vmem:[%s559_s24] sm:$0x1]  ;;  %s582_s7 = sadd.s32 15, %s2069_s26  ;;  %s2122_s19 = sld [smem:[#allocation5 + %s2069_s26]] }
  0xad   : > { %v1191_v56 = vrot.slane %v1190_v53, 1  ;;  %561 = vst [vmem:[#allocation2 + $0x4a] sm:$0x1] %v560_v55  ;;  %s2124_s16 = sld [smem:[#allocation5 + %s582_s7]]  ;;  %s564_s27 = scalar_lea.vmem [#allocation7], %s563_s29 }
  0xae   : > { %v565_v57 = vld [vmem:[%s564_s27] sm:$0x1]  ;;  %s512_s15 = sadd.s32 1, %s2069_s26  ;;  %s569_s21 = scalar_lea.vmem [#allocation7], %s568_s20 }
  0xaf   : > { %v1192_v58 = vadd.f32 %v1191_v56, %v1190_v53  ;;  %566 = vst [vmem:[#allocation2 + $0x4b] sm:$0x1] %v565_v57  ;;  %v570_v59 = vld [vmem:[%s569_s21] sm:$0x1]  ;;  %s513_s10 = sld [smem:[#allocation5 + %s512_s15]]  ;;  %s517_s14 = sadd.s32 2, %s2069_s26 }
  0xb0   : > { %v850_v60 = vld [vmem:[#allocation2 + $0x28] sm:$0xff]  ;;  %571 = vst [vmem:[#allocation2 + $0x4c] sm:$0x1] %v570_v59  ;;  %s518_s23 = sld [smem:[#allocation5 + %s517_s14]]  ;;  %s574_s29 = scalar_lea.vmem [#allocation7], %s2116_s25 }
  0xb1   : > { %v2130_v61 = vsel %vm1127_vm1, %v1192_v58, %v2074_v15  ;;  %v957_v62 = vmul.f32 %v2104_v32, %v850_v60  ;;  %v575_v63 = vld [vmem:[%s574_s29] sm:$0x1]  ;;  %s522_s20 = sadd.s32 3, %s2069_s26  ;;  %s579_s18 = scalar_lea.vmem [#allocation7], %s2118_s22 }
  0xb2   : > { %576 = vst [vmem:[#allocation2 + $0x4d] sm:$0x1] %v575_v63  ;;  %v580_v0 = vld [vmem:[%s579_s18] sm:$0x1]  ;;  %s523_s2 = sld [smem:[#allocation5 + %s522_s20]]  ;;  %s508_s28 = scalar_lea.vmem [#allocation7], %s2122_s19 }
  0xb3   : > { %978 = vadd.xlane.f32.xlu1 %v957_v62  ;;  %581 = vst [vmem:[#allocation2 + $0x4e] sm:$0x1] %v580_v0  ;;  %v509_v1 = vld [vmem:[%s508_s28] sm:$0x1]  ;;  %s527_s17 = sadd.s32 4, %s2069_s26  ;;  %s584_s24 = scalar_lea.vmem [#allocation7], %s2124_s16 }
  0xb4   : > { %v585_v2 = vld [vmem:[%s584_s24] sm:$0x1]  ;;  %511 = vst [vmem:[#allocation2 + $0x40] sm:$0x1] %v509_v1  ;;  %s528_s7 = sld [smem:[#allocation5 + %s527_s17]]  ;;  %s532_s25 = sadd.s32 5, %s2069_s26 }
  0xb5   : > { %586 = vst [vmem:[#allocation2 + $0x4f] sm:$0x1] %v585_v2  ;;  %s533_s27 = sld [smem:[#allocation5 + %s532_s25]]  ;;  %s514_s15 = scalar_lea.vmem [#allocation7], %s513_s10 }
  0xb6   : > { %v515_v3 = vld [vmem:[%s514_s15] sm:$0x1]  ;;  %s537_s22 = sadd.s32 6, %s2069_s26  ;;  %s519_s21 = scalar_lea.vmem [#allocation7], %s518_s23 }
  0xb7   : > { %516 = vst [vmem:[#allocation2 + $0x41] sm:$0x1] %v515_v3  ;;  %v520_v4 = vld [vmem:[%s519_s21] sm:$0x1]  ;;  %s538_s14 = sld [smem:[#allocation5 + %s537_s22]]  ;;  %s542_s29 = sadd.s32 7, %s2069_s26 }
  0xb8   : > { %521 = vst [vmem:[#allocation2 + $0x42] sm:$0x1] %v520_v4  ;;  %s543_s19 = sld [smem:[#allocation5 + %s542_s29]]  ;;  %s524_s20 = scalar_lea.vmem [#allocation7], %s523_s2 }
  0xb9   : > { %v525_v6 = vld [vmem:[%s524_s20] sm:$0x1]  ;;  %s2143_s16 = sadd.s32 384, %s1931_s9  ;;  %p2374_p0 = scmp.ne.s32.totalorder %s2366_s12, 0 }
  0xba   : > { %526 = vst [vmem:[#allocation2 + $0x43] sm:$0x1] %v525_v6  ;;  %s461_s18 = sadd.s32 8, %s2143_s16  ;;  %s529_s28 = scalar_lea.vmem [#allocation7], %s528_s7 }
  0xbb   : > { %v530_v7 = vld [vmem:[%s529_s28] sm:$0x1]  ;;  %s462_s10 = sld [smem:[#allocation5 + %s461_s18]]  ;;  %s534_s23 = scalar_lea.vmem [#allocation7], %s533_s27 }
  0xbc   : > { %v854_v8 = vld [vmem:[#allocation2 + $0x48] sm:$0xff]  ;;  %531 = vst [vmem:[#allocation2 + $0x44] sm:$0x1] %v530_v7  ;;  %v535_v9 = vld [vmem:[%s534_s23] sm:$0x1]  ;;  %s466_s26 = sadd.s32 9, %s2143_s16 }
  0xbd   : > { %s471_s17 = sadd.s32 10, %s2143_s16  ;;  %v961_v10 = vmul.f32 %v2004_v46, %v854_v8  ;;  %536 = vst [vmem:[#allocation2 + $0x45] sm:$0x1] %v535_v9  ;;  %s467_s2 = sld [smem:[#allocation5 + %s466_s26]] }
  0xbe   : > { %s539_s24 = scalar_lea.vmem [#allocation7], %s538_s14  ;;  %s472_s25 = sld [smem:[#allocation5 + %s471_s17]] }
  0xbf   : > { %v540_v11 = vld [vmem:[%s539_s24] sm:$0x1]  ;;  %986 = vadd.xlane.f32.xlu1 %v961_v10  ;;  %s544_s7 = scalar_lea.vmem [#allocation7], %s543_s19  ;;  %s476_s15 = sadd.s32 11, %s2143_s16 }
  0xc0   : > { %541 = vst [vmem:[#allocation2 + $0x46] sm:$0x1] %v540_v11  ;;  %v545_v12 = vld [vmem:[%s544_s7] sm:$0x1]  ;;  %s481_s22 = sadd.s32 12, %s2143_s16  ;;  %s477_s27 = sld [smem:[#allocation5 + %s476_s15]] }
  0xc1   : > { %546 = vst [vmem:[#allocation2 + $0x47] sm:$0x1] %v545_v12  ;;  %s482_s21 = sld [smem:[#allocation5 + %s481_s22]]  ;;  %s486_s29 = sadd.s32 13, %s2143_s16 }
  0xc2   : > { %s463_s20 = scalar_lea.vmem [#allocation7], %s462_s10  ;;  %s487_s18 = sld [smem:[#allocation5 + %s486_s29]] }
  0xc3   : > { %v464_v13 = vld [vmem:[%s463_s20] sm:$0x1]  ;;  %s491_s28 = sadd.s32 14, %s2143_s16  ;;  %s468_s23 = scalar_lea.vmem [#allocation7], %s467_s2 }
  0xc4   : > { %465 = vst [vmem:[#allocation2 + $0x38] sm:$0x1] %v464_v13  ;;  %s492_s14 = sld [smem:[#allocation5 + %s491_s28]]  ;;  %v469_v14 = vld [vmem:[%s468_s23] sm:$0x1]  ;;  %s496_s26 = sadd.s32 15, %s2143_s16 }
  0xc5   : > { %470 = vst [vmem:[#allocation2 + $0x39] sm:$0x1] %v469_v14  ;;  %s473_s19 = scalar_lea.vmem [#allocation7], %s472_s25  ;;  %s497_s17 = sld [smem:[#allocation5 + %s496_s26]] }
  0xc6   : > { %v474_v15 = vld [vmem:[%s473_s19] sm:$0x1]  ;;  %s421_s24 = sld [smem:[#allocation5 + %s2143_s16]]  ;;  %s478_s7 = scalar_lea.vmem [#allocation7], %s477_s27 }
  0xc7   : > { %475 = vst [vmem:[#allocation2 + $0x3a] sm:$0x1] %v474_v15  ;;  %v479_v18 = vld [vmem:[%s478_s7] sm:$0x1]  ;;  %s483_s10 = scalar_lea.vmem [#allocation7], %s482_s21  ;;  %s426_s15 = sadd.s32 1, %s2143_s16 }
  0xc8   : > { %v2155_v17 = vld [vmem:[#allocation2 + $0x40] sm:$0xff]  ;;  %480 = vst [vmem:[#allocation2 + $0x3b] sm:$0x1] %v479_v18  ;;  %s427_s2 = sld [smem:[#allocation5 + %s426_s15]]  ;;  %s488_s25 = scalar_lea.vmem [#allocation7], %s487_s18 }
  0xc9   : > { %v484_v19 = vld [vmem:[%s483_s10] sm:$0x1]  ;;  %v960_v21 = vmul.f32 %v2004_v46, %v2155_v17  ;;  %s431_s22 = sadd.s32 2, %s2143_s16  ;;  %s436_s21 = sadd.s32 3, %s2143_s16 }
  0xca   : > { %485 = vst [vmem:[#allocation2 + $0x3c] sm:$0x1] %v484_v19  ;;  %v489_v22 = vld [vmem:[%s488_s25] sm:$0x1]  ;;  %s493_s27 = scalar_lea.vmem [#allocation7], %s492_s14  ;;  %s432_s29 = sld [smem:[#allocation5 + %s431_s22]] }
  0xcb   : > { %984 = vadd.xlane.f32.xlu0 %v960_v21  ;;  %490 = vst [vmem:[#allocation2 + $0x3d] sm:$0x1] %v489_v22  ;;  %v494_v23 = vld [vmem:[%s493_s27] sm:$0x1]  ;;  %s498_s20 = scalar_lea.vmem [#allocation7], %s497_s17  ;;  %s437_s23 = sld [smem:[#allocation5 + %s436_s21]] }
  0xcc   : > { %495 = vst [vmem:[#allocation2 + $0x3e] sm:$0x1] %v494_v23  ;;  %v499_v24 = vld [vmem:[%s498_s20] sm:$0x1]  ;;  %s422_s28 = scalar_lea.vmem [#allocation7], %s421_s24  ;;  %s2163_s26 = sadd.s32 640, %s1931_s9 }
  0xcd   : > { %v423_v46 = vld [vmem:[%s422_s28] sm:$0x1]  ;;  %500 = vst [vmem:[#allocation2 + $0x3f] sm:$0x1] %v499_v24  ;;  %s441_s18 = sadd.s32 4, %s2143_s16  ;;  %s446_s19 = sadd.s32 5, %s2143_s16 }
  0xce   : > { %425 = vst [vmem:[#allocation2 + $0x30] sm:$0x1] %v423_v46  ;;  %s442_s7 = sld [smem:[#allocation5 + %s441_s18]]  ;;  %s428_s14 = scalar_lea.vmem [#allocation7], %s427_s2 }
  0xcf   : > { %v429_v25 = vld [vmem:[%s428_s14] sm:$0x1]  ;;  %s447_s10 = sld [smem:[#allocation5 + %s446_s19]]  ;;  %s451_s15 = sadd.s32 6, %s2143_s16 }
  0xd0   : > { %430 = vst [vmem:[#allocation2 + $0x31] sm:$0x1] %v429_v25  ;;  %s452_s17 = sld [smem:[#allocation5 + %s451_s15]]  ;;  %s433_s25 = scalar_lea.vmem [#allocation7], %s432_s29 }
  0xd1   : > { %v434_v26 = vld [vmem:[%s433_s25] sm:$0x1]  ;;  %s456_s24 = sadd.s32 7, %s2143_s16  ;;  %s633_s22 = sadd.s32 8, %s2163_s26 }
  0xd2   : > { %435 = vst [vmem:[#allocation2 + $0x32] sm:$0x1] %v434_v26  ;;  %s457_s27 = sld [smem:[#allocation5 + %s456_s24]]  ;;  %s438_s21 = scalar_lea.vmem [#allocation7], %s437_s23 }
  0xd3   : > { %v439_v28 = vld [vmem:[%s438_s21] sm:$0x1]  ;;  %s634_s20 = sld [smem:[#allocation5 + %s633_s22]]  ;;  %s638_s28 = sadd.s32 9, %s2163_s26 }
  0xd4   : > { %v852_v29 = vld [vmem:[#allocation2 + $0x38] sm:$0xff]  ;;  %440 = vst [vmem:[#allocation2 + $0x33] sm:$0x1] %v439_v28  ;;  %s639_s2 = sld [smem:[#allocation5 + %s638_s28]]  ;;  %s443_s18 = scalar_lea.vmem [#allocation7], %s442_s7 }
  0xd5   : > { %v959_v30 = vmul.f32 %v2016_v50, %v852_v29  ;;  %v444_v31 = vld [vmem:[%s443_s18] sm:$0x1]  ;;  %s643_s29 = sadd.s32 10, %s2163_s26  ;;  %s448_s19 = scalar_lea.vmem [#allocation7], %s447_s10 }
  0xd6   : > { %445 = vst [vmem:[#allocation2 + $0x34] sm:$0x1] %v444_v31  ;;  %v449_v33 = vld [vmem:[%s448_s19] sm:$0x1]  ;;  %s644_s16 = sld [smem:[#allocation5 + %s643_s29]]  ;;  %s453_s23 = scalar_lea.vmem [#allocation7], %s452_s17 }
  0xd7   : > { %982 = vadd.xlane.f32.xlu1 %v959_v30  ;;  %450 = vst [vmem:[#allocation2 + $0x35] sm:$0x1] %v449_v33  ;;  %v454_v34 = vld [vmem:[%s453_s23] sm:$0x1]  ;;  %s648_s14 = sadd.s32 11, %s2163_s26  ;;  %s653_s15 = sadd.s32 12, %s2163_s26 }
  0xd8   : > { %455 = vst [vmem:[#allocation2 + $0x36] sm:$0x1] %v454_v34  ;;  %s649_s25 = sld [smem:[#allocation5 + %s648_s14]]  ;;  %s458_s24 = scalar_lea.vmem [#allocation7], %s457_s27 }
  0xd9   : > { %v459_v35 = vld [vmem:[%s458_s24] sm:$0x1]  ;;  %s654_s7 = sld [smem:[#allocation5 + %s653_s15]]  ;;  %s635_s22 = scalar_lea.vmem [#allocation7], %s634_s20 }
  0xda   : > { %460 = vst [vmem:[#allocation2 + $0x37] sm:$0x1] %v459_v35  ;;  %v636_v36 = vld [vmem:[%s635_s22] sm:$0x1]  ;;  %s658_s10 = sadd.s32 13, %s2163_s26  ;;  %s640_s21 = scalar_lea.vmem [#allocation7], %s639_s2 }
  0xdb   : > { %637 = vst [vmem:[#allocation2 + $0x58] sm:$0x1] %v636_v36  ;;  %v641_v38 = vld [vmem:[%s640_s21] sm:$0x1]  ;;  %s659_s17 = sld [smem:[#allocation5 + %s658_s10]]  ;;  %s663_s28 = sadd.s32 14, %s2163_s26 }
  0xdc   : > { %642 = vst [vmem:[#allocation2 + $0x59] sm:$0x1] %v641_v38  ;;  %s664_s18 = sld [smem:[#allocation5 + %s663_s28]]  ;;  %s645_s29 = scalar_lea.vmem [#allocation7], %s644_s16 }
  0xdd   : > { %v646_v39 = vld [vmem:[%s645_s29] sm:$0x1]  ;;  %s668_s27 = sadd.s32 15, %s2163_s26  ;;  %s593_s19 = sld [smem:[#allocation5 + %s2163_s26]] }
  0xde   : > { %647 = vst [vmem:[#allocation2 + $0x5a] sm:$0x1] %v646_v39  ;;  %s669_s23 = sld [smem:[#allocation5 + %s668_s27]]  ;;  %s650_s14 = scalar_lea.vmem [#allocation7], %s649_s25 }
  0xdf   : > { %v651_v32 = vld [vmem:[%s650_s14] sm:$0x1]  ;;  %s598_s20 = sadd.s32 1, %s2163_s26  ;;  %s655_s15 = scalar_lea.vmem [#allocation7], %s654_s7 }
  0xe0   : > { %652 = vst [vmem:[#allocation2 + $0x5b] sm:$0x1] %v651_v32  ;;  %v656_v40 = vld [vmem:[%s655_s15] sm:$0x1]  ;;  %s599_s2 = sld [smem:[#allocation5 + %s598_s20]]  ;;  %s603_s24 = sadd.s32 2, %s2163_s26 }
  0xe1   : > { %v2181_v41 = vld [vmem:[#allocation2 + $0x30] sm:$0xff]  ;;  %657 = vst [vmem:[#allocation2 + $0x5c] sm:$0x1] %v656_v40  ;;  %s604_s22 = sld [smem:[#allocation5 + %s603_s24]]  ;;  %s660_s16 = scalar_lea.vmem [#allocation7], %s659_s17  ;;  %v1201_v40 = vrot.slane %v2155_v17, 4 }
  0xe2   : > { %v958_v42 = vmul.f32 %v2016_v50, %v2181_v41  ;;  %v661_v43 = vld [vmem:[%s660_s16] sm:$0x1]  ;;  %s608_s10 = sadd.s32 3, %s2163_s26  ;;  %s665_s25 = scalar_lea.vmem [#allocation7], %s664_s18  ;;  %v1194_v32 = vrot.slane %v2181_v41, 4 }
  0xe3   : > { %662 = vst [vmem:[#allocation2 + $0x5d] sm:$0x1] %v661_v43  ;;  %v666_v27 = vld [vmem:[%s665_s25] sm:$0x1]  ;;  %s609_s7 = sld [smem:[#allocation5 + %s608_s10]]  ;;  %s594_s21 = scalar_lea.vmem [#allocation7], %s593_s19 }
  0xe4   : > { %980 = vadd.xlane.f32.xlu0 %v958_v42  ;;  %667 = vst [vmem:[#allocation2 + $0x5e] sm:$0x1] %v666_v27  ;;  %v595_v44 = vld [vmem:[%s594_s21] sm:$0x1]  ;;  %s613_s28 = sadd.s32 4, %s2163_s26  ;;  %s670_s29 = scalar_lea.vmem [#allocation7], %s669_s23  ;;  %v1195_v27 = vadd.f32 %v1194_v32, %v2181_v41 }
  0xe5   : > { %v671_v45 = vld [vmem:[%s670_s29] sm:$0x1]  ;;  %597 = vst [vmem:[#allocation2 + $0x50] sm:$0x1] %v595_v44  ;;  %s614_s27 = sld [smem:[#allocation5 + %s613_s28]]  ;;  %s618_s17 = sadd.s32 5, %s2163_s26 }
  0xe6   : > { %672 = vst [vmem:[#allocation2 + $0x5f] sm:$0x1] %v671_v45  ;;  %s619_s14 = sld [smem:[#allocation5 + %s618_s17]]  ;;  %s600_s20 = scalar_lea.vmem [#allocation7], %s599_s2  ;;  %v1202_v45 = vadd.f32 %v1201_v40, %v2155_v17  ;;  %v2252_v32 = vand.u32 127, %v867_v16 }
  0xe7   : > { %v601_v50 = vld [vmem:[%s600_s20] sm:$0x1]  ;;  %s623_s18 = sadd.s32 6, %s2163_s26  ;;  %s605_s15 = scalar_lea.vmem [#allocation7], %s604_s22 }
  0xe8   : > { %602 = vst [vmem:[#allocation2 + $0x51] sm:$0x1] %v601_v50  ;;  %v606_v47 = vld [vmem:[%s605_s15] sm:$0x1]  ;;  %s624_s24 = sld [smem:[#allocation5 + %s623_s18]]  ;;  %s628_s16 = sadd.s32 7, %s2163_s26  ;;  %v1053_v16 = vsub.s32 %v2252_v32, %v1957_v20 }
  0xe9   : > { %607 = vst [vmem:[#allocation2 + $0x52] sm:$0x1] %v606_v47  ;;  %s629_s19 = sld [smem:[#allocation5 + %s628_s16]]  ;;  %s610_s10 = scalar_lea.vmem [#allocation7], %s609_s7  ;;  %vm1034_vm8 = vcmp.lt.s32.totalorder %v2252_v32, 8 }
  0xea   : > { %v611_v48 = vld [vmem:[%s610_s10] sm:$0x1]  ;;  %s2191_s23 = sadd.s32 768, %s1931_s9 }
  0xeb   : > { %612 = vst [vmem:[#allocation2 + $0x53] sm:$0x1] %v611_v48  ;;  %s719_s25 = sadd.s32 8, %s2191_s23  ;;  %s615_s21 = scalar_lea.vmem [#allocation7], %s614_s27  ;;  %v1196_v48 = vrot.slane %v1195_v27, 2 }
  0xec   : > { %v616_v49 = vld [vmem:[%s615_s21] sm:$0x1]  ;;  %s720_s2 = sld [smem:[#allocation5 + %s719_s25]]  ;;  %s620_s22 = scalar_lea.vmem [#allocation7], %s619_s14 }
  0xed   : > { %v856_v52 = vld [vmem:[#allocation2 + $0x58] sm:$0xff]  ;;  %617 = vst [vmem:[#allocation2 + $0x54] sm:$0x1] %v616_v49  ;;  %v621_v53 = vld [vmem:[%s620_s22] sm:$0x1]  ;;  %s724_s26 = sadd.s32 9, %s2191_s23 }
  0xee   : > { %s729_s28 = sadd.s32 10, %s2191_s23  ;;  %v963_v54 = vmul.f32 %v2020_v51, %v856_v52  ;;  %622 = vst [vmem:[#allocation2 + $0x55] sm:$0x1] %v621_v53  ;;  %s725_s7 = sld [smem:[#allocation5 + %s724_s26]]  ;;  %v1203_v52 = vrot.slane %v1202_v45, 2 }
  0xef   : > { %s625_s29 = scalar_lea.vmem [#allocation7], %s624_s24  ;;  %s730_s17 = sld [smem:[#allocation5 + %s729_s28]] }
  0xf0   : > { %v626_v55 = vld [vmem:[%s625_s29] sm:$0x1]  ;;  %990 = vadd.xlane.f32.xlu1 %v963_v54  ;;  %s630_s27 = scalar_lea.vmem [#allocation7], %s629_s19  ;;  %s734_s20 = sadd.s32 11, %s2191_s23  ;;  %v1197_v54 = vadd.f32 %v1196_v48, %v1195_v27 }
  0xf1   : > { %627 = vst [vmem:[#allocation2 + $0x56] sm:$0x1] %v626_v55  ;;  %v631_v56 = vld [vmem:[%s630_s27] sm:$0x1]  ;;  %s739_s18 = sadd.s32 12, %s2191_s23  ;;  %s735_s14 = sld [smem:[#allocation5 + %s734_s20]] }
  0xf2   : > { %632 = vst [vmem:[#allocation2 + $0x57] sm:$0x1] %v631_v56  ;;  %s740_s15 = sld [smem:[#allocation5 + %s739_s18]]  ;;  %s744_s16 = sadd.s32 13, %s2191_s23  ;;  %v1204_v56 = vadd.f32 %v1203_v52, %v1202_v45 }
  0xf3   : > { %s721_s10 = scalar_lea.vmem [#allocation7], %s720_s2  ;;  %s745_s25 = sld [smem:[#allocation5 + %s744_s16]] }
  0xf4   : > { %v722_v57 = vld [vmem:[%s721_s10] sm:$0x1]  ;;  %s749_s21 = sadd.s32 14, %s2191_s23  ;;  %s726_s22 = scalar_lea.vmem [#allocation7], %s725_s7 }
  0xf5   : > { %723 = vst [vmem:[#allocation2 + $0x68] sm:$0x1] %v722_v57  ;;  %s750_s24 = sld [smem:[#allocation5 + %s749_s21]]  ;;  %v727_v58 = vld [vmem:[%s726_s22] sm:$0x1]  ;;  %s754_s26 = sadd.s32 15, %s2191_s23 }
  0xf6   : > { %728 = vst [vmem:[#allocation2 + $0x69] sm:$0x1] %v727_v58  ;;  %s731_s19 = scalar_lea.vmem [#allocation7], %s730_s17  ;;  %s755_s28 = sld [smem:[#allocation5 + %s754_s26]] }
  0xf7   : > { %v732_v59 = vld [vmem:[%s731_s19] sm:$0x1]  ;;  %s679_s29 = sld [smem:[#allocation5 + %s2191_s23]]  ;;  %s736_s27 = scalar_lea.vmem [#allocation7], %s735_s14 }
  0xf8   : > { %733 = vst [vmem:[#allocation2 + $0x6a] sm:$0x1] %v732_v59  ;;  %v737_v62 = vld [vmem:[%s736_s27] sm:$0x1]  ;;  %s741_s2 = scalar_lea.vmem [#allocation7], %s740_s15  ;;  %s684_s20 = sadd.s32 1, %s2191_s23 }
  0xf9   : > { %v2203_v60 = vld [vmem:[#allocation2 + $0x50] sm:$0xff]  ;;  %v742_v63 = vld [vmem:[%s741_s2] sm:$0x1]  ;;  %738 = vst [vmem:[#allocation2 + $0x6b] sm:$0x1] %v737_v62  ;;  %s685_s7 = sld [smem:[#allocation5 + %s684_s20]] }
  0xfa   : > { %v962_v0 = vmul.f32 %v2020_v51, %v2203_v60  ;;  %743 = vst [vmem:[#allocation2 + $0x6c] sm:$0x1] %v742_v63  ;;  %s746_s17 = scalar_lea.vmem [#allocation7], %s745_s25  ;;  %s689_s18 = sadd.s32 2, %s2191_s23  ;;  %v1208_v42 = vrot.slane %v2203_v60, 4  ;;  %v1198_v59 = vrot.slane %v1197_v54, 1 }
  0xfb   : > { %v747_v1 = vld [vmem:[%s746_s17] sm:$0x1]  ;;  %s751_s14 = scalar_lea.vmem [#allocation7], %s750_s24  ;;  %s690_s16 = sld [smem:[#allocation5 + %s689_s18]]  ;;  %v1205_v63 = vrot.slane %v1204_v56, 1 }
  0xfc   : > { %988 = vadd.xlane.f32.xlu0 %v962_v0  ;;  %748 = vst [vmem:[#allocation2 + $0x6d] sm:$0x1] %v747_v1  ;;  %v752_v2 = vld [vmem:[%s751_s14] sm:$0x1]  ;;  %s694_s15 = sadd.s32 3, %s2191_s23  ;;  %s756_s10 = scalar_lea.vmem [#allocation7], %s755_s28  ;;  %v1209_v50 = vadd.f32 %v1208_v42, %v2203_v60  ;;  %v1199_v1 = vadd.f32 %v1198_v59, %v1197_v54 }
  0xfd   : > { %753 = vst [vmem:[#allocation2 + $0x6e] sm:$0x1] %v752_v2  ;;  %v757_v3 = vld [vmem:[%s756_s10] sm:$0x1]  ;;  %s680_s21 = scalar_lea.vmem [#allocation7], %s679_s29  ;;  %s695_s22 = sld [smem:[#allocation5 + %s694_s15]]  ;;  %v1206_v2 = vadd.f32 %v1205_v63, %v1204_v56 }
  0xfe   : > { %v681_v51 = vld [vmem:[%s680_s21] sm:$0x1]  ;;  %s2211_s26 = sadd.s32 896, %s1931_s9  ;;  %758 = vst [vmem:[#allocation2 + $0x6f] sm:$0x1] %v757_v3  ;;  %s699_s25 = sadd.s32 4, %s2191_s23 }
  0xff   : > { %683 = vst [vmem:[#allocation2 + $0x60] sm:$0x1] %v681_v51  ;;  %s704_s19 = sadd.s32 5, %s2191_s23  ;;  %s700_s27 = sld [smem:[#allocation5 + %s699_s25]] }
 0x100   : > { %s686_s24 = scalar_lea.vmem [#allocation7], %s685_s7  ;;  %s705_s2 = sld [smem:[#allocation5 + %s704_s19]] }
 0x101   : > { %v687_v4 = vld [vmem:[%s686_s24] sm:$0x1]  ;;  %s709_s20 = sadd.s32 6, %s2191_s23  ;;  %s691_s17 = scalar_lea.vmem [#allocation7], %s690_s16 }
 0x102   : > { %688 = vst [vmem:[#allocation2 + $0x61] sm:$0x1] %v687_v4  ;;  %s710_s28 = sld [smem:[#allocation5 + %s709_s20]]  ;;  %v692_v6 = vld [vmem:[%s691_s17] sm:$0x1]  ;;  %s714_s29 = sadd.s32 7, %s2191_s23  ;;  %v1238_v4 = vsel %vm1129_vm2, %v1199_v1, %v2130_v61 }
 0x103   : > { %s805_s18 = sadd.s32 8, %s2211_s26  ;;  %693 = vst [vmem:[#allocation2 + $0x62] sm:$0x1] %v692_v6  ;;  %s715_s9 = sld [smem:[#allocation5 + %s714_s29]]  ;;  %v1239_v6 = vsel %vm1131_vm3, %v1206_v2, %v1238_v4 }
 0x104   : > { %s696_s14 = scalar_lea.vmem [#allocation7], %s695_s22  ;;  %s806_s15 = sld [smem:[#allocation5 + %s805_s18]] }
 0x105   : > { %v697_v7 = vld [vmem:[%s696_s14] sm:$0x1]  ;;  %s810_s10 = sadd.s32 9, %s2211_s26  ;;  %v858_v8 = vld [vmem:[#allocation2 + $0x68] sm:$0xff]  ;;  %s701_s21 = scalar_lea.vmem [#allocation7], %s700_s27 }
 0x106   : > { %698 = vst [vmem:[#allocation2 + $0x63] sm:$0x1] %v697_v7  ;;  %s811_s7 = sld [smem:[#allocation5 + %s810_s10]]  ;;  %v965_v9 = vmul.f32 %v2052_v5, %v858_v8  ;;  %v702_v10 = vld [vmem:[%s701_s21] sm:$0x1]  ;;  %s815_s16 = sadd.s32 10, %s2211_s26 }
 0x107   : > { %703 = vst [vmem:[#allocation2 + $0x64] sm:$0x1] %v702_v10  ;;  %s706_s25 = scalar_lea.vmem [#allocation7], %s705_s2  ;;  %s816_s23 = sld [smem:[#allocation5 + %s815_s16]] }
 0x108   : > { %v707_v11 = vld [vmem:[%s706_s25] sm:$0x1]  ;;  %994 = vadd.xlane.f32.xlu1 %v965_v9  ;;  %s711_s22 = scalar_lea.vmem [#allocation7], %s710_s28  ;;  %s820_s19 = sadd.s32 11, %s2211_s26 }
 0x109   : > { %708 = vst [vmem:[#allocation2 + $0x65] sm:$0x1] %v707_v11  ;;  %v712_v12 = vld [vmem:[%s711_s22] sm:$0x1]  ;;  %s825_s24 = sadd.s32 12, %s2211_s26  ;;  %s821_s20 = sld [smem:[#allocation5 + %s820_s19]]  ;;  %v969_v11 = vpop.xlane.xlu0 %968 }
 0x10a   : > { %713 = vst [vmem:[#allocation2 + $0x66] sm:$0x1] %v712_v12  ;;  %s716_s17 = scalar_lea.vmem [#allocation7], %s715_s9  ;;  %s826_s27 = sld [smem:[#allocation5 + %s825_s24]] }
 0x10b   : > { %v717_v13 = vld [vmem:[%s716_s17] sm:$0x1]  ;;  %s807_s29 = scalar_lea.vmem [#allocation7], %s806_s15  ;;  %s830_s2 = sadd.s32 13, %s2211_s26 }
 0x10c   : > { %718 = vst [vmem:[#allocation2 + $0x67] sm:$0x1] %v717_v13  ;;  %v808_v14 = vld [vmem:[%s807_s29] sm:$0x1]  ;;  %s812_s18 = scalar_lea.vmem [#allocation7], %s811_s7  ;;  %s831_s28 = sld [smem:[#allocation5 + %s830_s2]] }
 0x10d   : > { %809 = vst [vmem:[#allocation2 + $0x78] sm:$0x1] %v808_v14  ;;  %v813_v15 = vld [vmem:[%s812_s18] sm:$0x1]  ;;  %s835_s14 = sadd.s32 14, %s2211_s26  ;;  %s817_s21 = scalar_lea.vmem [#allocation7], %s816_s23  ;;  %v973_v10 = vpop.xlane.xlu1 %972 }
 0x10e   : > { %814 = vst [vmem:[#allocation2 + $0x79] sm:$0x1] %v813_v15  ;;  %s836_s10 = sld [smem:[#allocation5 + %s835_s14]]  ;;  %v818_v18 = vld [vmem:[%s817_s21] sm:$0x1]  ;;  %s840_s9 = sadd.s32 15, %s2211_s26 }
 0x10f   : > { %s765_s16 = sld [smem:[#allocation5 + %s2211_s26]]  ;;  %819 = vst [vmem:[#allocation2 + $0x7a] sm:$0x1] %v818_v18  ;;  %s822_s22 = scalar_lea.vmem [#allocation7], %s821_s20 }
 0x110   : > { %s841_s25 = sld [smem:[#allocation5 + %s840_s9]]  ;;  %v823_v19 = vld [vmem:[%s822_s22] sm:$0x1]  ;;  %s770_s15 = sadd.s32 1, %s2211_s26 }
 0x111   : > { %824 = vst [vmem:[#allocation2 + $0x7b] sm:$0x1] %v823_v19  ;;  %s827_s19 = scalar_lea.vmem [#allocation7], %s826_s27  ;;  %s771_s7 = sld [smem:[#allocation5 + %s770_s15]] }
 0x112   : > { %v828_v21 = vld [vmem:[%s827_s19] sm:$0x1]  ;;  %s775_s24 = sadd.s32 2, %s2211_s26  ;;  %s832_s23 = scalar_lea.vmem [#allocation7], %s831_s28 }
 0x113   : > { %v857_v22 = vld [vmem:[#allocation2 + $0x60] sm:$0xff]  ;;  %829 = vst [vmem:[#allocation2 + $0x7c] sm:$0x1] %v828_v21  ;;  %s776_s17 = sld [smem:[#allocation5 + %s775_s24]]  ;;  %s780_s29 = sadd.s32 3, %s2211_s26 }
 0x114   : > { %v964_v23 = vmul.f32 %v2052_v5, %v857_v22  ;;  %v833_v24 = vld [vmem:[%s832_s23] sm:$0x1]  ;;  %s837_s2 = scalar_lea.vmem [#allocation7], %s836_s10  ;;  %s781_s20 = sld [smem:[#allocation5 + %s780_s29]]  ;;  %v1215_v43 = vrot.slane %v857_v22, 4 }
 0x115   : > { %834 = vst [vmem:[#allocation2 + $0x7d] sm:$0x1] %v833_v24  ;;  %v838_v46 = vld [vmem:[%s837_s2] sm:$0x1]  ;;  %s766_s27 = scalar_lea.vmem [#allocation7], %s765_s16  ;;  %s785_s18 = sadd.s32 4, %s2211_s26 }
 0x116   : > { %992 = vadd.xlane.f32.xlu0 %v964_v23  ;;  %839 = vst [vmem:[#allocation2 + $0x7e] sm:$0x1] %v838_v46  ;;  %v767_v25 = vld [vmem:[%s766_s27] sm:$0x1]  ;;  %s842_s14 = scalar_lea.vmem [#allocation7], %s841_s25  ;;  %s786_s21 = sld [smem:[#allocation5 + %s785_s18]]  ;;  %v1216_v47 = vadd.f32 %v1215_v43, %v857_v22 }
 0x117   : > { %v843_v26 = vld [vmem:[%s842_s14] sm:$0x1]  ;;  %769 = vst [vmem:[#allocation2 + $0x70] sm:$0x1] %v767_v25  ;;  %s790_s9 = sadd.s32 5, %s2211_s26  ;;  %s772_s22 = scalar_lea.vmem [#allocation7], %s771_s7 }
 0x118   : > { %844 = vst [vmem:[#allocation2 + $0x7f] sm:$0x1] %v843_v26  ;;  %s791_s28 = sld [smem:[#allocation5 + %s790_s9]]  ;;  %v773_v5 = vld [vmem:[%s772_s22] sm:$0x1]  ;;  %s795_s15 = sadd.s32 6, %s2211_s26 }
 0x119   : > { %774 = vst [vmem:[#allocation2 + $0x71] sm:$0x1] %v773_v5  ;;  %s777_s10 = scalar_lea.vmem [#allocation7], %s776_s17  ;;  %s796_s19 = sld [smem:[#allocation5 + %s795_s15]]  ;;  %v1217_v53 = vrot.slane %v1216_v47, 2 }
 0x11a   : > { %v778_v28 = vld [vmem:[%s777_s10] sm:$0x1]  ;;  %s800_s24 = sadd.s32 7, %s2211_s26  ;;  %s782_s23 = scalar_lea.vmem [#allocation7], %s781_s20  ;;  %v971_v13 = vpop.xlane.xlu0 %970  ;;  %v1000_v22 = vmul.f32 1.442695, %v969_v11 }
 0x11b   : > { %779 = vst [vmem:[#allocation2 + $0x72] sm:$0x1] %v778_v28  ;;  %s801_s16 = sld [smem:[#allocation5 + %s800_s24]]  ;;  %v783_v29 = vld [vmem:[%s782_s23] sm:$0x1]  ;;  %v1218_v58 = vadd.f32 %v1217_v53, %v1216_v47  ;;  %s2275_s26 = sand.u32 1, %s1786_s1  }
 0x11c   : > { %784 = vst [vmem:[#allocation2 + $0x73] sm:$0x1] %v783_v29  ;;  %s787_s25 = scalar_lea.vmem [#allocation7], %s786_s21  ;;  %v1004_v23 = vmul.f32 1.442695, %v973_v10  ;;  %1610 = vpow2.f32 %v1000_v22  ;;  %s1510_s2 = sshll.u32 %s2275_s26, 3 }
 0x11d   : > { %v788_v30 = vld [vmem:[%s787_s25] sm:$0x1]  ;;  %v1219_v0 = vrot.slane %v1218_v58, 1  ;;  %v1002_v46 = vmul.f32 1.442695, %v971_v13  ;;  %s150_s20 = scalar_lea.vmem [#allocation10], %s1510_s2 }
 0x11e   : > { %789 = vst [vmem:[#allocation2 + $0x74] sm:$0x1] %v788_v30  ;;  %s792_s29 = scalar_lea.vmem [#allocation7], %s791_s28  ;;  %1612 = vpow2.f32 %v1004_v23  ;;  %s1523_s27 = sshll.u32 %s1865_s6, 7 }
 0x11f   : > { %v860_v31 = vld [vmem:[#allocation2 + $0x78] sm:$0xff]  ;;  %v793_v33 = vld [vmem:[%s792_s29] sm:$0x1]  ;;  %s797_s7 = scalar_lea.vmem [#allocation7], %s796_s19  ;;  %v1220_v3 = vadd.f32 %v1219_v0, %v1218_v58  ;;  %1614 = vpow2.f32 %v1002_v46  ;;  %s1265_s18 = sshll.u32 %s150_s20, 4  ;;  %s1266_s18 = int_to_ptr.vmem [resolvable:$true] %s1265_s18 }
 0x120   : > { %v967_v34 = vmul.f32 %v2099_v37, %v860_v31  ;;  %794 = vst [vmem:[#allocation2 + $0x75] sm:$0x1] %v793_v33  ;;  %v798_v35 = vld [vmem:[%s797_s7] sm:$0x1]  ;;  %s2287_s9 = scalar_lea.hbm %s2359_s3, %s1523_s27  ;;  %s1247_s28 = scalar_lea.sflag [#allocation9], %s2275_s26 }
 0x121   : > { %799 = vst [vmem:[#allocation2 + $0x76] sm:$0x1] %v798_v35  ;;  %s802_s17 = scalar_lea.vmem [#allocation7], %s801_s16  ;;  %s1694_s22 = scalar_lea.vmem %s1266_s18, 128 }
 0x122   : > { %998 = vadd.xlane.f32.xlu1 %v967_v34  ;;  %v803_v36 = vld [vmem:[%s802_s17] sm:$0x1]  ;;  %p1695_p13 = scmp.ne.s32.totalorder %s1266_s18, %s1694_s22  ;;  %s1802_s15 = smov [#allocation10]  }
 0x123   : > { %804 = vst [vmem:[#allocation2 + $0x77] sm:$0x1] %v803_v36  ;;  %s1698_s10 = sshll.u32 %s1802_s15, 4  ;;  %s1699_s10 = int_to_ptr.vmem [resolvable:$false] %s1698_s10 }
 0x124   : > { %p1696_p3 = pnand %p1695_p13, %p2374_p0  ;;  %s1700_s19 = scalar_lea.vmem %s1699_s10, 256 }
 0x125   : > { %p1701_p6 = scmp.lt.s32.totalorder %s1266_s18, %s1699_s10  ;;  %p1702_p10 = scmp.lt.s32.totalorder %s1700_s19, %s1694_s22 }
 0x126   : > { %v975_v12 = vpop.xlane.xlu1 %974  ;;  %v1611_v43 = vpop.eup %1610  ;;  %p1697_p4 = pneg %p1696_p3 }
 0x127   : > { %v1006_v25 = vmul.f32 1.442695, %v975_v12  ;;  %p1703_p11 = por %p1702_p10, %p1701_p6 }
 0x128   : > { %v1613_v27 = vpop.eup %1612 }
 0x129   : > { %1616 = vpow2.f32 %v1006_v25  ;;  %v1065_v59 = vrot.slane %v1613_v27, %v1053_v16  ;;  %p1704_p12 = pnand %p1703_p11, %p1697_p4 }
 0x12a   : > { %v859_v38 = vld [vmem:[#allocation2 + $0x70] sm:$0xff] }
 0x12b   : > { %v966_v39 = vmul.f32 %v2099_v37, %v859_v38  ;;  %v1222_v44 = vrot.slane %v859_v38, 4  ;;  %v1210_v37 = vrot.slane %v1209_v50, 2 }
 0x12d   : > { %996 = vadd.xlane.f32.xlu0 %v966_v39  ;;  %v1223_v49 = vadd.f32 %v1222_v44, %v859_v38  ;;  %v1211_v57 = vadd.f32 %v1210_v37, %v1209_v50  ;;  %v1615_v44 = vpop.eup %1614  ;;  %v1055_v50 = vadd.s32 4294967288, %v2252_v32 }
 0x12f   : > { %v1224_v55 = vrot.slane %v1223_v49, 2  ;;  %v1212_v41 = vrot.slane %v1211_v57, 1  ;;  %v1058_v37 = vsub.s32 %v1055_v50, %v1957_v20 }
 0x131   : > { %v1225_v62 = vadd.f32 %v1224_v55, %v1223_v49  ;;  %v1213_v60 = vadd.f32 %v1212_v41, %v1211_v57  ;;  %v1059_v63 = vrot.slane %v1615_v44, %v1058_v37 }
 0x133   : > { %v1226_v17 = vrot.slane %v1225_v62, 1  ;;  %v1240_v7 = vsel %vm1133_vm4, %v1213_v60, %v1239_v6  ;;  %v1617_v47 = vpop.eup %1616 }
 0x134   : > { %v1241_v8 = vsel %vm1135_vm5, %v1220_v3, %v1240_v7  ;;  %v977_v15 = vpop.xlane.xlu0 %976  ;;  %v1069_v57 = vrot.slane %v1617_v47, %v1058_v37  ;;  %v1054_v3 = vrot.slane %v1611_v43, %v1053_v16 }
 0x135   : > { %v1227_v51 = vadd.f32 %v1226_v17, %v1225_v62  ;;  %v1008_v26 = vmul.f32 1.442695, %v977_v15 }
 0x136   : > { %v1070_v20 = vsel %vm1060_vm7, %v1069_v57, %v1065_v59  ;;  %v1061_v4 = vsel %vm1060_vm7, %v1059_v63, %v1054_v3 }
 0x137   : > { %v2249_v9 = vsel %vm1137_vm6, %v1227_v51, %v1241_v8  ;;  %1618 = vpow2.f32 %v1008_v26  ;;  %v1126_v11 = vsel %vm1125_vm0, %v1070_v20, %v1061_v4 }
 0x138   : > { %1244 = vst [vmem:[%s150_s20] sm:$0xff] %v2249_v9 }
 0x140   : > { %v979_v14 = vpop.xlane.xlu1 %978 }
 0x141   : > { %v1010_v28 = vmul.f32 1.442695, %v979_v14  ;;  %v1619_v48 = vpop.eup %1618 }
 0x142   : > { %v1074_v41 = vrot.slane %v1619_v48, %v1053_v16 }
 0x143   : > { %1620 = vpow2.f32 %v1010_v28 }
 0x14c   : > { %v987_v18 = vpop.xlane.xlu1 %986 }
 0x14d   : > { %v1018_v29 = vmul.f32 1.442695, %v987_v18  ;;  %v1621_v49 = vpop.eup %1620 }
 0x14e   : > { %v1078_v0 = vrot.slane %v1621_v49, %v1058_v37 }
 0x14f   : > { %1622 = vpow2.f32 %v1018_v29 }
 0x150   : > { %v1079_v6 = vsel %vm1060_vm7, %v1078_v0, %v1074_v41 }
 0x158   : > { %v985_v61 = vpop.xlane.xlu0 %984 }
 0x159   : > { %v1016_v34 = vmul.f32 1.442695, %v985_v61  ;;  %v1623_v52 = vpop.eup %1622  ;;  %v1128_v61 = vsel %vm1127_vm1, %v1079_v6, %v1126_v11 }
 0x15a   : > { %v1096_v14 = vrot.slane %v1623_v52, %v1058_v37 }
 0x164   : > { %v983_v19 = vpop.xlane.xlu1 %982 }
 0x165   : > { %v1014_v30 = vmul.f32 1.442695, %v983_v19 }
 0x167   : > { %1624 = vpow2.f32 %v1014_v30 }
 0x171   : > { %v981_v21 = vpop.xlane.xlu0 %980  ;;  %v1625_v53 = vpop.eup %1624 }
 0x172   : > { %v1012_v33 = vmul.f32 1.442695, %v981_v21  ;;  %v1087_v2 = vrot.slane %v1625_v53, %v1058_v37 }
 0x174   : > { %1626 = vpow2.f32 %v1012_v33 }
 0x175   : > { %1628 = vpow2.f32 %v1016_v34 }
 0x17d   : > { %v991_v24 = vpop.xlane.xlu1 %990 }
 0x17e   : > { %v1022_v35 = vmul.f32 1.442695, %v991_v24  ;;  %v1627_v55 = vpop.eup %1626 }
 0x17f   : > { %v1629_v58 = vpop.eup %1628  ;;  %v1083_v17 = vrot.slane %v1627_v55, %v1053_v16 }
 0x180   : > { %1630 = vpow2.f32 %v1022_v35  ;;  %v1092_v13 = vrot.slane %v1629_v58, %v1053_v16 }
 0x181   : > { %v1088_v7 = vsel %vm1060_vm7, %v1087_v2, %v1083_v17 }
 0x182   : > { %v1130_v19 = vsel %vm1129_vm2, %v1088_v7, %v1128_v61  ;;  %v1097_v24 = vsel %vm1060_vm7, %v1096_v14, %v1092_v13 }
 0x183   : > { %v1132_v26 = vsel %vm1131_vm3, %v1097_v24, %v1130_v19 }
 0x189   : > { %v989_v5 = vpop.xlane.xlu0 %988 }
 0x18a   : > { %v1020_v38 = vmul.f32 1.442695, %v989_v5  ;;  %v1631_v62 = vpop.eup %1630 }
 0x18b   : > { %v1105_v10 = vrot.slane %v1631_v62, %v1058_v37 }
 0x18c   : > { %1632 = vpow2.f32 %v1020_v38 }
 0x195   : > { %v995_v31 = vpop.xlane.xlu1 %994 }
 0x196   : > { %v1026_v39 = vmul.f32 1.442695, %v995_v31  ;;  %v1633_v1 = vpop.eup %1632 }
 0x197   : > { %v1101_v8 = vrot.slane %v1633_v1, %v1053_v16 }
 0x198   : > { %1634 = vpow2.f32 %v1026_v39 }
 0x199   : > { %v1106_v21 = vsel %vm1060_vm7, %v1105_v10, %v1101_v8 }
 0x19a   : > { %v1134_v5 = vsel %vm1133_vm4, %v1106_v21, %v1132_v26 }
 0x1a2   : > { %v1635_v60 = vpop.eup %1634 }
 0x1a3   : > { %v993_v36 = vpop.xlane.xlu0 %992  ;;  %v1114_v18 = vrot.slane %v1635_v60, %v1058_v37 }
 0x1a4   : > { %v1024_v40 = vmul.f32 1.442695, %v993_v36 }
 0x1a6   : > { %1636 = vpow2.f32 %v1024_v40 }
 0x1af   : > { %v999_v42 = vpop.xlane.xlu1 %998 }
 0x1b0   : > { %v1030_v45 = vmul.f32 1.442695, %v999_v42  ;;  %v1637_v51 = vpop.eup %1636 }
 0x1b1   : > { %v1110_v15 = vrot.slane %v1637_v51, %v1053_v16 }
 0x1b2   : > { %1638 = vpow2.f32 %v1030_v45 }
 0x1b3   : > { %v1115_v46 = vsel %vm1060_vm7, %v1114_v18, %v1110_v15 }
 0x1b4   : > { %v1136_v29 = vsel %vm1135_vm5, %v1115_v46, %v1134_v5 }
 0x1ba   : > { %v997_v54 = vpop.xlane.xlu0 %996 }
 0x1bb   : > { %v1028_v56 = vmul.f32 1.442695, %v997_v54 }
 0x1bc   : > { %v1639_v12 = vpop.eup %1638 }
 0x1bd   : > { %1640 = vpow2.f32 %v1028_v56  ;;  %v1123_v22 = vrot.slane %v1639_v12, %v1058_v37 }
 0x1c7   : > { %v1641_v23 = vpop.eup %1640 }
 0x1c8   : > { %v1119_v25 = vrot.slane %v1641_v23, %v1053_v16 }
 0x1ca   : > { %v1124_v28 = vsel %vm1060_vm7, %v1123_v22, %v1119_v25 }
 0x1cb   : > { %v1138_v30 = vsel %vm1137_vm6, %v1124_v28, %v1136_v29 }
 0x1cc   : > { %v1145_v31 = vsel %vm1034_vm8, 0.0, %v1138_v30  ;;  %v1140_v33 = vsel %vm1034_vm8, %v1138_v30, 0.0 }
 0x1cd   : > { %v1146_v34 = vsel %vm1141_vm9, %v1145_v31, 0.0  ;;  %v1142_v35 = vsel %vm1141_vm9, %v1140_v33, 0.0 }
 0x1ce   : > { %1147 = vadd.xlane.f32.xlu0 %v1146_v34  ;;  %1143 = vadd.xlane.f32.xlu1 %v1142_v35 }
 0x1cf   : > { %1707 = shalt.err (!%p1704_p12)
}
 0x1d0   : > { %s1708_s24 = scalar_lea.hbm %s2287_s9, 128  ;;  %s1712_s25 = scalar_lea.hbm %s2359_s3, 256 }
 0x1d1   : > { %p1709_p1 = scmp.ne.s32.totalorder %s2287_s9, %s1708_s24  ;;  %p1713_p7 = scmp.lt.u32.totalorder %s2287_s9, %s2359_s3 }
 0x1d2   : > { %p1714_p9 = scmp.lt.u32.totalorder %s1712_s25, %s1708_s24  ;;  %p1716_p13 = scmp.lt.u32.totalorder %s1708_s24, %s2287_s9 }
 0x1d3   : > { %p1710_p2 = pnand %p1709_p1, %p2374_p0 }
 0x1d4   : > { %p1715_p8 = por %p1714_p9, %p1713_p7 }
 0x1d5   : > { %p1711_p5 = pneg %p1710_p2 }
 0x1d6   : > { %p1717_p3 = por %p1716_p13, %p1715_p8 }
 0x1d8   : > { %p1718_p4 = pnand %p1717_p3, %p1711_p5 }
 0x1da   : > { %1721 = shalt.err (!%p1718_p4)
}
 0x1db   : > { %1553 = dma.vmem_to_hbm [thread:$0]  (%p2374_p0), %s1266_s18, 128, %s2287_s9, %s1247_s28  }
 0x1dc   : > { %s157_s17 = scalar_lea.vmem [#allocation11], %s1510_s2  ;;  %s2314_s22 = scalar_lea.hbm %s2360_s4, %s1523_s27 }
 0x1dd   : > { %s1278_s20 = sshll.u32 %s157_s17, 4  ;;  %s1252_s18 = scalar_lea.sflag [#allocation12], %s2275_s26  ;;  %s2316_s20 = int_to_ptr.vmem [resolvable:$true] %s1278_s20 }
 0x1de   : > { %s1722_s9 = scalar_lea.vmem %s2316_s20, 128  ;;  %s1803_s2 = smov [#allocation11]  }
 0x1df   : > { %p1723_p6 = scmp.ne.s32.totalorder %s2316_s20, %s1722_s9  ;;  %s1726_s28 = sshll.u32 %s1803_s2, 4  ;;  %s1727_s28 = int_to_ptr.vmem [resolvable:$false] %s1726_s28 }
 0x1e0   : > { %s1728_s6 = scalar_lea.vmem %s1727_s28, 256  ;;  %p1729_p12 = scmp.lt.s32.totalorder %s2316_s20, %s1727_s28 }
 0x1e1   : > { %p1724_p10 = pnand %p1723_p6, %p2374_p0  ;;  %p1730_p1 = scmp.lt.s32.totalorder %s1728_s6, %s1722_s9 }
 0x1e3   : > { %p1725_p11 = pneg %p1724_p10  ;;  %p1731_p2 = por %p1730_p1, %p1729_p12 }
 0x1e5   : > { %p1732_p5 = pnand %p1731_p2, %p1725_p11 }
 0x25b   : > { %v1148_v9 = vpop.xlane.xlu0 %1147  ;;  %v1144_v38 = vpop.xlane.xlu1 %1143 }
 0x25c   : > { %1642 = vrcp.f32 %v1148_v9 }
 0x266   : > { %v1643_v36 = vpop.eup %1642 }
 0x267   : > { %v1150_v39 = vmul.f32 %v1643_v36, %v1144_v38 }
 0x269   : > { %1245 = vst [vmem:[%s157_s17] sm:$0xff] %v1150_v39 }
 0x26a   : > { %1735 = shalt.err (!%p1732_p5)
}
 0x26b   : > { %s1736_s26 = scalar_lea.hbm %s2314_s22, 128  ;;  %s1740_s10 = scalar_lea.hbm %s2360_s4, 256 }
 0x26c   : > { %p1737_p7 = scmp.ne.s32.totalorder %s2314_s22, %s1736_s26  ;;  %p1741_p13 = scmp.lt.u32.totalorder %s2314_s22, %s2360_s4 }
 0x26d   : > { %p1742_p3 = scmp.lt.u32.totalorder %s1740_s10, %s1736_s26  ;;  %p1744_p6 = scmp.lt.u32.totalorder %s1736_s26, %s2314_s22 }
 0x26e   : > { %p1738_p9 = pnand %p1737_p7, %p2374_p0 }
 0x26f   : > { %p1743_p4 = por %p1742_p3, %p1741_p13 }
 0x270   : > { %p1739_p8 = pneg %p1738_p9 }
 0x271   : > { %p1745_p10 = por %p1744_p6, %p1743_p4 }
 0x273   : > { %p1746_p11 = pnand %p1745_p10, %p1739_p8 }
 0x275   : > { %1749 = shalt.err (!%p1746_p11)
}
 0x276   : > { %1554 = dma.vmem_to_hbm [thread:$0]  (%p2374_p0), %s2316_s20, 128, %s2314_s22, %s1252_s18  }
 0x277 PF: > { %p1570_p12 = scmp.ge.s32.totalorder %s1794_s5, 2  ;;  %s1290_s16 = sand.u32 1, %s1782_s0  }
 0x278   : > { %p2375_p1 = scmp.ne.s32.totalorder %s2367_s13, 0  ;;  %s1291_s23 = scalar_lea.sflag [#allocation9], %s1290_s16 }
 0x27a   : > { %p1562_p2 = pnand %p1570_p12, %p2375_p1 }
 0x27c   : > { %1773 = dma.done.wait (!%p1562_p2), %s1291_s23, 128  }
 0x27d   : > { %1775 = vsyncadd (!%p1562_p2), %s1291_s23, 4294967168  ;;  %s1300_s25 = scalar_lea.sflag [#allocation12], %s1290_s16 }
 0x27e   : > { %1777 = dma.done.wait (!%p1562_p2), %s1300_s25, 128  }
 0x27f   : > { %1779 = vsyncadd (!%p1562_p2), %s1300_s25, 4294967168  ;;  %p27_p0 = scmp.ge.s32.totalorder %s1869_s8, 4   ;;  %s2376_s0 = smov %s1786_s1 }
 0x280   : > { %s2377_s1 = smov %s1790_s30  ;;  %s2378_s30 = smov %s1880_s11 }
 0x281   : > { %s2379_s5 = smov %s1869_s8  ;;  %29 = sbr.rel (!%p27_p0) target bundleno = 28 (0x1c), region = 221 }
 0x288   :  { %1305 = vsyncpa [#allocation8], 1 }
 0x289   :  { %1307 = vsyncpa [#allocation8 + $0x1], 1 }
 0x28a   :  { %1308 = vsyncpa [#allocation9], 1 }
 0x28b   :  { %1310 = vsyncpa [#allocation9 + $0x1], 1 }
 0x28c   :  { %1311 = vsyncpa [#allocation12], 1 }
 0x28d   :  { %1313 = vsyncpa [#allocation12 + $0x1], 1 }

</bundles_post_ra>
